<compile_context>
chip_gen: v7x
topology: tpu7x:2x2x1
jax: 0.10.0
libtpu: 0.0.40
codegen_flags: <defaults>
</compile_context>

<pallas_src>
import numpy as np
import jax
import jax.numpy as jnp
from jax.experimental import pallas as pl
from jax.experimental.pallas import tpu as pltpu

# ---------------- configuration (small, consistent with the module) ----------------
DIM = 32            # channels
RES = (8, 8)        # input resolution (H, W)
DEPTH = 2           # number of Swin blocks (even -> shift 0, odd -> shift ws//2)
HEADS = 4           # attention heads
WS = 4              # window size
MLP_RATIO = 4.0
B = 2               # batch

H, W = RES
L = H * W                           # 64 tokens
N = WS * WS                         # 16 tokens per window
HD = DIM // HEADS                   # 8
SCALE = HD ** (-0.5)
HIDDEN = int(DIM * MLP_RATIO)       # 128
NW = (H // WS) * (W // WS)          # 4 windows
LN_EPS = 1e-5
NEG_INF = -1e9                      # off-window bias -> exp underflows to exactly 0.0 in f32
INV_SQRT2 = 0.7071067811865476


# ---------------- Pallas kernel: whole BasicLayer, one batch item per grid step ----------------
def _basic_layer_kernel(x_ref, wqkv_ref, bias_ref, wp_ref, w1_ref, w2_ref,
                        vecc_ref, vech_ref, o_ref, attn_scr):
    """All DEPTH Swin blocks for one batch item, fully VMEM resident.

    Per block d (static unroll):
        y = x + proj(W-MSA(LN1(x)))   # attention in original token order, bias pre-conjugated
        x = y + MLP(LN2(y))
    """
    x = x_ref[0]                                              # (L, C)
    for d in range(DEPTH):                                    # DEPTH=2, static unroll
        g1, be1, bp  = vecc_ref[d, 0, :], vecc_ref[d, 1, :], vecc_ref[d, 2, :]
        g2, be2, bm2 = vecc_ref[d, 3, :], vecc_ref[d, 4, :], vecc_ref[d, 5, :]
        bqkv = vech_ref[d, 0, :3 * DIM]
        bm1  = vech_ref[d, 1, :]

        # ---- LayerNorm 1 (per-token) ----
        mu = jnp.mean(x, axis=-1, keepdims=True)
        var = jnp.mean((x - mu) ** 2, axis=-1, keepdims=True)
        xn = (x - mu) * jax.lax.rsqrt(var + LN_EPS) * g1 + be1

        # ---- fused QKV: one (L, C) @ (C, 3C) matmul ----
        qkv = jnp.dot(xn, wqkv_ref[d], preferred_element_type=jnp.float32) + bqkv
        q = qkv[:, :DIM] * SCALE
        k = qkv[:, DIM:2 * DIM]
        v = qkv[:, 2 * DIM:]

        # ---- per-head W-MSA over all windows at once (block-diag bias, NEG_INF off-window) ----
        for h in range(HEADS):                                # HEADS=4, static unroll
            qh = q[:, h * HD:(h + 1) * HD]
            kh = k[:, h * HD:(h + 1) * HD]
            vh = v[:, h * HD:(h + 1) * HD]
            s = jax.lax.dot_general(qh, kh, (((1,), (1,)), ((), ())),
                                    preferred_element_type=jnp.float32)   # (L, L) = qh @ kh.T
            s = s + bias_ref[d, h]
            s = s - jnp.max(s, axis=-1, keepdims=True)        # keeps off-window exp() exactly 0
            e = jnp.exp(s)
            p = e * (1.0 / jnp.sum(e, axis=-1, keepdims=True))
            # head output straight into its column slab -> one projection matmul below
            attn_scr[:, h * HD:(h + 1) * HD] = jnp.dot(p, vh,
                                                       preferred_element_type=jnp.float32)

        # ---- single (L,C)@(C,C) output projection + residual 1 ----
        y = x + jnp.dot(attn_scr[...], wp_ref[d], preferred_element_type=jnp.float32) + bp

        # ---- LayerNorm 2 + MLP (exact-erf GELU, matches nn.GELU) + residual 2 ----
        mu2 = jnp.mean(y, axis=-1, keepdims=True)
        var2 = jnp.mean((y - mu2) ** 2, axis=-1, keepdims=True)
        yn = (y - mu2) * jax.lax.rsqrt(var2 + LN_EPS) * g2 + be2
        hid = jnp.dot(yn, w1_ref[d], preferred_element_type=jnp.float32) + bm1
        hid = 0.5 * hid * (1.0 + jax.lax.erf(hid * jnp.float32(INV_SQRT2)))
        x = y + jnp.dot(hid, w2_ref[d], preferred_element_type=jnp.float32) + bm2

    o_ref[0] = x


# ---------------- pallas_call wrapper ----------------
def run_basic_layer(x, sp):
    bsz = x.shape[0]
    return pl.pallas_call(
        _basic_layer_kernel,
        out_shape=jax.ShapeDtypeStruct((bsz, L, DIM), jnp.float32),
        grid_spec=pltpu.PrefetchScalarGridSpec(
            num_scalar_prefetch=0,
            grid=(bsz,),
            in_specs=[
                pl.BlockSpec((1, L, DIM), lambda b: (b, 0, 0)),              # x (one batch item)
                pl.BlockSpec((DEPTH, DIM, 3 * DIM), lambda b: (0, 0, 0)),    # stacked fused Wqkv
                pl.BlockSpec((DEPTH, HEADS, L, L), lambda b: (0, 0, 0, 0)),  # stacked fused bias
                pl.BlockSpec((DEPTH, DIM, DIM), lambda b: (0, 0, 0)),        # stacked Wproj
                pl.BlockSpec((DEPTH, DIM, HIDDEN), lambda b: (0, 0, 0)),     # stacked W1
                pl.BlockSpec((DEPTH, HIDDEN, DIM), lambda b: (0, 0, 0)),     # stacked W2
                pl.BlockSpec((DEPTH, 8, DIM), lambda b: (0, 0, 0)),          # packed C-wide vecs
                pl.BlockSpec((DEPTH, 2, HIDDEN), lambda b: (0, 0, 0)),       # packed bqkv | bm1
            ],
            out_specs=pl.BlockSpec((1, L, DIM), lambda b: (b, 0, 0)),
            scratch_shapes=[pltpu.VMEM((L, DIM), jnp.float32)],              # per-head attn slab
        ),
        compiler_params=pltpu.CompilerParams(dimension_semantics=("parallel",)),
    )(x, sp["wqkv"], sp["bias"], sp["wp"], sp["w1"], sp["w2"], sp["vecc"], sp["vech"])


# ---------------- static helpers: permutation, rel-pos index, shift mask ----------------
def window_perm(h, w, ws, shift):
    """perm[p] = original token index occupying permuted (window-major) position p."""
    idx = np.arange(h * w).reshape(h, w)
    if shift > 0:
        idx = np.roll(idx, (-shift, -shift), axis=(0, 1))
    return idx.reshape(h // ws, ws, w // ws, ws).transpose(0, 2, 1, 3).reshape(-1)


def relative_position_index(ws):
    coords = np.stack(np.meshgrid(np.arange(ws), np.arange(ws), indexing="ij"))   # (2, ws, ws)
    coords_flatten = coords.reshape(2, -1)                                        # (2, N)
    rel = coords_flatten[:, :, None] - coords_flatten[:, None, :]                 # (2, N, N)
    rel = rel.transpose(1, 2, 0).astype(np.int64)
    rel[:, :, 0] += ws - 1
    rel[:, :, 1] += ws - 1
    rel[:, :, 0] *= 2 * ws - 1
    return rel.sum(-1)                                                            # (N, N)


def shifted_attn_mask(h, w, ws, shift):
    img_mask = np.zeros((1, h, w, 1), dtype=np.float32)
    slices = (slice(0, -ws), slice(-ws, -shift), slice(-shift, None))
    cnt = 0
    for hs in slices:
        for wsl in slices:
            img_mask[:, hs, wsl, :] = cnt
            cnt += 1
    m = img_mask.reshape(1, h // ws, ws, w // ws, ws, 1)
    m = m.transpose(0, 1, 3, 2, 4, 5).reshape(-1, ws * ws)              # (nW, N)
    attn_mask = m[:, None, :] - m[:, :, None]                           # (nW, N, N)
    return jnp.asarray(np.where(attn_mask != 0, -100.0, 0.0).astype(np.float32))


REL_INDEX = relative_position_index(WS)                                 # (N, N) numpy
SHIFT_MASK = shifted_attn_mask(H, W, WS, WS // 2)                       # (nW, N, N)


def build_block_bias(rel_table, shift):
    """(HEADS, L, L) bias, in ORIGINAL token order.

    Step 1: block-diagonal bias in window-permuted space = rel-pos bias + shift mask per window,
            NEG_INF off the diagonal blocks (cross-window entries -> exp underflow to 0).
    Step 2: conjugate by the window permutation so the kernel needs no token gather at all.
    """
    rel = rel_table[REL_INDEX.reshape(-1)].reshape(N, N, HEADS).transpose(2, 0, 1)  # (HEADS,N,N)
    if shift > 0:
        win_mask = SHIFT_MASK                                           # (NW, N, N)
    else:
        win_mask = jnp.zeros((NW, N, N), jnp.float32)
    per_win = rel[None, :, :, :] + win_mask[:, None, :, :]              # (NW, HEADS, N, N)
    bias_win = jnp.full((HEADS, L, L), NEG_INF, dtype=jnp.float32)
    for wdx in range(NW):
        bias_win = bias_win.at[:, wdx * N:(wdx + 1) * N, wdx * N:(wdx + 1) * N].set(per_win[wdx])
    perm = window_perm(H, W, WS, shift)                                 # window-space -> original
    inv = np.argsort(perm)                                              # original -> window-space
    return bias_win[:, inv, :][:, :, inv]                               # B_orig[i,j]=B_win[inv i,inv j]


# ---------------- parameters ----------------
def init_block_params(key):
    ks = jax.random.split(key, 12)
    std = 0.02
    return {
        "g1": 1.0 + std * jax.random.normal(ks[5], (DIM,), jnp.float32),
        "be1": std * jax.random.normal(ks[6], (DIM,), jnp.float32),
        "wqkv": std * jax.random.normal(ks[0], (DIM, 3 * DIM), jnp.float32),
        "bqkv": std * jax.random.normal(ks[7], (3 * DIM,), jnp.float32),
        "rel_table": std * jax.random.normal(ks[1], ((2 * WS - 1) ** 2, HEADS), jnp.float32),
        "wp": std * jax.random.normal(ks[2], (DIM, DIM), jnp.float32),
        "bp": std * jax.random.normal(ks[8], (DIM,), jnp.float32),
        "g2": 1.0 + std * jax.random.normal(ks[9], (DIM,), jnp.float32),
        "be2": std * jax.random.normal(ks[10], (DIM,), jnp.float32),
        "w1": std * jax.random.normal(ks[3], (DIM, HIDDEN), jnp.float32),
        "bm1": std * jax.random.normal(ks[11], (HIDDEN,), jnp.float32),
        "w2": std * jax.random.normal(ks[4], (HIDDEN, DIM), jnp.float32),
        "bm2": jnp.zeros((DIM,), jnp.float32),
    }


def pack_vectors(p):
    """Pack the small per-block vectors into two lane-/sublane-friendly slabs."""
    vecc = jnp.zeros((8, DIM), jnp.float32)
    for i, name in enumerate(["g1", "be1", "bp", "g2", "be2", "bm2"]):
        vecc = vecc.at[i].set(p[name])
    vech = jnp.zeros((2, HIDDEN), jnp.float32)
    vech = vech.at[0, :3 * DIM].set(p["bqkv"])
    vech = vech.at[1].set(p["bm1"])
    return vecc, vech


def stack_layer(params_list):
    """Stack per-block weights along a leading depth axis for the single fused kernel."""
    biases, veccs, vechs = [], [], []
    for i, p in enumerate(params_list):
        shift = 0 if i % 2 == 0 else WS // 2
        biases.append(build_block_bias(p["rel_table"], shift))
        c, hvec = pack_vectors(p)
        veccs.append(c)
        vechs.append(hvec)
    return {
        "wqkv": jnp.stack([p["wqkv"] for p in params_list]),
        "wp": jnp.stack([p["wp"] for p in params_list]),
        "w1": jnp.stack([p["w1"] for p in params_list]),
        "w2": jnp.stack([p["w2"] for p in params_list]),
        "bias": jnp.stack(biases),
        "vecc": jnp.stack(veccs),
        "vech": jnp.stack(vechs),
    }


# ---------------- BasicLayer forward (downsample=None) ----------------
@jax.jit
def basic_layer_forward(x, stacked):
    y = run_basic_layer(x, stacked)        # one fused kernel: all DEPTH blocks
    x_st = y
    # downsample=None in this BasicLayer instantiation -> (x_ST, x) are both the block output.
    return x_st, y


# ---------------- pure-JAX reference (mirrors the PyTorch module) ----------------
def _reference_block(x, p, shift):
    bsz, Lx, C = x.shape
    shortcut = x
    mu = x.mean(-1, keepdims=True)
    var = ((x - mu) ** 2).mean(-1, keepdims=True)
    xn = (x - mu) / jnp.sqrt(var + LN_EPS) * p["g1"] + p["be1"]
    xi = xn.reshape(bsz, H, W, C)
    if shift > 0:
        xi = jnp.roll(xi, (-shift, -shift), axis=(1, 2))
    xw = xi.reshape(bsz, H // WS, WS, W // WS, WS, C).transpose(0, 1, 3, 2, 4, 5).reshape(-1, N, C)
    qkv = xw @ p["wqkv"] + p["bqkv"]
    q, k, v = qkv[..., :DIM], qkv[..., DIM:2 * DIM], qkv[..., 2 * DIM:]
    q = q.reshape(-1, N, HEADS, HD).transpose(0, 2, 1, 3) * SCALE
    k = k.reshape(-1, N, HEADS, HD).transpose(0, 2, 1, 3)
    v = v.reshape(-1, N, HEADS, HD).transpose(0, 2, 1, 3)
    attn = q @ jnp.swapaxes(k, -1, -2)                                   # (B*NW, HEADS, N, N)
    rel = p["rel_table"][REL_INDEX.reshape(-1)].reshape(N, N, HEADS).transpose(2, 0, 1)
    attn = attn + rel[None]
    if shift > 0:
        attn = attn.reshape(bsz, NW, HEADS, N, N) + SHIFT_MASK[None, :, None]
        attn = attn.reshape(-1, HEADS, N, N)
    attn = jax.nn.softmax(attn, axis=-1)
    out = (attn @ v).transpose(0, 2, 1, 3).reshape(-1, N, C)
    out = out @ p["wp"] + p["bp"]
    out = out.reshape(bsz, H // WS, W // WS, WS, WS, C).transpose(0, 1, 3, 2, 4, 5)
    out = out.reshape(bsz, H, W, C)
    if shift > 0:
        out = jnp.roll(out, (shift, shift), axis=(1, 2))
    x = shortcut + out.reshape(bsz, Lx, C)
    mu2 = x.mean(-1, keepdims=True)
    var2 = ((x - mu2) ** 2).mean(-1, keepdims=True)
    xn2 = (x - mu2) / jnp.sqrt(var2 + LN_EPS) * p["g2"] + p["be2"]
    h1 = xn2 @ p["w1"] + p["bm1"]
    h1 = 0.5 * h1 * (1.0 + jax.lax.erf(h1 * INV_SQRT2))
    return x + h1 @ p["w2"] + p["bm2"]


def reference_basic_layer(x, params_list):
    for i, p in enumerate(params_list):
        x = _reference_block(x, p, 0 if i % 2 == 0 else WS // 2)
    return x


# ---------------- main ----------------
if __name__ == "__main__":
    key = jax.random.PRNGKey(0)
    kx, *kblocks = jax.random.split(key, DEPTH + 1)
    x = jax.random.normal(kx, (B, L, DIM), jnp.float32)                 # (2, 64, 32)
    params_list = [init_block_params(k) for k in kblocks]
    stacked = stack_layer(params_list)

    x_st, x_out = basic_layer_forward(x, stacked)
    jax.block_until_ready((x_st, x_out))

    # correctness check against a pure-JAX transcription of the PyTorch module
    ref = jax.block_until_ready(reference_basic_layer(x, params_list))
    assert x_st.shape == (B, L, DIM) and x_out.shape == (B, L, DIM)
    assert bool(jnp.all(jnp.isfinite(x_out)))
    np.testing.assert_allclose(np.asarray(x_out), np.asarray(ref), rtol=1e-3, atol=1e-3)

    print("KERNEL_OK")
</pallas_src>

<mosaic_0001>
module attributes {stable_mosaic.version = 11 : i64} {
  func.func @_basic_layer_kernel(%arg0: i32, %arg1: memref<1x64x32xf32, #tpu.memory_space<vmem>>, %arg2: memref<2x32x96xf32, #tpu.memory_space<vmem>>, %arg3: memref<2x4x64x64xf32, #tpu.memory_space<vmem>>, %arg4: memref<2x32x32xf32, #tpu.memory_space<vmem>>, %arg5: memref<2x32x128xf32, #tpu.memory_space<vmem>>, %arg6: memref<2x128x32xf32, #tpu.memory_space<vmem>>, %arg7: memref<2x8x32xf32, #tpu.memory_space<vmem>>, %arg8: memref<2x2x128xf32, #tpu.memory_space<vmem>>, %arg9: memref<1x64x32xf32, #tpu.memory_space<vmem>>, %arg10: memref<64x32xf32, #tpu.memory_space<vmem>>) attributes {dimension_semantics = [#tpu.dimension_semantics<parallel>], iteration_bounds = array<i64: 2>, scalar_prefetch = 0 : i64, scratch_operands = 1 : i64, tpu.core_type = #tpu.core_type<tc>, window_params = [{transform_indices = @transform_0, window_bounds = array<i64: 1, 64, 32>}, {pipeline_mode = #tpu.pipeline_mode<synchronous>, transform_indices = @transform_1, window_bounds = array<i64: 2, 32, 96>}, {pipeline_mode = #tpu.pipeline_mode<synchronous>, transform_indices = @transform_2, window_bounds = array<i64: 2, 4, 64, 64>}, {pipeline_mode = #tpu.pipeline_mode<synchronous>, transform_indices = @transform_3, window_bounds = array<i64: 2, 32, 32>}, {pipeline_mode = #tpu.pipeline_mode<synchronous>, transform_indices = @transform_4, window_bounds = array<i64: 2, 32, 128>}, {pipeline_mode = #tpu.pipeline_mode<synchronous>, transform_indices = @transform_5, window_bounds = array<i64: 2, 128, 32>}, {pipeline_mode = #tpu.pipeline_mode<synchronous>, transform_indices = @transform_6, window_bounds = array<i64: 2, 8, 32>}, {pipeline_mode = #tpu.pipeline_mode<synchronous>, transform_indices = @transform_7, window_bounds = array<i64: 2, 2, 128>}, {transform_indices = @transform_8, window_bounds = array<i64: 1, 64, 32>}]} {
    %c0 = arith.constant 0 : index
    %c0_0 = arith.constant 0 : index
    %c0_1 = arith.constant 0 : index
    %0 = vector.load %arg1[%c0, %c0_0, %c0_1] : memref<1x64x32xf32, #tpu.memory_space<vmem>>, vector<1x64x32xf32>
    %1 = vector.shape_cast %0 : vector<1x64x32xf32> to vector<64x32xf32>
    %c0_2 = arith.constant 0 : index
    %c0_3 = arith.constant 0 : index
    %c0_4 = arith.constant 0 : index
    %2 = vector.load %arg7[%c0_2, %c0_3, %c0_4] : memref<2x8x32xf32, #tpu.memory_space<vmem>>, vector<1x1x32xf32>
    %3 = vector.shape_cast %2 : vector<1x1x32xf32> to vector<32xf32>
    %c0_5 = arith.constant 0 : index
    %c1 = arith.constant 1 : index
    %c0_6 = arith.constant 0 : index
    %4 = vector.load %arg7[%c0_5, %c1, %c0_6] : memref<2x8x32xf32, #tpu.memory_space<vmem>>, vector<1x1x32xf32>
    %5 = vector.shape_cast %4 : vector<1x1x32xf32> to vector<32xf32>
    %c0_7 = arith.constant 0 : index
    %c2 = arith.constant 2 : index
    %c0_8 = arith.constant 0 : index
    %6 = vector.load %arg7[%c0_7, %c2, %c0_8] : memref<2x8x32xf32, #tpu.memory_space<vmem>>, vector<1x1x32xf32>
    %7 = vector.shape_cast %6 : vector<1x1x32xf32> to vector<32xf32>
    %c0_9 = arith.constant 0 : index
    %c3 = arith.constant 3 : index
    %c0_10 = arith.constant 0 : index
    %8 = vector.load %arg7[%c0_9, %c3, %c0_10] : memref<2x8x32xf32, #tpu.memory_space<vmem>>, vector<1x1x32xf32>
    %9 = vector.shape_cast %8 : vector<1x1x32xf32> to vector<32xf32>
    %c0_11 = arith.constant 0 : index
    %c4 = arith.constant 4 : index
    %c0_12 = arith.constant 0 : index
    %10 = vector.load %arg7[%c0_11, %c4, %c0_12] : memref<2x8x32xf32, #tpu.memory_space<vmem>>, vector<1x1x32xf32>
    %11 = vector.shape_cast %10 : vector<1x1x32xf32> to vector<32xf32>
    %c0_13 = arith.constant 0 : index
    %c5 = arith.constant 5 : index
    %c0_14 = arith.constant 0 : index
    %12 = vector.load %arg7[%c0_13, %c5, %c0_14] : memref<2x8x32xf32, #tpu.memory_space<vmem>>, vector<1x1x32xf32>
    %13 = vector.shape_cast %12 : vector<1x1x32xf32> to vector<32xf32>
    %c0_15 = arith.constant 0 : index
    %c0_16 = arith.constant 0 : index
    %c0_17 = arith.constant 0 : index
    %14 = vector.load %arg8[%c0_15, %c0_16, %c0_17] : memref<2x2x128xf32, #tpu.memory_space<vmem>>, vector<1x1x96xf32>
    %15 = vector.shape_cast %14 : vector<1x1x96xf32> to vector<96xf32>
    %c0_18 = arith.constant 0 : index
    %c1_19 = arith.constant 1 : index
    %c0_20 = arith.constant 0 : index
    %16 = vector.load %arg8[%c0_18, %c1_19, %c0_20] : memref<2x2x128xf32, #tpu.memory_space<vmem>>, vector<1x1x128xf32>
    %17 = vector.shape_cast %16 : vector<1x1x128xf32> to vector<128xf32>
    %cst = arith.constant dense<0.000000e+00> : vector<64xf32>
    %18 = vector.multi_reduction <add>, %1, %cst [1] : vector<64x32xf32> to vector<64xf32>
    %19 = vector.shape_cast %18 : vector<64xf32> to vector<64x1xf32>
    %cst_21 = arith.constant 3.200000e+01 : f32
    %20 = vector.broadcast %cst_21 : f32 to vector<64x1xf32>
    %21 = arith.divf %19, %20 : vector<64x1xf32>
    %22 = vector.broadcast %21 : vector<64x1xf32> to vector<64x32xf32>
    %23 = arith.subf %1, %22 : vector<64x32xf32>
    %24 = arith.mulf %23, %23 : vector<64x32xf32>
    %cst_22 = arith.constant dense<0.000000e+00> : vector<64xf32>
    %25 = vector.multi_reduction <add>, %24, %cst_22 [1] : vector<64x32xf32> to vector<64xf32>
    %26 = vector.shape_cast %25 : vector<64xf32> to vector<64x1xf32>
    %cst_23 = arith.constant 3.200000e+01 : f32
    %27 = vector.broadcast %cst_23 : f32 to vector<64x1xf32>
    %28 = arith.divf %26, %27 : vector<64x1xf32>
    %29 = vector.broadcast %21 : vector<64x1xf32> to vector<64x32xf32>
    %30 = arith.subf %1, %29 : vector<64x32xf32>
    %cst_24 = arith.constant 9.99999974E-6 : f32
    %31 = vector.broadcast %cst_24 : f32 to vector<64x1xf32>
    %32 = arith.addf %28, %31 : vector<64x1xf32>
    %33 = math.rsqrt %32 : vector<64x1xf32>
    %34 = vector.broadcast %33 : vector<64x1xf32> to vector<64x32xf32>
    %35 = arith.mulf %30, %34 : vector<64x32xf32>
    %36 = vector.shape_cast %3 : vector<32xf32> to vector<1x32xf32>
    %37 = vector.broadcast %36 : vector<1x32xf32> to vector<64x32xf32>
    %38 = arith.mulf %35, %37 : vector<64x32xf32>
    %39 = vector.shape_cast %5 : vector<32xf32> to vector<1x32xf32>
    %40 = vector.broadcast %39 : vector<1x32xf32> to vector<64x32xf32>
    %41 = arith.addf %38, %40 : vector<64x32xf32>
    %c0_25 = arith.constant 0 : index
    %c0_26 = arith.constant 0 : index
    %c0_27 = arith.constant 0 : index
    %42 = vector.load %arg2[%c0_25, %c0_26, %c0_27] : memref<2x32x96xf32, #tpu.memory_space<vmem>>, vector<1x32x96xf32>
    %43 = vector.shape_cast %42 : vector<1x32x96xf32> to vector<32x96xf32>
    %cst_28 = arith.constant dense<0.000000e+00> : vector<64x96xf32>
    %44 = tpu.matmul %41, %43, %cst_28 {dimension_numbers = #tpu.dot_dimension_numbers<[1], [0], [0], [1], [0, 0, 1, 1], [], []>} : vector<64x32xf32>, vector<32x96xf32>, vector<64x96xf32> -> vector<64x96xf32>
    %45 = vector.shape_cast %15 : vector<96xf32> to vector<1x96xf32>
    %46 = vector.broadcast %45 : vector<1x96xf32> to vector<64x96xf32>
    %47 = arith.addf %44, %46 : vector<64x96xf32>
    %48 = vector.extract_strided_slice %47 {offsets = [0, 0], sizes = [64, 32], strides = [1, 1]} : vector<64x96xf32> to vector<64x32xf32>
    %cst_29 = arith.constant 0.353553385 : f32
    %49 = vector.broadcast %cst_29 : f32 to vector<64x32xf32>
    %50 = arith.mulf %48, %49 : vector<64x32xf32>
    %51 = vector.extract_strided_slice %47 {offsets = [0, 32], sizes = [64, 32], strides = [1, 1]} : vector<64x96xf32> to vector<64x32xf32>
    %52 = vector.extract_strided_slice %47 {offsets = [0, 64], sizes = [64, 32], strides = [1, 1]} : vector<64x96xf32> to vector<64x32xf32>
    %53 = vector.extract_strided_slice %50 {offsets = [0, 0], sizes = [64, 8], strides = [1, 1]} : vector<64x32xf32> to vector<64x8xf32>
    %54 = vector.extract_strided_slice %51 {offsets = [0, 0], sizes = [64, 8], strides = [1, 1]} : vector<64x32xf32> to vector<64x8xf32>
    %55 = vector.extract_strided_slice %52 {offsets = [0, 0], sizes = [64, 8], strides = [1, 1]} : vector<64x32xf32> to vector<64x8xf32>
    %cst_30 = arith.constant dense<0.000000e+00> : vector<64x64xf32>
    %56 = tpu.matmul %53, %54, %cst_30 {dimension_numbers = #tpu.dot_dimension_numbers<[1], [1], [0], [0], [0, 0, 1, 0], [], []>} : vector<64x8xf32>, vector<64x8xf32>, vector<64x64xf32> -> vector<64x64xf32>
    %c0_31 = arith.constant 0 : index
    %c0_32 = arith.constant 0 : index
    %c0_33 = arith.constant 0 : index
    %c0_34 = arith.constant 0 : index
    %57 = vector.load %arg3[%c0_31, %c0_32, %c0_33, %c0_34] : memref<2x4x64x64xf32, #tpu.memory_space<vmem>>, vector<1x1x64x64xf32>
    %58 = vector.shape_cast %57 : vector<1x1x64x64xf32> to vector<64x64xf32>
    %59 = arith.addf %56, %58 : vector<64x64xf32>
    %cst_35 = arith.constant dense<0xFF800000> : vector<64xf32>
    %60 = vector.multi_reduction <maximumf>, %59, %cst_35 [1] : vector<64x64xf32> to vector<64xf32>
    %61 = vector.shape_cast %60 : vector<64xf32> to vector<64x1xf32>
    %62 = vector.broadcast %61 : vector<64x1xf32> to vector<64x64xf32>
    %63 = arith.subf %59, %62 : vector<64x64xf32>
    %64 = math.exp %63 : vector<64x64xf32>
    %cst_36 = arith.constant dense<0.000000e+00> : vector<64xf32>
    %65 = vector.multi_reduction <add>, %64, %cst_36 [1] : vector<64x64xf32> to vector<64xf32>
    %66 = vector.shape_cast %65 : vector<64xf32> to vector<64x1xf32>
    %cst_37 = arith.constant 1.000000e+00 : f32
    %67 = vector.broadcast %cst_37 : f32 to vector<64x1xf32>
    %68 = arith.divf %67, %66 : vector<64x1xf32>
    %69 = vector.broadcast %68 : vector<64x1xf32> to vector<64x64xf32>
    %70 = arith.mulf %64, %69 : vector<64x64xf32>
    %cst_38 = arith.constant dense<0.000000e+00> : vector<64x8xf32>
    %71 = tpu.matmul %70, %55, %cst_38 {dimension_numbers = #tpu.dot_dimension_numbers<[1], [0], [0], [1], [0, 0, 1, 1], [], []>} : vector<64x64xf32>, vector<64x8xf32>, vector<64x8xf32> -> vector<64x8xf32>
    %c0_39 = arith.constant 0 : index
    %c0_40 = arith.constant 0 : index
    %72 = vector.load %arg10[%c0_39, %c0_40] : memref<64x32xf32, #tpu.memory_space<vmem>>, vector<64x8xf32>
    tpu.vector_store %arg10[%c0_39, %c0_40], %71 {strides = array<i32>} : memref<64x32xf32, #tpu.memory_space<vmem>>, vector<64x8xf32>,
    %73 = vector.extract_strided_slice %50 {offsets = [0, 8], sizes = [64, 8], strides = [1, 1]} : vector<64x32xf32> to vector<64x8xf32>
    %74 = vector.extract_strided_slice %51 {offsets = [0, 8], sizes = [64, 8], strides = [1, 1]} : vector<64x32xf32> to vector<64x8xf32>
    %75 = vector.extract_strided_slice %52 {offsets = [0, 8], sizes = [64, 8], strides = [1, 1]} : vector<64x32xf32> to vector<64x8xf32>
    %cst_41 = arith.constant dense<0.000000e+00> : vector<64x64xf32>
    %76 = tpu.matmul %73, %74, %cst_41 {dimension_numbers = #tpu.dot_dimension_numbers<[1], [1], [0], [0], [0, 0, 1, 0], [], []>} : vector<64x8xf32>, vector<64x8xf32>, vector<64x64xf32> -> vector<64x64xf32>
    %c0_42 = arith.constant 0 : index
    %c1_43 = arith.constant 1 : index
    %c0_44 = arith.constant 0 : index
    %c0_45 = arith.constant 0 : index
    %77 = vector.load %arg3[%c0_42, %c1_43, %c0_44, %c0_45] : memref<2x4x64x64xf32, #tpu.memory_space<vmem>>, vector<1x1x64x64xf32>
    %78 = vector.shape_cast %77 : vector<1x1x64x64xf32> to vector<64x64xf32>
    %79 = arith.addf %76, %78 : vector<64x64xf32>
    %cst_46 = arith.constant dense<0xFF800000> : vector<64xf32>
    %80 = vector.multi_reduction <maximumf>, %79, %cst_46 [1] : vector<64x64xf32> to vector<64xf32>
    %81 = vector.shape_cast %80 : vector<64xf32> to vector<64x1xf32>
    %82 = vector.broadcast %81 : vector<64x1xf32> to vector<64x64xf32>
    %83 = arith.subf %79, %82 : vector<64x64xf32>
    %84 = math.exp %83 : vector<64x64xf32>
    %cst_47 = arith.constant dense<0.000000e+00> : vector<64xf32>
    %85 = vector.multi_reduction <add>, %84, %cst_47 [1] : vector<64x64xf32> to vector<64xf32>
    %86 = vector.shape_cast %85 : vector<64xf32> to vector<64x1xf32>
    %cst_48 = arith.constant 1.000000e+00 : f32
    %87 = vector.broadcast %cst_48 : f32 to vector<64x1xf32>
    %88 = arith.divf %87, %86 : vector<64x1xf32>
    %89 = vector.broadcast %88 : vector<64x1xf32> to vector<64x64xf32>
    %90 = arith.mulf %84, %89 : vector<64x64xf32>
    %cst_49 = arith.constant dense<0.000000e+00> : vector<64x8xf32>
    %91 = tpu.matmul %90, %75, %cst_49 {dimension_numbers = #tpu.dot_dimension_numbers<[1], [0], [0], [1], [0, 0, 1, 1], [], []>} : vector<64x64xf32>, vector<64x8xf32>, vector<64x8xf32> -> vector<64x8xf32>
    %c0_50 = arith.constant 0 : index
    %c8 = arith.constant 8 : index
    %92 = vector.load %arg10[%c0_50, %c8] : memref<64x32xf32, #tpu.memory_space<vmem>>, vector<64x8xf32>
    tpu.vector_store %arg10[%c0_50, %c8], %91 {strides = array<i32>} : memref<64x32xf32, #tpu.memory_space<vmem>>, vector<64x8xf32>,
    %93 = vector.extract_strided_slice %50 {offsets = [0, 16], sizes = [64, 8], strides = [1, 1]} : vector<64x32xf32> to vector<64x8xf32>
    %94 = vector.extract_strided_slice %51 {offsets = [0, 16], sizes = [64, 8], strides = [1, 1]} : vector<64x32xf32> to vector<64x8xf32>
    %95 = vector.extract_strided_slice %52 {offsets = [0, 16], sizes = [64, 8], strides = [1, 1]} : vector<64x32xf32> to vector<64x8xf32>
    %cst_51 = arith.constant dense<0.000000e+00> : vector<64x64xf32>
    %96 = tpu.matmul %93, %94, %cst_51 {dimension_numbers = #tpu.dot_dimension_numbers<[1], [1], [0], [0], [0, 0, 1, 0], [], []>} : vector<64x8xf32>, vector<64x8xf32>, vector<64x64xf32> -> vector<64x64xf32>
    %c0_52 = arith.constant 0 : index
    %c2_53 = arith.constant 2 : index
    %c0_54 = arith.constant 0 : index
    %c0_55 = arith.constant 0 : index
    %97 = vector.load %arg3[%c0_52, %c2_53, %c0_54, %c0_55] : memref<2x4x64x64xf32, #tpu.memory_space<vmem>>, vector<1x1x64x64xf32>
    %98 = vector.shape_cast %97 : vector<1x1x64x64xf32> to vector<64x64xf32>
    %99 = arith.addf %96, %98 : vector<64x64xf32>
    %cst_56 = arith.constant dense<0xFF800000> : vector<64xf32>
    %100 = vector.multi_reduction <maximumf>, %99, %cst_56 [1] : vector<64x64xf32> to vector<64xf32>
    %101 = vector.shape_cast %100 : vector<64xf32> to vector<64x1xf32>
    %102 = vector.broadcast %101 : vector<64x1xf32> to vector<64x64xf32>
    %103 = arith.subf %99, %102 : vector<64x64xf32>
    %104 = math.exp %103 : vector<64x64xf32>
    %cst_57 = arith.constant dense<0.000000e+00> : vector<64xf32>
    %105 = vector.multi_reduction <add>, %104, %cst_57 [1] : vector<64x64xf32> to vector<64xf32>
    %106 = vector.shape_cast %105 : vector<64xf32> to vector<64x1xf32>
    %cst_58 = arith.constant 1.000000e+00 : f32
    %107 = vector.broadcast %cst_58 : f32 to vector<64x1xf32>
    %108 = arith.divf %107, %106 : vector<64x1xf32>
    %109 = vector.broadcast %108 : vector<64x1xf32> to vector<64x64xf32>
    %110 = arith.mulf %104, %109 : vector<64x64xf32>
    %cst_59 = arith.constant dense<0.000000e+00> : vector<64x8xf32>
    %111 = tpu.matmul %110, %95, %cst_59 {dimension_numbers = #tpu.dot_dimension_numbers<[1], [0], [0], [1], [0, 0, 1, 1], [], []>} : vector<64x64xf32>, vector<64x8xf32>, vector<64x8xf32> -> vector<64x8xf32>
    %c0_60 = arith.constant 0 : index
    %c16 = arith.constant 16 : index
    %112 = vector.load %arg10[%c0_60, %c16] : memref<64x32xf32, #tpu.memory_space<vmem>>, vector<64x8xf32>
    tpu.vector_store %arg10[%c0_60, %c16], %111 {strides = array<i32>} : memref<64x32xf32, #tpu.memory_space<vmem>>, vector<64x8xf32>,
    %113 = vector.extract_strided_slice %50 {offsets = [0, 24], sizes = [64, 8], strides = [1, 1]} : vector<64x32xf32> to vector<64x8xf32>
    %114 = vector.extract_strided_slice %51 {offsets = [0, 24], sizes = [64, 8], strides = [1, 1]} : vector<64x32xf32> to vector<64x8xf32>
    %115 = vector.extract_strided_slice %52 {offsets = [0, 24], sizes = [64, 8], strides = [1, 1]} : vector<64x32xf32> to vector<64x8xf32>
    %cst_61 = arith.constant dense<0.000000e+00> : vector<64x64xf32>
    %116 = tpu.matmul %113, %114, %cst_61 {dimension_numbers = #tpu.dot_dimension_numbers<[1], [1], [0], [0], [0, 0, 1, 0], [], []>} : vector<64x8xf32>, vector<64x8xf32>, vector<64x64xf32> -> vector<64x64xf32>
    %c0_62 = arith.constant 0 : index
    %c3_63 = arith.constant 3 : index
    %c0_64 = arith.constant 0 : index
    %c0_65 = arith.constant 0 : index
    %117 = vector.load %arg3[%c0_62, %c3_63, %c0_64, %c0_65] : memref<2x4x64x64xf32, #tpu.memory_space<vmem>>, vector<1x1x64x64xf32>
    %118 = vector.shape_cast %117 : vector<1x1x64x64xf32> to vector<64x64xf32>
    %119 = arith.addf %116, %118 : vector<64x64xf32>
    %cst_66 = arith.constant dense<0xFF800000> : vector<64xf32>
    %120 = vector.multi_reduction <maximumf>, %119, %cst_66 [1] : vector<64x64xf32> to vector<64xf32>
    %121 = vector.shape_cast %120 : vector<64xf32> to vector<64x1xf32>
    %122 = vector.broadcast %121 : vector<64x1xf32> to vector<64x64xf32>
    %123 = arith.subf %119, %122 : vector<64x64xf32>
    %124 = math.exp %123 : vector<64x64xf32>
    %cst_67 = arith.constant dense<0.000000e+00> : vector<64xf32>
    %125 = vector.multi_reduction <add>, %124, %cst_67 [1] : vector<64x64xf32> to vector<64xf32>
    %126 = vector.shape_cast %125 : vector<64xf32> to vector<64x1xf32>
    %cst_68 = arith.constant 1.000000e+00 : f32
    %127 = vector.broadcast %cst_68 : f32 to vector<64x1xf32>
    %128 = arith.divf %127, %126 : vector<64x1xf32>
    %129 = vector.broadcast %128 : vector<64x1xf32> to vector<64x64xf32>
    %130 = arith.mulf %124, %129 : vector<64x64xf32>
    %cst_69 = arith.constant dense<0.000000e+00> : vector<64x8xf32>
    %131 = tpu.matmul %130, %115, %cst_69 {dimension_numbers = #tpu.dot_dimension_numbers<[1], [0], [0], [1], [0, 0, 1, 1], [], []>} : vector<64x64xf32>, vector<64x8xf32>, vector<64x8xf32> -> vector<64x8xf32>
    %c0_70 = arith.constant 0 : index
    %c24 = arith.constant 24 : index
    %132 = vector.load %arg10[%c0_70, %c24] : memref<64x32xf32, #tpu.memory_space<vmem>>, vector<64x8xf32>
    tpu.vector_store %arg10[%c0_70, %c24], %131 {strides = array<i32>} : memref<64x32xf32, #tpu.memory_space<vmem>>, vector<64x8xf32>,
    %c0_71 = arith.constant 0 : index
    %c0_72 = arith.constant 0 : index
    %133 = vector.load %arg10[%c0_71, %c0_72] : memref<64x32xf32, #tpu.memory_space<vmem>>, vector<64x32xf32>
    %c0_73 = arith.constant 0 : index
    %c0_74 = arith.constant 0 : index
    %c0_75 = arith.constant 0 : index
    %134 = vector.load %arg4[%c0_73, %c0_74, %c0_75] : memref<2x32x32xf32, #tpu.memory_space<vmem>>, vector<1x32x32xf32>
    %135 = vector.shape_cast %134 : vector<1x32x32xf32> to vector<32x32xf32>
    %cst_76 = arith.constant dense<0.000000e+00> : vector<64x32xf32>
    %136 = tpu.matmul %133, %135, %cst_76 {dimension_numbers = #tpu.dot_dimension_numbers<[1], [0], [0], [1], [0, 0, 1, 1], [], []>} : vector<64x32xf32>, vector<32x32xf32>, vector<64x32xf32> -> vector<64x32xf32>
    %137 = arith.addf %1, %136 : vector<64x32xf32>
    %138 = vector.shape_cast %7 : vector<32xf32> to vector<1x32xf32>
    %139 = vector.broadcast %138 : vector<1x32xf32> to vector<64x32xf32>
    %140 = arith.addf %137, %139 : vector<64x32xf32>
    %cst_77 = arith.constant dense<0.000000e+00> : vector<64xf32>
    %141 = vector.multi_reduction <add>, %140, %cst_77 [1] : vector<64x32xf32> to vector<64xf32>
    %142 = vector.shape_cast %141 : vector<64xf32> to vector<64x1xf32>
    %cst_78 = arith.constant 3.200000e+01 : f32
    %143 = vector.broadcast %cst_78 : f32 to vector<64x1xf32>
    %144 = arith.divf %142, %143 : vector<64x1xf32>
    %145 = vector.broadcast %144 : vector<64x1xf32> to vector<64x32xf32>
    %146 = arith.subf %140, %145 : vector<64x32xf32>
    %147 = arith.mulf %146, %146 : vector<64x32xf32>
    %cst_79 = arith.constant dense<0.000000e+00> : vector<64xf32>
    %148 = vector.multi_reduction <add>, %147, %cst_79 [1] : vector<64x32xf32> to vector<64xf32>
    %149 = vector.shape_cast %148 : vector<64xf32> to vector<64x1xf32>
    %cst_80 = arith.constant 3.200000e+01 : f32
    %150 = vector.broadcast %cst_80 : f32 to vector<64x1xf32>
    %151 = arith.divf %149, %150 : vector<64x1xf32>
    %152 = vector.broadcast %144 : vector<64x1xf32> to vector<64x32xf32>
    %153 = arith.subf %140, %152 : vector<64x32xf32>
    %cst_81 = arith.constant 9.99999974E-6 : f32
    %154 = vector.broadcast %cst_81 : f32 to vector<64x1xf32>
    %155 = arith.addf %151, %154 : vector<64x1xf32>
    %156 = math.rsqrt %155 : vector<64x1xf32>
    %157 = vector.broadcast %156 : vector<64x1xf32> to vector<64x32xf32>
    %158 = arith.mulf %153, %157 : vector<64x32xf32>
    %159 = vector.shape_cast %9 : vector<32xf32> to vector<1x32xf32>
    %160 = vector.broadcast %159 : vector<1x32xf32> to vector<64x32xf32>
    %161 = arith.mulf %158, %160 : vector<64x32xf32>
    %162 = vector.shape_cast %11 : vector<32xf32> to vector<1x32xf32>
    %163 = vector.broadcast %162 : vector<1x32xf32> to vector<64x32xf32>
    %164 = arith.addf %161, %163 : vector<64x32xf32>
    %c0_82 = arith.constant 0 : index
    %c0_83 = arith.constant 0 : index
    %c0_84 = arith.constant 0 : index
    %165 = vector.load %arg5[%c0_82, %c0_83, %c0_84] : memref<2x32x128xf32, #tpu.memory_space<vmem>>, vector<1x32x128xf32>
    %166 = vector.shape_cast %165 : vector<1x32x128xf32> to vector<32x128xf32>
    %cst_85 = arith.constant dense<0.000000e+00> : vector<64x128xf32>
    %167 = tpu.matmul %164, %166, %cst_85 {dimension_numbers = #tpu.dot_dimension_numbers<[1], [0], [0], [1], [0, 0, 1, 1], [], []>} : vector<64x32xf32>, vector<32x128xf32>, vector<64x128xf32> -> vector<64x128xf32>
    %168 = vector.shape_cast %17 : vector<128xf32> to vector<1x128xf32>
    %169 = vector.broadcast %168 : vector<1x128xf32> to vector<64x128xf32>
    %170 = arith.addf %167, %169 : vector<64x128xf32>
    %cst_86 = arith.constant 5.000000e-01 : f32
    %171 = vector.broadcast %cst_86 : f32 to vector<64x128xf32>
    %172 = arith.mulf %171, %170 : vector<64x128xf32>
    %cst_87 = arith.constant 0.707106769 : f32
    %173 = vector.broadcast %cst_87 : f32 to vector<64x128xf32>
    %174 = arith.mulf %170, %173 : vector<64x128xf32>
    %175 = math.erf %174 : vector<64x128xf32>
    %cst_88 = arith.constant 1.000000e+00 : f32
    %176 = vector.broadcast %cst_88 : f32 to vector<64x128xf32>
    %177 = arith.addf %176, %175 : vector<64x128xf32>
    %178 = arith.mulf %172, %177 : vector<64x128xf32>
    %c0_89 = arith.constant 0 : index
    %c0_90 = arith.constant 0 : index
    %c0_91 = arith.constant 0 : index
    %179 = vector.load %arg6[%c0_89, %c0_90, %c0_91] : memref<2x128x32xf32, #tpu.memory_space<vmem>>, vector<1x128x32xf32>
    %180 = vector.shape_cast %179 : vector<1x128x32xf32> to vector<128x32xf32>
    %cst_92 = arith.constant dense<0.000000e+00> : vector<64x32xf32>
    %181 = tpu.matmul %178, %180, %cst_92 {dimension_numbers = #tpu.dot_dimension_numbers<[1], [0], [0], [1], [0, 0, 1, 1], [], []>} : vector<64x128xf32>, vector<128x32xf32>, vector<64x32xf32> -> vector<64x32xf32>
    %182 = arith.addf %140, %181 : vector<64x32xf32>
    %183 = vector.shape_cast %13 : vector<32xf32> to vector<1x32xf32>
    %184 = vector.broadcast %183 : vector<1x32xf32> to vector<64x32xf32>
    %185 = arith.addf %182, %184 : vector<64x32xf32>
    %c1_93 = arith.constant 1 : index
    %c0_94 = arith.constant 0 : index
    %c0_95 = arith.constant 0 : index
    %186 = vector.load %arg7[%c1_93, %c0_94, %c0_95] : memref<2x8x32xf32, #tpu.memory_space<vmem>>, vector<1x1x32xf32>
    %187 = vector.shape_cast %186 : vector<1x1x32xf32> to vector<32xf32>
    %c1_96 = arith.constant 1 : index
    %c1_97 = arith.constant 1 : index
    %c0_98 = arith.constant 0 : index
    %188 = vector.load %arg7[%c1_96, %c1_97, %c0_98] : memref<2x8x32xf32, #tpu.memory_space<vmem>>, vector<1x1x32xf32>
    %189 = vector.shape_cast %188 : vector<1x1x32xf32> to vector<32xf32>
    %c1_99 = arith.constant 1 : index
    %c2_100 = arith.constant 2 : index
    %c0_101 = arith.constant 0 : index
    %190 = vector.load %arg7[%c1_99, %c2_100, %c0_101] : memref<2x8x32xf32, #tpu.memory_space<vmem>>, vector<1x1x32xf32>
    %191 = vector.shape_cast %190 : vector<1x1x32xf32> to vector<32xf32>
    %c1_102 = arith.constant 1 : index
    %c3_103 = arith.constant 3 : index
    %c0_104 = arith.constant 0 : index
    %192 = vector.load %arg7[%c1_102, %c3_103, %c0_104] : memref<2x8x32xf32, #tpu.memory_space<vmem>>, vector<1x1x32xf32>
    %193 = vector.shape_cast %192 : vector<1x1x32xf32> to vector<32xf32>
    %c1_105 = arith.constant 1 : index
    %c4_106 = arith.constant 4 : index
    %c0_107 = arith.constant 0 : index
    %194 = vector.load %arg7[%c1_105, %c4_106, %c0_107] : memref<2x8x32xf32, #tpu.memory_space<vmem>>, vector<1x1x32xf32>
    %195 = vector.shape_cast %194 : vector<1x1x32xf32> to vector<32xf32>
    %c1_108 = arith.constant 1 : index
    %c5_109 = arith.constant 5 : index
    %c0_110 = arith.constant 0 : index
    %196 = vector.load %arg7[%c1_108, %c5_109, %c0_110] : memref<2x8x32xf32, #tpu.memory_space<vmem>>, vector<1x1x32xf32>
    %197 = vector.shape_cast %196 : vector<1x1x32xf32> to vector<32xf32>
    %c1_111 = arith.constant 1 : index
    %c0_112 = arith.constant 0 : index
    %c0_113 = arith.constant 0 : index
    %198 = vector.load %arg8[%c1_111, %c0_112, %c0_113] : memref<2x2x128xf32, #tpu.memory_space<vmem>>, vector<1x1x96xf32>
    %199 = vector.shape_cast %198 : vector<1x1x96xf32> to vector<96xf32>
    %c1_114 = arith.constant 1 : index
    %c1_115 = arith.constant 1 : index
    %c0_116 = arith.constant 0 : index
    %200 = vector.load %arg8[%c1_114, %c1_115, %c0_116] : memref<2x2x128xf32, #tpu.memory_space<vmem>>, vector<1x1x128xf32>
    %201 = vector.shape_cast %200 : vector<1x1x128xf32> to vector<128xf32>
    %cst_117 = arith.constant dense<0.000000e+00> : vector<64xf32>
    %202 = vector.multi_reduction <add>, %185, %cst_117 [1] : vector<64x32xf32> to vector<64xf32>
    %203 = vector.shape_cast %202 : vector<64xf32> to vector<64x1xf32>
    %cst_118 = arith.constant 3.200000e+01 : f32
    %204 = vector.broadcast %cst_118 : f32 to vector<64x1xf32>
    %205 = arith.divf %203, %204 : vector<64x1xf32>
    %206 = vector.broadcast %205 : vector<64x1xf32> to vector<64x32xf32>
    %207 = arith.subf %185, %206 : vector<64x32xf32>
    %208 = arith.mulf %207, %207 : vector<64x32xf32>
    %cst_119 = arith.constant dense<0.000000e+00> : vector<64xf32>
    %209 = vector.multi_reduction <add>, %208, %cst_119 [1] : vector<64x32xf32> to vector<64xf32>
    %210 = vector.shape_cast %209 : vector<64xf32> to vector<64x1xf32>
    %cst_120 = arith.constant 3.200000e+01 : f32
    %211 = vector.broadcast %cst_120 : f32 to vector<64x1xf32>
    %212 = arith.divf %210, %211 : vector<64x1xf32>
    %213 = vector.broadcast %205 : vector<64x1xf32> to vector<64x32xf32>
    %214 = arith.subf %185, %213 : vector<64x32xf32>
    %cst_121 = arith.constant 9.99999974E-6 : f32
    %215 = vector.broadcast %cst_121 : f32 to vector<64x1xf32>
    %216 = arith.addf %212, %215 : vector<64x1xf32>
    %217 = math.rsqrt %216 : vector<64x1xf32>
    %218 = vector.broadcast %217 : vector<64x1xf32> to vector<64x32xf32>
    %219 = arith.mulf %214, %218 : vector<64x32xf32>
    %220 = vector.shape_cast %187 : vector<32xf32> to vector<1x32xf32>
    %221 = vector.broadcast %220 : vector<1x32xf32> to vector<64x32xf32>
    %222 = arith.mulf %219, %221 : vector<64x32xf32>
    %223 = vector.shape_cast %189 : vector<32xf32> to vector<1x32xf32>
    %224 = vector.broadcast %223 : vector<1x32xf32> to vector<64x32xf32>
    %225 = arith.addf %222, %224 : vector<64x32xf32>
    %c1_122 = arith.constant 1 : index
    %c0_123 = arith.constant 0 : index
    %c0_124 = arith.constant 0 : index
    %226 = vector.load %arg2[%c1_122, %c0_123, %c0_124] : memref<2x32x96xf32, #tpu.memory_space<vmem>>, vector<1x32x96xf32>
    %227 = vector.shape_cast %226 : vector<1x32x96xf32> to vector<32x96xf32>
    %cst_125 = arith.constant dense<0.000000e+00> : vector<64x96xf32>
    %228 = tpu.matmul %225, %227, %cst_125 {dimension_numbers = #tpu.dot_dimension_numbers<[1], [0], [0], [1], [0, 0, 1, 1], [], []>} : vector<64x32xf32>, vector<32x96xf32>, vector<64x96xf32> -> vector<64x96xf32>
    %229 = vector.shape_cast %199 : vector<96xf32> to vector<1x96xf32>
    %230 = vector.broadcast %229 : vector<1x96xf32> to vector<64x96xf32>
    %231 = arith.addf %228, %230 : vector<64x96xf32>
    %232 = vector.extract_strided_slice %231 {offsets = [0, 0], sizes = [64, 32], strides = [1, 1]} : vector<64x96xf32> to vector<64x32xf32>
    %cst_126 = arith.constant 0.353553385 : f32
    %233 = vector.broadcast %cst_126 : f32 to vector<64x32xf32>
    %234 = arith.mulf %232, %233 : vector<64x32xf32>
    %235 = vector.extract_strided_slice %231 {offsets = [0, 32], sizes = [64, 32], strides = [1, 1]} : vector<64x96xf32> to vector<64x32xf32>
    %236 = vector.extract_strided_slice %231 {offsets = [0, 64], sizes = [64, 32], strides = [1, 1]} : vector<64x96xf32> to vector<64x32xf32>
    %237 = vector.extract_strided_slice %234 {offsets = [0, 0], sizes = [64, 8], strides = [1, 1]} : vector<64x32xf32> to vector<64x8xf32>
    %238 = vector.extract_strided_slice %235 {offsets = [0, 0], sizes = [64, 8], strides = [1, 1]} : vector<64x32xf32> to vector<64x8xf32>
    %239 = vector.extract_strided_slice %236 {offsets = [0, 0], sizes = [64, 8], strides = [1, 1]} : vector<64x32xf32> to vector<64x8xf32>
    %cst_127 = arith.constant dense<0.000000e+00> : vector<64x64xf32>
    %240 = tpu.matmul %237, %238, %cst_127 {dimension_numbers = #tpu.dot_dimension_numbers<[1], [1], [0], [0], [0, 0, 1, 0], [], []>} : vector<64x8xf32>, vector<64x8xf32>, vector<64x64xf32> -> vector<64x64xf32>
    %c1_128 = arith.constant 1 : index
    %c0_129 = arith.constant 0 : index
    %c0_130 = arith.constant 0 : index
    %c0_131 = arith.constant 0 : index
    %241 = vector.load %arg3[%c1_128, %c0_129, %c0_130, %c0_131] : memref<2x4x64x64xf32, #tpu.memory_space<vmem>>, vector<1x1x64x64xf32>
    %242 = vector.shape_cast %241 : vector<1x1x64x64xf32> to vector<64x64xf32>
    %243 = arith.addf %240, %242 : vector<64x64xf32>
    %cst_132 = arith.constant dense<0xFF800000> : vector<64xf32>
    %244 = vector.multi_reduction <maximumf>, %243, %cst_132 [1] : vector<64x64xf32> to vector<64xf32>
    %245 = vector.shape_cast %244 : vector<64xf32> to vector<64x1xf32>
    %246 = vector.broadcast %245 : vector<64x1xf32> to vector<64x64xf32>
    %247 = arith.subf %243, %246 : vector<64x64xf32>
    %248 = math.exp %247 : vector<64x64xf32>
    %cst_133 = arith.constant dense<0.000000e+00> : vector<64xf32>
    %249 = vector.multi_reduction <add>, %248, %cst_133 [1] : vector<64x64xf32> to vector<64xf32>
    %250 = vector.shape_cast %249 : vector<64xf32> to vector<64x1xf32>
    %cst_134 = arith.constant 1.000000e+00 : f32
    %251 = vector.broadcast %cst_134 : f32 to vector<64x1xf32>
    %252 = arith.divf %251, %250 : vector<64x1xf32>
    %253 = vector.broadcast %252 : vector<64x1xf32> to vector<64x64xf32>
    %254 = arith.mulf %248, %253 : vector<64x64xf32>
    %cst_135 = arith.constant dense<0.000000e+00> : vector<64x8xf32>
    %255 = tpu.matmul %254, %239, %cst_135 {dimension_numbers = #tpu.dot_dimension_numbers<[1], [0], [0], [1], [0, 0, 1, 1], [], []>} : vector<64x64xf32>, vector<64x8xf32>, vector<64x8xf32> -> vector<64x8xf32>
    %c0_136 = arith.constant 0 : index
    %c0_137 = arith.constant 0 : index
    %256 = vector.load %arg10[%c0_136, %c0_137] : memref<64x32xf32, #tpu.memory_space<vmem>>, vector<64x8xf32>
    tpu.vector_store %arg10[%c0_136, %c0_137], %255 {strides = array<i32>} : memref<64x32xf32, #tpu.memory_space<vmem>>, vector<64x8xf32>,
    %257 = vector.extract_strided_slice %234 {offsets = [0, 8], sizes = [64, 8], strides = [1, 1]} : vector<64x32xf32> to vector<64x8xf32>
    %258 = vector.extract_strided_slice %235 {offsets = [0, 8], sizes = [64, 8], strides = [1, 1]} : vector<64x32xf32> to vector<64x8xf32>
    %259 = vector.extract_strided_slice %236 {offsets = [0, 8], sizes = [64, 8], strides = [1, 1]} : vector<64x32xf32> to vector<64x8xf32>
    %cst_138 = arith.constant dense<0.000000e+00> : vector<64x64xf32>
    %260 = tpu.matmul %257, %258, %cst_138 {dimension_numbers = #tpu.dot_dimension_numbers<[1], [1], [0], [0], [0, 0, 1, 0], [], []>} : vector<64x8xf32>, vector<64x8xf32>, vector<64x64xf32> -> vector<64x64xf32>
    %c1_139 = arith.constant 1 : index
    %c1_140 = arith.constant 1 : index
    %c0_141 = arith.constant 0 : index
    %c0_142 = arith.constant 0 : index
    %261 = vector.load %arg3[%c1_139, %c1_140, %c0_141, %c0_142] : memref<2x4x64x64xf32, #tpu.memory_space<vmem>>, vector<1x1x64x64xf32>
    %262 = vector.shape_cast %261 : vector<1x1x64x64xf32> to vector<64x64xf32>
    %263 = arith.addf %260, %262 : vector<64x64xf32>
    %cst_143 = arith.constant dense<0xFF800000> : vector<64xf32>
    %264 = vector.multi_reduction <maximumf>, %263, %cst_143 [1] : vector<64x64xf32> to vector<64xf32>
    %265 = vector.shape_cast %264 : vector<64xf32> to vector<64x1xf32>
    %266 = vector.broadcast %265 : vector<64x1xf32> to vector<64x64xf32>
    %267 = arith.subf %263, %266 : vector<64x64xf32>
    %268 = math.exp %267 : vector<64x64xf32>
    %cst_144 = arith.constant dense<0.000000e+00> : vector<64xf32>
    %269 = vector.multi_reduction <add>, %268, %cst_144 [1] : vector<64x64xf32> to vector<64xf32>
    %270 = vector.shape_cast %269 : vector<64xf32> to vector<64x1xf32>
    %cst_145 = arith.constant 1.000000e+00 : f32
    %271 = vector.broadcast %cst_145 : f32 to vector<64x1xf32>
    %272 = arith.divf %271, %270 : vector<64x1xf32>
    %273 = vector.broadcast %272 : vector<64x1xf32> to vector<64x64xf32>
    %274 = arith.mulf %268, %273 : vector<64x64xf32>
    %cst_146 = arith.constant dense<0.000000e+00> : vector<64x8xf32>
    %275 = tpu.matmul %274, %259, %cst_146 {dimension_numbers = #tpu.dot_dimension_numbers<[1], [0], [0], [1], [0, 0, 1, 1], [], []>} : vector<64x64xf32>, vector<64x8xf32>, vector<64x8xf32> -> vector<64x8xf32>
    %c0_147 = arith.constant 0 : index
    %c8_148 = arith.constant 8 : index
    %276 = vector.load %arg10[%c0_147, %c8_148] : memref<64x32xf32, #tpu.memory_space<vmem>>, vector<64x8xf32>
    tpu.vector_store %arg10[%c0_147, %c8_148], %275 {strides = array<i32>} : memref<64x32xf32, #tpu.memory_space<vmem>>, vector<64x8xf32>,
    %277 = vector.extract_strided_slice %234 {offsets = [0, 16], sizes = [64, 8], strides = [1, 1]} : vector<64x32xf32> to vector<64x8xf32>
    %278 = vector.extract_strided_slice %235 {offsets = [0, 16], sizes = [64, 8], strides = [1, 1]} : vector<64x32xf32> to vector<64x8xf32>
    %279 = vector.extract_strided_slice %236 {offsets = [0, 16], sizes = [64, 8], strides = [1, 1]} : vector<64x32xf32> to vector<64x8xf32>
    %cst_149 = arith.constant dense<0.000000e+00> : vector<64x64xf32>
    %280 = tpu.matmul %277, %278, %cst_149 {dimension_numbers = #tpu.dot_dimension_numbers<[1], [1], [0], [0], [0, 0, 1, 0], [], []>} : vector<64x8xf32>, vector<64x8xf32>, vector<64x64xf32> -> vector<64x64xf32>
    %c1_150 = arith.constant 1 : index
    %c2_151 = arith.constant 2 : index
    %c0_152 = arith.constant 0 : index
    %c0_153 = arith.constant 0 : index
    %281 = vector.load %arg3[%c1_150, %c2_151, %c0_152, %c0_153] : memref<2x4x64x64xf32, #tpu.memory_space<vmem>>, vector<1x1x64x64xf32>
    %282 = vector.shape_cast %281 : vector<1x1x64x64xf32> to vector<64x64xf32>
    %283 = arith.addf %280, %282 : vector<64x64xf32>
    %cst_154 = arith.constant dense<0xFF800000> : vector<64xf32>
    %284 = vector.multi_reduction <maximumf>, %283, %cst_154 [1] : vector<64x64xf32> to vector<64xf32>
    %285 = vector.shape_cast %284 : vector<64xf32> to vector<64x1xf32>
    %286 = vector.broadcast %285 : vector<64x1xf32> to vector<64x64xf32>
    %287 = arith.subf %283, %286 : vector<64x64xf32>
    %288 = math.exp %287 : vector<64x64xf32>
    %cst_155 = arith.constant dense<0.000000e+00> : vector<64xf32>
    %289 = vector.multi_reduction <add>, %288, %cst_155 [1] : vector<64x64xf32> to vector<64xf32>
    %290 = vector.shape_cast %289 : vector<64xf32> to vector<64x1xf32>
    %cst_156 = arith.constant 1.000000e+00 : f32
    %291 = vector.broadcast %cst_156 : f32 to vector<64x1xf32>
    %292 = arith.divf %291, %290 : vector<64x1xf32>
    %293 = vector.broadcast %292 : vector<64x1xf32> to vector<64x64xf32>
    %294 = arith.mulf %288, %293 : vector<64x64xf32>
    %cst_157 = arith.constant dense<0.000000e+00> : vector<64x8xf32>
    %295 = tpu.matmul %294, %279, %cst_157 {dimension_numbers = #tpu.dot_dimension_numbers<[1], [0], [0], [1], [0, 0, 1, 1], [], []>} : vector<64x64xf32>, vector<64x8xf32>, vector<64x8xf32> -> vector<64x8xf32>
    %c0_158 = arith.constant 0 : index
    %c16_159 = arith.constant 16 : index
    %296 = vector.load %arg10[%c0_158, %c16_159] : memref<64x32xf32, #tpu.memory_space<vmem>>, vector<64x8xf32>
    tpu.vector_store %arg10[%c0_158, %c16_159], %295 {strides = array<i32>} : memref<64x32xf32, #tpu.memory_space<vmem>>, vector<64x8xf32>,
    %297 = vector.extract_strided_slice %234 {offsets = [0, 24], sizes = [64, 8], strides = [1, 1]} : vector<64x32xf32> to vector<64x8xf32>
    %298 = vector.extract_strided_slice %235 {offsets = [0, 24], sizes = [64, 8], strides = [1, 1]} : vector<64x32xf32> to vector<64x8xf32>
    %299 = vector.extract_strided_slice %236 {offsets = [0, 24], sizes = [64, 8], strides = [1, 1]} : vector<64x32xf32> to vector<64x8xf32>
    %cst_160 = arith.constant dense<0.000000e+00> : vector<64x64xf32>
    %300 = tpu.matmul %297, %298, %cst_160 {dimension_numbers = #tpu.dot_dimension_numbers<[1], [1], [0], [0], [0, 0, 1, 0], [], []>} : vector<64x8xf32>, vector<64x8xf32>, vector<64x64xf32> -> vector<64x64xf32>
    %c1_161 = arith.constant 1 : index
    %c3_162 = arith.constant 3 : index
    %c0_163 = arith.constant 0 : index
    %c0_164 = arith.constant 0 : index
    %301 = vector.load %arg3[%c1_161, %c3_162, %c0_163, %c0_164] : memref<2x4x64x64xf32, #tpu.memory_space<vmem>>, vector<1x1x64x64xf32>
    %302 = vector.shape_cast %301 : vector<1x1x64x64xf32> to vector<64x64xf32>
    %303 = arith.addf %300, %302 : vector<64x64xf32>
    %cst_165 = arith.constant dense<0xFF800000> : vector<64xf32>
    %304 = vector.multi_reduction <maximumf>, %303, %cst_165 [1] : vector<64x64xf32> to vector<64xf32>
    %305 = vector.shape_cast %304 : vector<64xf32> to vector<64x1xf32>
    %306 = vector.broadcast %305 : vector<64x1xf32> to vector<64x64xf32>
    %307 = arith.subf %303, %306 : vector<64x64xf32>
    %308 = math.exp %307 : vector<64x64xf32>
    %cst_166 = arith.constant dense<0.000000e+00> : vector<64xf32>
    %309 = vector.multi_reduction <add>, %308, %cst_166 [1] : vector<64x64xf32> to vector<64xf32>
    %310 = vector.shape_cast %309 : vector<64xf32> to vector<64x1xf32>
    %cst_167 = arith.constant 1.000000e+00 : f32
    %311 = vector.broadcast %cst_167 : f32 to vector<64x1xf32>
    %312 = arith.divf %311, %310 : vector<64x1xf32>
    %313 = vector.broadcast %312 : vector<64x1xf32> to vector<64x64xf32>
    %314 = arith.mulf %308, %313 : vector<64x64xf32>
    %cst_168 = arith.constant dense<0.000000e+00> : vector<64x8xf32>
    %315 = tpu.matmul %314, %299, %cst_168 {dimension_numbers = #tpu.dot_dimension_numbers<[1], [0], [0], [1], [0, 0, 1, 1], [], []>} : vector<64x64xf32>, vector<64x8xf32>, vector<64x8xf32> -> vector<64x8xf32>
    %c0_169 = arith.constant 0 : index
    %c24_170 = arith.constant 24 : index
    %316 = vector.load %arg10[%c0_169, %c24_170] : memref<64x32xf32, #tpu.memory_space<vmem>>, vector<64x8xf32>
    tpu.vector_store %arg10[%c0_169, %c24_170], %315 {strides = array<i32>} : memref<64x32xf32, #tpu.memory_space<vmem>>, vector<64x8xf32>,
    %c0_171 = arith.constant 0 : index
    %c0_172 = arith.constant 0 : index
    %317 = vector.load %arg10[%c0_171, %c0_172] : memref<64x32xf32, #tpu.memory_space<vmem>>, vector<64x32xf32>
    %c1_173 = arith.constant 1 : index
    %c0_174 = arith.constant 0 : index
    %c0_175 = arith.constant 0 : index
    %318 = vector.load %arg4[%c1_173, %c0_174, %c0_175] : memref<2x32x32xf32, #tpu.memory_space<vmem>>, vector<1x32x32xf32>
    %319 = vector.shape_cast %318 : vector<1x32x32xf32> to vector<32x32xf32>
    %cst_176 = arith.constant dense<0.000000e+00> : vector<64x32xf32>
    %320 = tpu.matmul %317, %319, %cst_176 {dimension_numbers = #tpu.dot_dimension_numbers<[1], [0], [0], [1], [0, 0, 1, 1], [], []>} : vector<64x32xf32>, vector<32x32xf32>, vector<64x32xf32> -> vector<64x32xf32>
    %321 = arith.addf %185, %320 : vector<64x32xf32>
    %322 = vector.shape_cast %191 : vector<32xf32> to vector<1x32xf32>
    %323 = vector.broadcast %322 : vector<1x32xf32> to vector<64x32xf32>
    %324 = arith.addf %321, %323 : vector<64x32xf32>
    %cst_177 = arith.constant dense<0.000000e+00> : vector<64xf32>
    %325 = vector.multi_reduction <add>, %324, %cst_177 [1] : vector<64x32xf32> to vector<64xf32>
    %326 = vector.shape_cast %325 : vector<64xf32> to vector<64x1xf32>
    %cst_178 = arith.constant 3.200000e+01 : f32
    %327 = vector.broadcast %cst_178 : f32 to vector<64x1xf32>
    %328 = arith.divf %326, %327 : vector<64x1xf32>
    %329 = vector.broadcast %328 : vector<64x1xf32> to vector<64x32xf32>
    %330 = arith.subf %324, %329 : vector<64x32xf32>
    %331 = arith.mulf %330, %330 : vector<64x32xf32>
    %cst_179 = arith.constant dense<0.000000e+00> : vector<64xf32>
    %332 = vector.multi_reduction <add>, %331, %cst_179 [1] : vector<64x32xf32> to vector<64xf32>
    %333 = vector.shape_cast %332 : vector<64xf32> to vector<64x1xf32>
    %cst_180 = arith.constant 3.200000e+01 : f32
    %334 = vector.broadcast %cst_180 : f32 to vector<64x1xf32>
    %335 = arith.divf %333, %334 : vector<64x1xf32>
    %336 = vector.broadcast %328 : vector<64x1xf32> to vector<64x32xf32>
    %337 = arith.subf %324, %336 : vector<64x32xf32>
    %cst_181 = arith.constant 9.99999974E-6 : f32
    %338 = vector.broadcast %cst_181 : f32 to vector<64x1xf32>
    %339 = arith.addf %335, %338 : vector<64x1xf32>
    %340 = math.rsqrt %339 : vector<64x1xf32>
    %341 = vector.broadcast %340 : vector<64x1xf32> to vector<64x32xf32>
    %342 = arith.mulf %337, %341 : vector<64x32xf32>
    %343 = vector.shape_cast %193 : vector<32xf32> to vector<1x32xf32>
    %344 = vector.broadcast %343 : vector<1x32xf32> to vector<64x32xf32>
    %345 = arith.mulf %342, %344 : vector<64x32xf32>
    %346 = vector.shape_cast %195 : vector<32xf32> to vector<1x32xf32>
    %347 = vector.broadcast %346 : vector<1x32xf32> to vector<64x32xf32>
    %348 = arith.addf %345, %347 : vector<64x32xf32>
    %c1_182 = arith.constant 1 : index
    %c0_183 = arith.constant 0 : index
    %c0_184 = arith.constant 0 : index
    %349 = vector.load %arg5[%c1_182, %c0_183, %c0_184] : memref<2x32x128xf32, #tpu.memory_space<vmem>>, vector<1x32x128xf32>
    %350 = vector.shape_cast %349 : vector<1x32x128xf32> to vector<32x128xf32>
    %cst_185 = arith.constant dense<0.000000e+00> : vector<64x128xf32>
    %351 = tpu.matmul %348, %350, %cst_185 {dimension_numbers = #tpu.dot_dimension_numbers<[1], [0], [0], [1], [0, 0, 1, 1], [], []>} : vector<64x32xf32>, vector<32x128xf32>, vector<64x128xf32> -> vector<64x128xf32>
    %352 = vector.shape_cast %201 : vector<128xf32> to vector<1x128xf32>
    %353 = vector.broadcast %352 : vector<1x128xf32> to vector<64x128xf32>
    %354 = arith.addf %351, %353 : vector<64x128xf32>
    %cst_186 = arith.constant 5.000000e-01 : f32
    %355 = vector.broadcast %cst_186 : f32 to vector<64x128xf32>
    %356 = arith.mulf %355, %354 : vector<64x128xf32>
    %cst_187 = arith.constant 0.707106769 : f32
    %357 = vector.broadcast %cst_187 : f32 to vector<64x128xf32>
    %358 = arith.mulf %354, %357 : vector<64x128xf32>
    %359 = math.erf %358 : vector<64x128xf32>
    %cst_188 = arith.constant 1.000000e+00 : f32
    %360 = vector.broadcast %cst_188 : f32 to vector<64x128xf32>
    %361 = arith.addf %360, %359 : vector<64x128xf32>
    %362 = arith.mulf %356, %361 : vector<64x128xf32>
    %c1_189 = arith.constant 1 : index
    %c0_190 = arith.constant 0 : index
    %c0_191 = arith.constant 0 : index
    %363 = vector.load %arg6[%c1_189, %c0_190, %c0_191] : memref<2x128x32xf32, #tpu.memory_space<vmem>>, vector<1x128x32xf32>
    %364 = vector.shape_cast %363 : vector<1x128x32xf32> to vector<128x32xf32>
    %cst_192 = arith.constant dense<0.000000e+00> : vector<64x32xf32>
    %365 = tpu.matmul %362, %364, %cst_192 {dimension_numbers = #tpu.dot_dimension_numbers<[1], [0], [0], [1], [0, 0, 1, 1], [], []>} : vector<64x128xf32>, vector<128x32xf32>, vector<64x32xf32> -> vector<64x32xf32>
    %366 = arith.addf %324, %365 : vector<64x32xf32>
    %367 = vector.shape_cast %197 : vector<32xf32> to vector<1x32xf32>
    %368 = vector.broadcast %367 : vector<1x32xf32> to vector<64x32xf32>
    %369 = arith.addf %366, %368 : vector<64x32xf32>
    %c0_193 = arith.constant 0 : index
    %c0_194 = arith.constant 0 : index
    %c0_195 = arith.constant 0 : index
    %370 = vector.load %arg9[%c0_193, %c0_194, %c0_195] : memref<1x64x32xf32, #tpu.memory_space<vmem>>, vector<1x64x32xf32>
    %371 = vector.shape_cast %370 : vector<1x64x32xf32> to vector<64x32xf32>
    %372 = vector.shape_cast %369 : vector<64x32xf32> to vector<1x64x32xf32>
    tpu.vector_store %arg9[%c0_193, %c0_194, %c0_195], %372 {strides = array<i32>} : memref<1x64x32xf32, #tpu.memory_space<vmem>>, vector<1x64x32xf32>,
    return
  }
  func.func @transform_0(%arg0: i32) -> (i32, i32, i32) {
    %c0_i32 = arith.constant 0 : i32
    %c0_i32_0 = arith.constant 0 : i32
    %c0_i32_1 = arith.constant 0 : i32
    return %arg0, %c0_i32, %c0_i32_0 : i32, i32, i32
  }
  func.func @transform_1(%arg0: i32) -> (i32, i32, i32) {
    %c0_i32 = arith.constant 0 : i32
    %c0_i32_0 = arith.constant 0 : i32
    %c0_i32_1 = arith.constant 0 : i32
    %c0_i32_2 = arith.constant 0 : i32
    return %c0_i32, %c0_i32_0, %c0_i32_1 : i32, i32, i32
  }
  func.func @transform_2(%arg0: i32) -> (i32, i32, i32, i32) {
    %c0_i32 = arith.constant 0 : i32
    %c0_i32_0 = arith.constant 0 : i32
    %c0_i32_1 = arith.constant 0 : i32
    %c0_i32_2 = arith.constant 0 : i32
    %c0_i32_3 = arith.constant 0 : i32
    return %c0_i32, %c0_i32_0, %c0_i32_1, %c0_i32_2 : i32, i32, i32, i32
  }
  func.func @transform_3(%arg0: i32) -> (i32, i32, i32) {
    %c0_i32 = arith.constant 0 : i32
    %c0_i32_0 = arith.constant 0 : i32
    %c0_i32_1 = arith.constant 0 : i32
    %c0_i32_2 = arith.constant 0 : i32
    return %c0_i32, %c0_i32_0, %c0_i32_1 : i32, i32, i32
  }
  func.func @transform_4(%arg0: i32) -> (i32, i32, i32) {
    %c0_i32 = arith.constant 0 : i32
    %c0_i32_0 = arith.constant 0 : i32
    %c0_i32_1 = arith.constant 0 : i32
    %c0_i32_2 = arith.constant 0 : i32
    return %c0_i32, %c0_i32_0, %c0_i32_1 : i32, i32, i32
  }
  func.func @transform_5(%arg0: i32) -> (i32, i32, i32) {
    %c0_i32 = arith.constant 0 : i32
    %c0_i32_0 = arith.constant 0 : i32
    %c0_i32_1 = arith.constant 0 : i32
    %c0_i32_2 = arith.constant 0 : i32
    return %c0_i32, %c0_i32_0, %c0_i32_1 : i32, i32, i32
  }
  func.func @transform_6(%arg0: i32) -> (i32, i32, i32) {
    %c0_i32 = arith.constant 0 : i32
    %c0_i32_0 = arith.constant 0 : i32
    %c0_i32_1 = arith.constant 0 : i32
    %c0_i32_2 = arith.constant 0 : i32
    return %c0_i32, %c0_i32_0, %c0_i32_1 : i32, i32, i32
  }
  func.func @transform_7(%arg0: i32) -> (i32, i32, i32) {
    %c0_i32 = arith.constant 0 : i32
    %c0_i32_0 = arith.constant 0 : i32
    %c0_i32_1 = arith.constant 0 : i32
    %c0_i32_2 = arith.constant 0 : i32
    return %c0_i32, %c0_i32_0, %c0_i32_1 : i32, i32, i32
  }
  func.func @transform_8(%arg0: i32) -> (i32, i32, i32) {
    %c0_i32 = arith.constant 0 : i32
    %c0_i32_0 = arith.constant 0 : i32
    %c0_i32_1 = arith.constant 0 : i32
    return %arg0, %c0_i32, %c0_i32_0 : i32, i32, i32
  }
}

</mosaic_0001>

<bundles_post_ra>
// kernel: basic_layer_forward.1
= control target key start
LH: loop header
LB: loop body
LE: loop exit
PB: predicated region body
PF: predicated region fallthrough
CT: control target
= control target key end

     0   :  { %13 = vsyncpa [#allocation4], 0  ;;  %s10779_s0 = inlined_call_operand.vmem [shape: f32[2,64,32], index: 0, kind: input, shape index: {}]   ;;  %s10780_s1 = inlined_call_operand.hbm [shape: f32[2,32,96], index: 1, kind: input, shape index: {}]   ;;  %s10781_s2 = inlined_call_operand.vmem [shape: f32[2,4,64,64], index: 2, kind: input, shape index: {}]   ;;  %s10782_s3 = inlined_call_operand.hbm [shape: f32[2,32,32], index: 3, kind: input, shape index: {}]   ;;  %s10783_s4 = inlined_call_operand.hbm [shape: f32[2,32,128], index: 4, kind: input, shape index: {}]   ;;  %s10784_s5 = inlined_call_operand.vmem [shape: f32[2,128,32], index: 5, kind: input, shape index: {}]   ;;  %s10785_s6 = inlined_call_operand.hbm [shape: f32[2,8,32], index: 6, kind: input, shape index: {}]   ;;  %s10786_s7 = inlined_call_operand.vmem [shape: f32[2,2,128], index: 7, kind: input, shape index: {}]   ;;  %s10787_s8 = inlined_call_operand.vmem [shape: f32[2,64,32], index: 8, kind: output, shape index: {}]  }
   0x1   :  { %14 = vsyncpa [#allocation6], 0 }
   0x2   :  { %15 = vsyncpa [#allocation9], 0  ;;  %s8694_s27 = smov 0  }
   0x3 LB: > { %s8700_s28 = sadd.s32 4294967295, %s8627_s27   ;;  %p5939_p0 = scmp.ge.s32.totalorder %s8627_s27, 1  ;;  %s8627_s27 = sphi %s8694_s27, %s21_s27  }
   0x4   : > { %p225_p1 = scmp.lt.s32.totalorder %s8627_s27, 3  ;;  %p10788_p2 = scmp.eq.s32.totalorder %s8700_s28, 0 }
   0x5   : > { %s8629_s30 = smov [#allocation5]   ;;  %s8630_s10 = smov [#allocation3]  }
   0x6   : > { %p8705_p3 = pnand %p5939_p0, %p225_p1  ;;  %s253_s9 = sshll.u32 %s8629_s30, 4  ;;  %s8709_s9 = int_to_ptr.vmem [resolvable:$true] %s253_s9 }
   0x7   : > { %s237_s11 = sshll.u32 %s8630_s10, 4  ;;  %s8631_s13 = smov [#allocation7]   ;;  %s8713_s11 = int_to_ptr.vmem [resolvable:$true] %s237_s11 }
   0x8   : > { %s10799_s29 = scalar_select %p8705_p3, 1, 0 }
   0x9   : > { %p7768_p4 = pneg %p8705_p3  ;;  %s266_s14 = sshll.u32 %s8631_s13, 4  ;;  %s8721_s14 = int_to_ptr.vmem [resolvable:$true] %s266_s14 }
   0xa   : > { %s8632_s15 = smov [#allocation8]   ;;  %s8497_s19 = scalar_lea.hbm %s10782_s3, 1024 }
   0xb   : > { %p8717_p5 = pnand %p10788_p2, %p7768_p4  ;;  %s8723_s16 = sshll.u32 %s8632_s15, 4  ;;  %s283_s16 = int_to_ptr.vmem [resolvable:$true] %s8723_s16 }
   0xc   : > { %p8498_p6 = scmp.ne.s32.totalorder %s10782_s3, %s8497_s19  ;;  %p8504_p10 = scmp.lt.u32.totalorder %s8497_s19, %s10782_s3 }
   0xd   : > { %p8733_p7 = pneg %p8717_p5 }
   0xf   : > { %p8500_p8 = pnand %p8733_p7, %p8498_p6 }
  0x11   : > { %p8501_p9 = pneg %p8500_p8 }
  0x13   : > { %p8506_p11 = pnand %p8504_p10, %p8501_p9 }
  0x15   : > { %8509 = shalt.err (!%p8506_p11)
}
  0x16   : > { %s8510_s25 = scalar_lea.vmem %s8709_s9, 1024  ;;  %p8518_p1 = scmp.lt.s32.totalorder %s8709_s9, %s8709_s9 }
  0x17   : > { %p8511_p12 = scmp.ne.s32.totalorder %s8709_s9, %s8510_s25  ;;  %p8519_p4 = scmp.lt.s32.totalorder %s8510_s25, %s8510_s25 }
  0x19   : > { %p8513_p13 = pnand %p8511_p12, %p8733_p7  ;;  %p8520_p6 = por %p8519_p4, %p8518_p1 }
  0x1b   : > { %p8514_p0 = pneg %p8513_p13 }
  0x1d   : > { %p8521_p8 = pnand %p8520_p6, %p8514_p0 }
  0x1f   : > { %8524 = shalt.err (!%p8521_p8)
}
  0x20   : > { %s8633_s26 = smov 128   ;;  %s8634_s30 = smov 8  }
  0x21   : > { %7774 = dma.hbm_to_vmem [thread:$0]  (!%p8717_p5), %s10782_s3, 1024, %s8709_s9, [#allocation6], %s8633_s26, %s8633_s26, %s8634_s30  }
  0x22   : > { %s8525_s18 = scalar_lea.hbm %s10780_s1, 1024 }
  0x23   : > { %p8526_p9 = scmp.ne.s32.totalorder %s10780_s1, %s8525_s18  ;;  %p8532_p12 = scmp.lt.u32.totalorder %s8525_s18, %s10780_s1 }
  0x25   : > { %p8528_p10 = pnand %p8526_p9, %p8733_p7 }
  0x27   : > { %p8529_p11 = pneg %p8528_p10 }
  0x29   : > { %p8534_p13 = pnand %p8532_p12, %p8529_p11 }
  0x2b   : > { %8537 = shalt.err (!%p8534_p13)
}
  0x2c   : > { %s8538_s9 = scalar_lea.vmem %s8713_s11, 1024  ;;  %p8546_p6 = scmp.lt.s32.totalorder %s8713_s11, %s8713_s11 }
  0x2d   : > { %p8539_p0 = scmp.ne.s32.totalorder %s8713_s11, %s8538_s9  ;;  %p8547_p8 = scmp.lt.s32.totalorder %s8538_s9, %s8538_s9 }
  0x2f   : > { %p8541_p1 = pnand %p8539_p0, %p8733_p7  ;;  %p8548_p9 = por %p8547_p8, %p8546_p6 }
  0x31   : > { %p8542_p4 = pneg %p8541_p1 }
  0x33   : > { %p8549_p10 = pnand %p8548_p9, %p8542_p4 }
  0x35   : > { %8552 = shalt.err (!%p8549_p10)
}
  0x36   : > { %7771 = dma.hbm_to_vmem [thread:$0]  (!%p8717_p5), %s10780_s1, 1024, %s8713_s11, [#allocation4], %s8633_s26, %s8633_s26, %s8634_s30  }
  0x37   : > { %s8553_s15 = scalar_lea.hbm %s10783_s4, 1024 }
  0x38   : > { %p8554_p11 = scmp.ne.s32.totalorder %s10783_s4, %s8553_s15  ;;  %p8560_p0 = scmp.lt.u32.totalorder %s8553_s15, %s10783_s4 }
  0x3a   : > { %p8556_p12 = pnand %p8554_p11, %p8733_p7 }
  0x3c   : > { %p8557_p13 = pneg %p8556_p12 }
  0x3e   : > { %p8562_p1 = pnand %p8560_p0, %p8557_p13 }
  0x40   : > { %8565 = shalt.err (!%p8562_p1)
}
  0x41   : > { %s8566_s11 = scalar_lea.vmem %s8721_s14, 1024  ;;  %p8574_p9 = scmp.lt.s32.totalorder %s8721_s14, %s8721_s14 }
  0x42   : > { %p8567_p4 = scmp.ne.s32.totalorder %s8721_s14, %s8566_s11  ;;  %p8575_p10 = scmp.lt.s32.totalorder %s8566_s11, %s8566_s11 }
  0x44   : > { %p8569_p6 = pnand %p8567_p4, %p8733_p7  ;;  %p8576_p11 = por %p8575_p10, %p8574_p9 }
  0x46   : > { %p8570_p8 = pneg %p8569_p6 }
  0x48   : > { %p8577_p12 = pnand %p8576_p11, %p8570_p8 }
  0x4a   : > { %8580 = shalt.err (!%p8577_p12)
}
  0x4b   : > { %7777 = dma.hbm_to_vmem [thread:$0]  (!%p8717_p5), %s10783_s4, 1024, %s8721_s14, [#allocation6], %s8633_s26, %s8633_s26, %s8634_s30  }
  0x4c   : > { %s8581_s25 = scalar_lea.hbm %s10785_s6, 256 }
  0x4d   : > { %p8582_p13 = scmp.ne.s32.totalorder %s10785_s6, %s8581_s25  ;;  %p8588_p4 = scmp.lt.u32.totalorder %s8581_s25, %s10785_s6 }
  0x4f   : > { %p8584_p0 = pnand %p8582_p13, %p8733_p7 }
  0x51   : > { %p8585_p1 = pneg %p8584_p0 }
  0x53   : > { %p8590_p6 = pnand %p8588_p4, %p8585_p1 }
  0x55   : > { %8593 = shalt.err (!%p8590_p6)
}
  0x56   : > { %s8594_s18 = scalar_lea.vmem %s283_s16, 256  ;;  %p8602_p11 = scmp.lt.s32.totalorder %s283_s16, %s283_s16 }
  0x57   : > { %p8595_p8 = scmp.ne.s32.totalorder %s283_s16, %s8594_s18  ;;  %p8603_p12 = scmp.lt.s32.totalorder %s8594_s18, %s8594_s18 }
  0x59   : > { %p8597_p9 = pnand %p8595_p8, %p8733_p7  ;;  %p8604_p2 = por %p8603_p12, %p8602_p11 }
  0x5b   : > { %p8598_p10 = pneg %p8597_p9 }
  0x5d   : > { %p8605_p3 = pnand %p8604_p2, %p8598_p10 }
  0x5f   : > { %8608 = shalt.err (!%p8605_p3)
}
  0x60   : > { %7780 = dma.hbm_to_vmem [thread:$0]  (!%p8717_p5), %s10785_s6, 256, %s283_s16, [#allocation9], %s8633_s26, %s8633_s26, %s8634_s30  }
  0x61   : > { %p10802_p13 = scmp.ne.s32.totalorder %s10799_s29, 0 }
  0x62   : > { %p10803_p7 = scmp.eq.s32.totalorder (!%p10802_p13), %s8700_s28, 0 }
  0x63   : > { %309 = sbr.rel (%p10802_p13) target bundleno = 8830 (0x227e), region = 52 }
  0x6a   : > { %8614 = dma.done.wait (%p10803_p7), [#allocation4], 1024   ;;  %p10804_p0 = pmov %p10803_p7 }
  0x6c   : > { %8616 = vsyncadd (%p10804_p0), [#allocation4], 4294966272  ;;  %p10805_p2 = pmov %p10804_p0 }
  0x6d   : > { %p10806_p3 = pmov %p10804_p0 }
  0x6e   : > { %8618 = dma.done.wait (%p10805_p2), [#allocation6], 2048  }
  0x6f   : > { %8620 = vsyncadd (%p10806_p3), [#allocation6], 4294965248  ;;  %p10807_p1 = pmov %p10804_p0 }
  0x70   : > { %p10808_p5 = pmov %p10804_p0 }
  0x71   : > { %8622 = dma.done.wait (%p10807_p1), [#allocation9], 256  }
  0x72   : > { %8624 = vsyncadd (%p10808_p5), [#allocation9], 4294967040  ;;  %p355_p4 = scmp.lt.s32.totalorder %s8700_s28, 1  ;;  %vm381_vm0 = vcmask 261120   ;;  %v511_v56 = vld [vmem:[#allocation3] sm:$0xff]  ;;  %v512_v57 = vld [vmem:[#allocation3 + $0x8] sm:$0xff] }
  0x73   : > { %v7320_v58 = vpack.c.bf16 %v512_v57, %v511_v56  ;;  %v513_v59 = vld [vmem:[#allocation3 + $0x10] sm:$0xff]  ;;  %v514_v60 = vld [vmem:[#allocation3 + $0x18] sm:$0xff]  ;;  %vm688_vm1 = vcmask 64512   ;;  %s8635_s20 = smov 96   ;;  %vm834_vm3 = vcmask 523264   ;;  %s8636_s30 = smov 64  }
  0x74   : > { %s10817_s28 = smov (!%p355_p4, %s8700_s28), 1  ;;  %v7324_v61 = vpack.c.bf16 %v514_v60, %v513_v59  ;;  %vm8954_vm2 = vmpackc.low %vm688_vm1, %vm688_vm1  ;;  %s8637_s11 = smov 88   ;;  %vm1551_vm4 = vcmask 130112   ;;  %vm2019_vm5 = vcmask 195712   ;;  %vm2487_vm6 = vcmask 261312  }
  0x75   : > { %s10790_s29 = sshll.u32 %s10817_s28, 6  ;;  %7321 = vmatprep.subr.bf16.mxu1 %v7320_v58  ;;  %s8638_s21 = smov 120  }
  0x76   : > { %s8855_s22 = scalar_lea.vmem %s10779_s0, %s10790_s29  ;;  %7323 = vmatpush3.bf16.msra.mxu1 %v7320_v58  ;;  %s8639_s24 = smov 56  }
  0x77   : > { %v365_v0 = vld [vmem:[%s8855_s22] sm:$0xff]  ;;  %v367_v1 = vld [vmem:[%s8855_s22 + $0x10] sm:$0xff]  ;;  %v366_v2 = vld [vmem:[%s8855_s22 + $0x8] sm:$0xff]  ;;  %7325 = vmatprep.subr.bf16.mxu1 %v7324_v61  ;;  %s8640_s25 = smov 80   ;;  %s8641_s10 = smov 112  }
  0x78   : > { %v382_v3 = vsel %vm381_vm0, %v365_v0, 0.0  ;;  %v388_v4 = vsel %vm381_vm0, %v367_v1, 0.0  ;;  %v368_v5 = vld [vmem:[%s8855_s22 + $0x18] sm:$0xff]  ;;  %v385_v6 = vsel %vm381_vm0, %v366_v2, 0.0  ;;  %v369_v8 = vld [vmem:[%s8855_s22 + $0x20] sm:$0xff]  ;;  %v370_v9 = vld [vmem:[%s8855_s22 + $0x28] sm:$0xff] }
  0x79   : > { %383 = vadd.xlane.f32.xlu0 %v382_v3  ;;  %389 = vadd.xlane.f32.xlu1 %v388_v4  ;;  %v391_v7 = vsel %vm381_vm0, %v368_v5, 0.0  ;;  %v394_v10 = vsel %vm381_vm0, %v369_v8, 0.0  ;;  %v397_v11 = vsel %vm381_vm0, %v370_v9, 0.0  ;;  %v371_v12 = vld [vmem:[%s8855_s22 + $0x30] sm:$0xff]  ;;  %v372_v13 = vld [vmem:[%s8855_s22 + $0x38] sm:$0xff]  ;;  %s8642_s19 = smov 48  }
  0x7a   : > { %v400_v14 = vsel %vm381_vm0, %v371_v12, 0.0  ;;  %v403_v15 = vsel %vm381_vm0, %v372_v13, 0.0  ;;  %7327 = vmatpush3.bf16.msra.mxu1 %v7324_v61  ;;  %s8643_s12 = smov 72   ;;  %s8644_s16 = smov 104  }
  0x7b   : > { %s10797_s26 = smov 40   ;;  %s10795_s23 = smov 8  }
  0x7c   : > { %s10793_s9 = smov 16   ;;  %s10791_s13 = smov 24  }
  0x7d   : > { %386 = vadd.xlane.f32.xlu0 %v385_v6  ;;  %392 = vadd.xlane.f32.xlu1 %v391_v7  ;;  %s10811_s17 = smov 40   ;;  %s10812_s18 = smov 8  }
  0x7e   : > { %s10813_s14 = smov 16  }
  0x81   : > { %395 = vadd.xlane.f32.xlu0 %v394_v10  ;;  %398 = vadd.xlane.f32.xlu1 %v397_v11 }
  0x85   : > { %401 = vadd.xlane.f32.xlu0 %v400_v14  ;;  %404 = vadd.xlane.f32.xlu1 %v403_v15 }
 0x106   : > { %v384_v16 = vpop.xlane.xlu0 %383  ;;  %v390_v17 = vpop.xlane.xlu1 %389 }
 0x107   : > { %v407_v18 = vmul.f32 0.03125, %v384_v16  ;;  %v409_v19 = vmul.f32 0.03125, %v390_v17 }
 0x109   : > { %v8873_v20 = vsub.f32 %v365_v0, %v407_v18  ;;  %v8875_v21 = vsub.f32 %v367_v1, %v409_v19 }
 0x10a   : > { %v387_v22 = vpop.xlane.xlu0 %386  ;;  %v393_v23 = vpop.xlane.xlu1 %392 }
 0x10b   : > { %v408_v24 = vmul.f32 0.03125, %v387_v22  ;;  %v410_v25 = vmul.f32 0.03125, %v393_v23  ;;  %v423_v26 = vmul.f32 %v8873_v20, %v8873_v20  ;;  %v425_v27 = vmul.f32 %v8875_v21, %v8875_v21  ;;  %v5954_v22 = vld [vmem:[#allocation8] ss:$0 sm:$0xff] }
 0x10d   : > { %v8881_v28 = vsub.f32 %v366_v2, %v408_v24  ;;  %v8883_v29 = vsub.f32 %v368_v5, %v410_v25  ;;  %v431_v30 = vsel %vm381_vm0, %v423_v26, 0.0  ;;  %v437_v33 = vsel %vm381_vm0, %v425_v27, 0.0  ;;  %v5955_v26 = vld [vmem:[#allocation8 + $0x1] ss:$0 sm:$0xff] }
 0x10e   : > { %432 = vadd.xlane.f32.xlu0 %v431_v30  ;;  %v396_v31 = vpop.xlane.xlu0 %395  ;;  %v399_v32 = vpop.xlane.xlu1 %398 }
 0x10f   : > { %v411_v34 = vmul.f32 0.03125, %v396_v31  ;;  %v412_v35 = vmul.f32 0.03125, %v399_v32  ;;  %v424_v36 = vmul.f32 %v8881_v28, %v8881_v28  ;;  %v426_v37 = vmul.f32 %v8883_v29, %v8883_v29 }
 0x111   : > { %v8891_v38 = vsub.f32 %v369_v8, %v411_v34  ;;  %v8893_v39 = vsub.f32 %v370_v9, %v412_v35  ;;  %v434_v40 = vsel %vm381_vm0, %v424_v36, 0.0  ;;  %v440_v43 = vsel %vm381_vm0, %v426_v37, 0.0 }
 0x112   : > { %438 = vadd.xlane.f32.xlu0 %v437_v33  ;;  %435 = vadd.xlane.f32.xlu1 %v434_v40  ;;  %v402_v41 = vpop.xlane.xlu0 %401  ;;  %v405_v42 = vpop.xlane.xlu1 %404 }
 0x113   : > { %v413_v44 = vmul.f32 0.03125, %v402_v41  ;;  %v414_v45 = vmul.f32 0.03125, %v405_v42  ;;  %v427_v46 = vmul.f32 %v8891_v38, %v8891_v38  ;;  %v428_v47 = vmul.f32 %v8893_v39, %v8893_v39 }
 0x115   : > { %v8901_v48 = vsub.f32 %v371_v12, %v413_v44  ;;  %v8903_v49 = vsub.f32 %v372_v13, %v414_v45  ;;  %v443_v50 = vsel %vm381_vm0, %v427_v46, 0.0  ;;  %v446_v51 = vsel %vm381_vm0, %v428_v47, 0.0 }
 0x116   : > { %441 = vadd.xlane.f32.xlu1 %v440_v43  ;;  %444 = vadd.xlane.f32.xlu0 %v443_v50 }
 0x117   : > { %v429_v52 = vmul.f32 %v8901_v48, %v8901_v48  ;;  %v430_v53 = vmul.f32 %v8903_v49, %v8903_v49 }
 0x119   : > { %v449_v54 = vsel %vm381_vm0, %v429_v52, 0.0  ;;  %v452_v55 = vsel %vm381_vm0, %v430_v53, 0.0 }
 0x11a   : > { %447 = vadd.xlane.f32.xlu1 %v446_v51  ;;  %450 = vadd.xlane.f32.xlu0 %v449_v54 }
 0x11e   : > { %453 = vadd.xlane.f32.xlu1 %v452_v55 }
 0x19b   : > { %v433_v62 = vpop.xlane.xlu0 %432 }
 0x19c   : > { %v455_v63 = vmul.f32 0.03125, %v433_v62 }
 0x19e   : > { %v463_v0 = vadd.f32 1e-05, %v455_v63 }
 0x19f   : > { %v436_v1 = vpop.xlane.xlu1 %435  ;;  %v439_v2 = vpop.xlane.xlu0 %438 }
 0x1a0   : > { %8137 = vrsqrt.f32 %v463_v0  ;;  %v456_v3 = vmul.f32 0.03125, %v436_v1  ;;  %v457_v4 = vmul.f32 0.03125, %v439_v2 }
 0x1a2   : > { %v464_v5 = vadd.f32 1e-05, %v456_v3  ;;  %v465_v6 = vadd.f32 1e-05, %v457_v4 }
 0x1a3   : > { %v442_v7 = vpop.xlane.xlu1 %441  ;;  %v445_v8 = vpop.xlane.xlu0 %444 }
 0x1a4   : > { %8139 = vrsqrt.f32 %v464_v5  ;;  %v458_v9 = vmul.f32 0.03125, %v442_v7  ;;  %v459_v10 = vmul.f32 0.03125, %v445_v8 }
 0x1a5   : > { %8141 = vrsqrt.f32 %v465_v6 }
 0x1a6   : > { %v466_v11 = vadd.f32 1e-05, %v458_v9  ;;  %v467_v12 = vadd.f32 1e-05, %v459_v10 }
 0x1a7   : > { %v448_v13 = vpop.xlane.xlu1 %447  ;;  %v451_v14 = vpop.xlane.xlu0 %450 }
 0x1a8   : > { %8143 = vrsqrt.f32 %v466_v11  ;;  %v460_v15 = vmul.f32 0.03125, %v448_v13  ;;  %v461_v16 = vmul.f32 0.03125, %v451_v14 }
 0x1a9   : > { %8145 = vrsqrt.f32 %v467_v12 }
 0x1aa   : > { %v8138_v17 = vpop.eup %8137  ;;  %v468_v18 = vadd.f32 1e-05, %v460_v15  ;;  %v469_v19 = vadd.f32 1e-05, %v461_v16 }
 0x1ab   : > { %v454_v23 = vpop.xlane.xlu1 %453  ;;  %v479_v24 = vmul.f32 %v8138_v17, %v8873_v20 }
 0x1ac   : > { %8147 = vrsqrt.f32 %v468_v18  ;;  %v462_v25 = vmul.f32 0.03125, %v454_v23 }
 0x1ad   : > { %8149 = vrsqrt.f32 %v469_v19  ;;  %v491_v27 = vmul.f32 %v5954_v22, %v479_v24 }
 0x1ae   : > { %v8140_v30 = vpop.eup %8139  ;;  %v470_v31 = vadd.f32 1e-05, %v462_v25 }
 0x1af   : > { %v8142_v32 = vpop.eup %8141  ;;  %v503_v33 = vadd.f32 %v5955_v26, %v491_v27  ;;  %v480_v34 = vmul.f32 %v8140_v30, %v8881_v28 }
 0x1b0   : > { %8151 = vrsqrt.f32 %v470_v31  ;;  %v481_v35 = vmul.f32 %v8142_v32, %v8875_v21 }
 0x1b1   : > { %6672 = vmatprep.mubr.msk.f32.mxu1 %vm381_vm0, %v503_v33  ;;  %v492_v36 = vmul.f32 %v5954_v22, %v480_v34 }
 0x1b2   : > { %v8144_v37 = vpop.eup %8143  ;;  %v493_v40 = vmul.f32 %v5954_v22, %v481_v35 }
 0x1b3   : > { %v8146_v20 = vpop.eup %8145  ;;  %v504_v41 = vadd.f32 %v5955_v26, %v492_v36  ;;  %v482_v42 = vmul.f32 %v8144_v37, %v8883_v29 }
 0x1b4   : > { %v505_v43 = vadd.f32 %v5955_v26, %v493_v40  ;;  %v483_v44 = vmul.f32 %v8146_v20, %v8891_v38 }
 0x1b5   : > { %6673 = vmatmul.mubr.msk.f32.vlgmr.msra.gmra.mrb[0].mxu1 %vm381_vm0, %v504_v41  ;;  %v494_v45 = vmul.f32 %v5954_v22, %v482_v42 }
 0x1b6   : > { %v8148_v46 = vpop.eup %8147  ;;  %6675 = vmatprep.mubr.msk.f32.mxu1 %vm381_vm0, %v505_v43  ;;  %v495_v28 = vmul.f32 %v5954_v22, %v483_v44  ;;  %v657_v43 = vld [vmem:[%s10781_s2 + $0x8] sm:$0xff]  ;;  %v656_v44 = vld [vmem:[%s10781_s2] sm:$0xff] }
 0x1b7   : > { %v8150_v21 = vpop.eup %8149  ;;  %v506_v47 = vadd.f32 %v5955_v26, %v494_v45  ;;  %v484_v50 = vmul.f32 %v8148_v46, %v8893_v39 }
 0x1b8   : > { %v507_v51 = vadd.f32 %v5955_v26, %v495_v28  ;;  %v485_v52 = vmul.f32 %v8150_v21, %v8901_v48  ;;  %v5956_v48 = vld [vmem:[%s10786_s7] ss:$0 sm:$0xff] }
 0x1b9   : > { %6676 = vmatmul.mubr.msk.f32.gmra.mrb[2].mxu1 %vm381_vm0, %v506_v47  ;;  %v496_v29 = vmul.f32 %v5954_v22, %v484_v50  ;;  %v659_v47 = vld [vmem:[%s10781_s2 + $0x18] sm:$0xff] }
 0x1ba   : > { %v8152_v53 = vpop.eup %8151  ;;  %6678 = vmatprep.mubr.msk.f32.mxu1 %vm381_vm0, %v507_v51  ;;  %v497_v38 = vmul.f32 %v5954_v22, %v485_v52 }
 0x1bb   : > { %v508_v54 = vadd.f32 %v5955_v26, %v496_v29  ;;  %v486_v55 = vmul.f32 %v8152_v53, %v8903_v49 }
 0x1bc   : > { %v509_v56 = vadd.f32 %v5955_v26, %v497_v38  ;;  %v658_v38 = vld [vmem:[%s10781_s2 + $0x10] sm:$0xff] }
 0x1bd   : > { %6679 = vmatmul.mubr.msk.f32.gmra.mrb[4].mxu1 %vm381_vm0, %v508_v54  ;;  %v498_v57 = vmul.f32 %v5954_v22, %v486_v55  ;;  %v661_v54 = vld [vmem:[%s10781_s2 + $0x28] sm:$0xff] }
 0x1be   : > { %6681 = vmatprep.mubr.msk.f32.mxu1 %vm381_vm0, %v509_v56 }
 0x1bf   : > { %v510_v39 = vadd.f32 %v5955_v26, %v498_v57 }
 0x1c1   : > { %6682 = vmatmul.mubr.msk.f32.gmra.mrb[6].mxu1 %vm381_vm0, %v510_v39 }
 0x288   : > { %v6674_v58 = vpop.f32.mrb[0].mxu1 }
 0x289   : > { %v615_v59 = vadd.f32 %v6674_v58, %v5956_v48  ;;  %v609_v60 = vpop.f32.mrb[1].mxu1  ;;  %v660_v58 = vld [vmem:[%s10781_s2 + $0x20] sm:$0xff] }
 0x28a   : > { %v610_v61 = vadd.f32 %v5956_v48, %v609_v60 }
 0x28b   : > { %v8974_v35 = vmul.f32 0.35355338, %v615_v59 }
 0x28c   : > { %v6677_v62 = vpop.f32.mrb[2].mxu1  ;;  %v8932_v49 = vpack.i.bf16 %v615_v59, %v610_v61  ;;  %v8934_v63 = vmul.f32 0.35355338, %v610_v61  ;;  %v663_v59 = vld [vmem:[%s10781_s2 + $0x38] sm:$0xff] }
 0x28d   : > { %v625_v0 = vadd.f32 %v6677_v62, %v5956_v48  ;;  %v619_v1 = vpop.f32.mrb[3].mxu1 }
 0x28e   : > { %v620_v2 = vadd.f32 %v5956_v48, %v619_v1  ;;  %7818 = vrot.lane.b32.xlu0 %v8932_v49, %s8635_s20  ;;  %6700 = vmatprep.mubr.msk.f32.mxu1 %vm688_vm1, %v8934_v63 }
 0x28f   : > { %v8982_v37 = vmul.f32 0.35355338, %v625_v0 }
 0x290   : > { %v6680_v3 = vpop.f32.mrb[4].mxu1  ;;  %v8940_v4 = vpack.i.bf16 %v625_v0, %v620_v2  ;;  %v8976_v36 = vmul.f32 0.35355338, %v620_v2 }
 0x291   : > { %v635_v5 = vadd.f32 %v6680_v3, %v5956_v48  ;;  %v629_v6 = vpop.f32.mrb[5].mxu1  ;;  %v662_v3 = vld [vmem:[%s10781_s2 + $0x30] sm:$0xff] }
 0x292   : > { %v630_v7 = vadd.f32 %v5956_v48, %v629_v6  ;;  %7823 = vrot.lane.b32.xlu1 %v8940_v4, %s8635_s20 }
 0x293   : > { %v8990_v20 = vmul.f32 0.35355338, %v635_v5 }
 0x294   : > { %v6683_v8 = vpop.f32.mrb[6].mxu1  ;;  %v8944_v9 = vpack.i.bf16 %v635_v5, %v630_v7  ;;  %v8984_v40 = vmul.f32 0.35355338, %v630_v7 }
 0x295   : > { %v645_v10 = vadd.f32 %v6683_v8, %v5956_v48  ;;  %v639_v11 = vpop.f32.mrb[7].mxu1 }
 0x296   : > { %v640_v12 = vadd.f32 %v5956_v48, %v639_v11  ;;  %7828 = vrot.lane.b32.xlu1 %v8944_v9, %s8635_s20 }
 0x297   : > { %v8998_v42 = vmul.f32 0.35355338, %v645_v10 }
 0x298   : > { %v8948_v13 = vpack.i.bf16 %v645_v10, %v640_v12  ;;  %v8992_v41 = vmul.f32 0.35355338, %v640_v12 }
 0x29a   : > { %7833 = vrot.lane.b32.xlu1 %v8948_v13, %s8635_s20 }
 0x300   : > { %v7819_v14 = vpop.permute.xlu0 %7818 }
 0x301   : > { %v7821_v15 = vunpack.i.h.bf16 %v7819_v14  ;;  %v7820_v16 = vunpack.i.l.bf16 %v7819_v14 }
 0x303   : > { %v7328_v18 = vpack.c.bf16 %v7821_v15, %v7820_v16 }
 0x304   : > { %v7824_v19 = vpop.permute.xlu1 %7823 }
 0x305   : > { %v7826_v22 = vunpack.i.h.bf16 %v7824_v19  ;;  %v7825_v23 = vunpack.i.l.bf16 %v7824_v19  ;;  %7330 = vmatprep.subr.msk.bf16.mxu1 %vm8954_vm2, %v7328_v18 }
 0x306   : > { %7333 = vmatpush3.bf16.xpose.msk.msra.mxu1 %vm8954_vm2, %v7328_v18 }
 0x307   : > { %v7334_v24 = vpack.c.bf16 %v7826_v22, %v7825_v23 }
 0x308   : > { %v7829_v25 = vpop.permute.xlu1 %7828 }
 0x309   : > { %v7831_v26 = vunpack.i.h.bf16 %v7829_v25  ;;  %v7830_v27 = vunpack.i.l.bf16 %v7829_v25  ;;  %7336 = vmatprep.subr.msk.bf16.mxu1 %vm8954_vm2, %v7334_v24 }
 0x30b   : > { %v7340_v30 = vpack.c.bf16 %v7831_v26, %v7830_v27 }
 0x30c   : > { %v7834_v31 = vpop.permute.xlu1 %7833 }
 0x30d   : > { %v7836_v32 = vunpack.i.h.bf16 %v7834_v31  ;;  %v7835_v33 = vunpack.i.l.bf16 %v7834_v31 }
 0x30e   : > { %7339 = vmatpush3.bf16.xpose.msk.msra.mxu1 %vm8954_vm2, %v7334_v24 }
 0x30f   : > { %7342 = vmatprep.subr.msk.bf16.mxu1 %vm8954_vm2, %v7340_v30  ;;  %v7346_v34 = vpack.c.bf16 %v7836_v32, %v7835_v33 }
 0x316   : > { %7345 = vmatpush3.bf16.xpose.msk.msra.mxu1 %vm8954_vm2, %v7340_v30 }
 0x317   : > { %7348 = vmatprep.subr.msk.bf16.mxu1 %vm8954_vm2, %v7346_v34 }
 0x31e   : > { %7351 = vmatpush3.bf16.xpose.msk.msra.mxu1 %vm8954_vm2, %v7346_v34 }
 0x325   : > { %6701 = vmatmul.mubr.msk.f32.vlgmr.msra.gmra.mrb[8].mxu1 %vm688_vm1, %v8974_v35 }
 0x326   : > { %6703 = vmatprep.mubr.msk.f32.mxu1 %vm688_vm1, %v8976_v36 }
 0x329   : > { %6704 = vmatmul.mubr.msk.f32.gmra.mrb[10].mxu1 %vm688_vm1, %v8982_v37 }
 0x32a   : > { %6706 = vmatprep.mubr.msk.f32.mxu1 %vm688_vm1, %v8984_v40 }
 0x32d   : > { %6707 = vmatmul.mubr.msk.f32.gmra.mrb[12].mxu1 %vm688_vm1, %v8990_v20 }
 0x32e   : > { %6709 = vmatprep.mubr.msk.f32.mxu1 %vm688_vm1, %v8992_v41 }
 0x331   : > { %6710 = vmatmul.mubr.msk.f32.gmra.mrb[14].mxu1 %vm688_vm1, %v8998_v42 }
 0x3f8   : > { %v6702_v45 = vpop.f32.mrb[8].mxu1 }
 0x3f9   : > { %v801_v46 = vadd.f32 %v6702_v45, %v657_v43  ;;  %v795_v28 = vpop.f32.mrb[9].mxu1 }
 0x3fa   : > { %v796_v21 = vadd.f32 %v795_v28, %v656_v44 }
 0x3fb   : > { %v838_v50 = vsel %vm834_vm3, %v801_v46, -inf }
 0x3fc   : > { %839 = vmax.xlane.f32.xlu1 %v838_v50  ;;  %v6705_v51 = vpop.f32.mrb[10].mxu1  ;;  %v835_v52 = vsel %vm834_vm3, %v796_v21, -inf }
 0x3fd   : > { %v811_v29 = vadd.f32 %v6705_v51, %v659_v47  ;;  %v805_v53 = vpop.f32.mrb[11].mxu1  ;;  %836 = vmax.xlane.f32.xlu0 %v835_v52 }
 0x3fe   : > { %v806_v56 = vadd.f32 %v805_v53, %v658_v38 }
 0x3ff   : > { %v844_v55 = vsel %vm834_vm3, %v811_v29, -inf }
 0x400   : > { %v6708_v57 = vpop.f32.mrb[12].mxu1  ;;  %v841_v0 = vsel %vm834_vm3, %v806_v56, -inf }
 0x401   : > { %v821_v39 = vadd.f32 %v6708_v57, %v661_v54  ;;  %v815_v48 = vpop.f32.mrb[13].mxu1  ;;  %845 = vmax.xlane.f32.xlu0 %v844_v55 }
 0x402   : > { %v816_v61 = vadd.f32 %v815_v48, %v660_v58 }
 0x403   : > { %v850_v60 = vsel %vm834_vm3, %v821_v39, -inf }
 0x404   : > { %851 = vmax.xlane.f32.xlu1 %v850_v60  ;;  %v6711_v62 = vpop.f32.mrb[14].mxu1  ;;  %v847_v7 = vsel %vm834_vm3, %v816_v61, -inf }
 0x405   : > { %v9028_v1 = vadd.f32 %v6711_v62, %v663_v59  ;;  %v825_v2 = vpop.f32.mrb[15].mxu1  ;;  %842 = vmax.xlane.f32.xlu0 %v841_v0 }
 0x406   : > { %v9035_v6 = vadd.f32 %v825_v2, %v662_v3 }
 0x407   : > { %v856_v5 = vsel %vm834_vm3, %v9028_v1, -inf }
 0x408   : > { %857 = vmax.xlane.f32.xlu1 %v856_v5  ;;  %v853_v8 = vsel %vm834_vm3, %v9035_v6, -inf }
 0x409   : > { %848 = vmax.xlane.f32.xlu0 %v847_v7 }
 0x40d   : > { %854 = vmax.xlane.f32.xlu0 %v853_v8 }
 0x419   : > { %7843 = vrot.lane.b32.xlu1 %v8940_v4, %s8636_s30 }
 0x41d   : > { %7848 = vrot.lane.b32.xlu1 %v8944_v9, %s8636_s30 }
 0x421   : > { %7853 = vrot.lane.b32.xlu1 %v8948_v13, %s8636_s30 }
 0x423   : > { %7838 = vrot.lane.b32.xlu0 %v8932_v49, %s8636_s30 }
 0x425   : > { %7863 = vrot.lane.b32.xlu1 %v8940_v4, %s8637_s11 }
 0x427   : > { %7858 = vrot.lane.b32.xlu0 %v8932_v49, %s8637_s11 }
 0x489   : > { %v840_v10 = vpop.xlane.xlu1 %839 }
 0x48a   : > { %v860_v11 = vsub.f32 %v801_v46, %v840_v10  ;;  %v837_v12 = vpop.xlane.xlu0 %836 }
 0x48b   : > { %v859_v14 = vsub.f32 %v796_v21, %v837_v12 }
 0x48c   : > { %v869_v15 = vmul.f32 1.442695, %v860_v11 }
 0x48d   : > { %v867_v16 = vmul.f32 1.442695, %v859_v14 }
 0x48e   : > { %8153 = vpow2.f32 %v869_v15  ;;  %v846_v18 = vpop.xlane.xlu0 %845 }
 0x48f   : > { %8155 = vpow2.f32 %v867_v16  ;;  %v862_v19 = vsub.f32 %v811_v29, %v846_v18 }
 0x491   : > { %v873_v22 = vmul.f32 1.442695, %v862_v19  ;;  %v852_v23 = vpop.xlane.xlu1 %851 }
 0x492   : > { %v864_v24 = vsub.f32 %v821_v39, %v852_v23  ;;  %v843_v25 = vpop.xlane.xlu0 %842 }
 0x493   : > { %8157 = vpow2.f32 %v873_v22  ;;  %v861_v26 = vsub.f32 %v806_v56, %v843_v25 }
 0x494   : > { %v877_v27 = vmul.f32 1.442695, %v864_v24 }
 0x495   : > { %v871_v30 = vmul.f32 1.442695, %v861_v26  ;;  %v858_v31 = vpop.xlane.xlu1 %857 }
 0x496   : > { %v849_v32 = vpop.xlane.xlu0 %848  ;;  %v866_v14 = vsub.f32 %v9028_v1, %v858_v31 }
 0x497   : > { %8159 = vpow2.f32 %v871_v30  ;;  %v863_v33 = vsub.f32 %v816_v61, %v849_v32 }
 0x498   : > { %v9052_v34 = vpop.eup %8153  ;;  %8161 = vpow2.f32 %v877_v27  ;;  %v881_v15 = vmul.f32 1.442695, %v866_v14 }
 0x499   : > { %v9054_v43 = vpop.eup %8155  ;;  %v875_v44 = vmul.f32 1.442695, %v863_v33  ;;  %v7844_v45 = vpop.permute.xlu1 %7843  ;;  %v886_v46 = vsel %vm834_vm3, %v9052_v34, 0.0 }
 0x49a   : > { %887 = vadd.xlane.f32.xlu1 %v886_v46  ;;  %v855_v28 = vpop.xlane.xlu0 %854  ;;  %v883_v21 = vsel %vm834_vm3, %v9054_v43, 0.0  ;;  %v7846_v29 = vunpack.i.h.bf16 %v7844_v45  ;;  %v7845_v53 = vunpack.i.l.bf16 %v7844_v45 }
 0x49b   : > { %884 = vadd.xlane.f32.xlu0 %v883_v21  ;;  %8163 = vpow2.f32 %v875_v44  ;;  %v865_v16 = vsub.f32 %v9035_v6, %v855_v28 }
 0x49c   : > { %v7356_v59 = vpack.c.bf16 %v7846_v29, %v7845_v53  ;;  %8165 = vpow2.f32 %v881_v15 }
 0x49d   : > { %v9060_v47 = vpop.eup %8157  ;;  %v7849_v50 = vpop.permute.xlu1 %7848  ;;  %v879_v18 = vmul.f32 1.442695, %v865_v16 }
 0x49e   : > { %v7839_v51 = vpop.permute.xlu0 %7838  ;;  %v892_v52 = vsel %vm834_vm3, %v9060_v47, 0.0  ;;  %v7851_v48 = vunpack.i.h.bf16 %v7849_v50  ;;  %v7850_v58 = vunpack.i.l.bf16 %v7849_v50 }
 0x49f   : > { %893 = vadd.xlane.f32.xlu1 %v892_v52  ;;  %v7841_v38 = vunpack.i.h.bf16 %v7839_v51  ;;  %v7840_v54 = vunpack.i.l.bf16 %v7839_v51  ;;  %8167 = vpow2.f32 %v879_v18 }
 0x4a0   : > { %v7360_v3 = vpack.c.bf16 %v7851_v48, %v7850_v58 }
 0x4a1   : > { %v9064_v55 = vpop.eup %8159  ;;  %v7352_v56 = vpack.c.bf16 %v7841_v38, %v7840_v54  ;;  %v7854_v60 = vpop.permute.xlu1 %7853 }
 0x4a2   : > { %v889_v57 = vsel %vm834_vm3, %v9064_v55, 0.0  ;;  %v9068_v39 = vpop.eup %8161  ;;  %v7856_v0 = vunpack.i.h.bf16 %v7854_v60  ;;  %v7855_v2 = vunpack.i.l.bf16 %v7854_v60  ;;  %v7859_v5 = vpop.permute.xlu0 %7858 }
 0x4a3   : > { %890 = vadd.xlane.f32.xlu0 %v889_v57  ;;  %7353 = vmatprep.subr.bf16.mxu0 %v7352_v56  ;;  %v898_v61 = vsel %vm834_vm3, %v9068_v39, 0.0  ;;  %v7861_v8 = vunpack.i.h.bf16 %v7859_v5  ;;  %v7860_v10 = vunpack.i.l.bf16 %v7859_v5 }
 0x4a4   : > { %7355 = vmatpush3.bf16.msra.mxu0 %v7352_v56  ;;  %v7364_v11 = vpack.c.bf16 %v7856_v0, %v7855_v2 }
 0x4a5   : > { %7357 = vmatprep.subr.bf16.mxu0 %v7356_v59  ;;  %v9072_v62 = vpop.eup %8163  ;;  %v7368_v12 = vpack.c.bf16 %v7861_v8, %v7860_v10  ;;  %v7864_v23 = vpop.permute.xlu1 %7863 }
 0x4a6   : > { %v895_v7 = vsel %vm834_vm3, %v9072_v62, 0.0  ;;  %v9090_v1 = vpop.eup %8165  ;;  %v7866_v32 = vunpack.i.h.bf16 %v7864_v23  ;;  %v7865_v33 = vunpack.i.l.bf16 %v7864_v23 }
 0x4a7   : > { %899 = vadd.xlane.f32.xlu0 %v898_v61  ;;  %v904_v6 = vsel %vm834_vm3, %v9090_v1, 0.0 }
 0x4a8   : > { %7359 = vmatpush3.bf16.msra.mxu0 %v7356_v59  ;;  %v7374_v28 = vpack.c.bf16 %v7866_v32, %v7865_v33  ;;  %v5992_v32 = vld [vmem:[%s10781_s2 + $0x58] sm:$0xff] }
 0x4a9   : > { %7361 = vmatprep.subr.bf16.mxu0 %v7360_v3  ;;  %v9096_v19 = vpop.eup %8167 }
 0x4aa   : > { %v901_v22 = vsel %vm834_vm3, %v9096_v19, 0.0 }
 0x4ab   : > { %896 = vadd.xlane.f32.xlu0 %v895_v7 }
 0x4ac   : > { %7363 = vmatpush3.bf16.msra.mxu0 %v7360_v3 }
 0x4ad   : > { %7365 = vmatprep.subr.bf16.mxu0 %v7364_v11 }
 0x4b0   : > { %7873 = vrot.lane.b32.xlu1 %v8948_v13, %s8637_s11  ;;  %7367 = vmatpush3.bf16.msra.mxu0 %v7364_v11 }
 0x4b1   : > { %7370 = vmatprep.subr.msk.bf16.mxu0 %vm8954_vm2, %v7368_v12 }
 0x4c1   : > { %7868 = vrot.lane.b32.xlu0 %v8944_v9, %s8637_s11 }
 0x4c5   : > { %1101 = vrot.lane.b32.xlu0 %v8934_v63, %s8638_s21 }
 0x4c9   : > { %1105 = vrot.lane.b32.xlu0 %v8976_v36, %s8638_s21 }
 0x4cd   : > { %1109 = vrot.lane.b32.xlu0 %v8984_v40, %s8638_s21 }
 0x4d1   : > { %1113 = vrot.lane.b32.xlu0 %v8992_v41, %s8638_s21 }
 0x4d4   : > { %905 = vadd.xlane.f32.xlu1 %v904_v6 }
 0x4d8   : > { %902 = vadd.xlane.f32.xlu1 %v901_v22 }
 0x4e9   : > { %1103 = vrot.lane.b32.xlu1 %v8974_v35, %s8638_s21 }
 0x4ed   : > { %1107 = vrot.lane.b32.xlu1 %v8982_v37, %s8638_s21 }
 0x4f1   : > { %1111 = vrot.lane.b32.xlu1 %v8990_v20, %s8638_s21 }
 0x4f5   : > { %1115 = vrot.lane.b32.xlu1 %v8998_v42, %s8638_s21 }
 0x527   : > { %v888_v24 = vpop.xlane.xlu1 %887 }
 0x528   : > { %8169 = vrcp.f32 %v888_v24  ;;  %v885_v25 = vpop.xlane.xlu0 %884  ;;  %v5990_v24 = vld [vmem:[%s10781_s2 + $0x48] sm:$0xff] }
 0x529   : > { %8171 = vrcp.f32 %v885_v25  ;;  %v5989_v25 = vld [vmem:[%s10781_s2 + $0x40] sm:$0xff] }
 0x52c   : > { %v894_v26 = vpop.xlane.xlu1 %893 }
 0x52d   : > { %8173 = vrcp.f32 %v894_v26 }
 0x530   : > { %v891_v27 = vpop.xlane.xlu0 %890  ;;  %v7874_v54 = vpop.permute.xlu1 %7873 }
 0x531   : > { %8175 = vrcp.f32 %v891_v27  ;;  %v7876_v48 = vunpack.i.h.bf16 %v7874_v54 }
 0x532   : > { %v8170_v30 = vpop.eup %8169 }
 0x533   : > { %v8172_v31 = vpop.eup %8171  ;;  %v924_v46 = vmul.f32 %v8170_v30, %v9052_v34 }
 0x534   : > { %v900_v44 = vpop.xlane.xlu0 %899  ;;  %v923_v45 = vmul.f32 %v8172_v31, %v9054_v43 }
 0x535   : > { %8177 = vrcp.f32 %v900_v44 }
 0x536   : > { %6728 = vmatprep.mubr.msk.f32.mxu0 %vm834_vm3, %v923_v45 }
 0x537   : > { %6729 = vmatmul.mubr.msk.f32.vlgmr.msra.gmra.mrb[0].mxu0 %vm834_vm3, %v924_v46  ;;  %v8174_v50 = vpop.eup %8173 }
 0x538   : > { %7373 = vmatpush3.bf16.xpose.msk.msra.mxu0 %vm8954_vm2, %v7368_v12  ;;  %v897_v21 = vpop.xlane.xlu0 %896  ;;  %v926_v53 = vmul.f32 %v8174_v50, %v9060_v47  ;;  %v5994_v50 = vld [vmem:[%s10781_s2 + $0x68] sm:$0xff] }
 0x539   : > { %8179 = vrcp.f32 %v897_v21  ;;  %7376 = vmatprep.subr.msk.bf16.mxu0 %vm8954_vm2, %v7374_v28  ;;  %v5991_v21 = vld [vmem:[%s10781_s2 + $0x50] sm:$0xff] }
 0x53b   : > { %v8176_v51 = vpop.eup %8175 }
 0x53c   : > { %v7869_v52 = vpop.permute.xlu0 %7868  ;;  %v925_v43 = vmul.f32 %v8176_v51, %v9064_v55  ;;  %v7875_v55 = vunpack.i.l.bf16 %v7874_v54 }
 0x53d   : > { %v7871_v34 = vunpack.i.h.bf16 %v7869_v52  ;;  %v7870_v29 = vunpack.i.l.bf16 %v7869_v52 }
 0x53e   : > { %6731 = vmatprep.mubr.msk.f32.mxu0 %vm834_vm3, %v925_v43  ;;  %v7386_v59 = vpack.c.bf16 %v7876_v48, %v7875_v55 }
 0x53f   : > { %v7380_v38 = vpack.c.bf16 %v7871_v34, %v7870_v29  ;;  %6732 = vmatmul.mubr.msk.f32.gmra.mrb[2].mxu0 %vm834_vm3, %v926_v53  ;;  %v8178_v56 = vpop.eup %8177  ;;  %v5993_v53 = vld [vmem:[%s10781_s2 + $0x60] sm:$0xff] }
 0x540   : > { %7379 = vmatpush3.bf16.xpose.msk.msra.mxu0 %vm8954_vm2, %v7374_v28  ;;  %v928_v47 = vmul.f32 %v8178_v56, %v9068_v39 }
 0x541   : > { %7382 = vmatprep.subr.msk.bf16.mxu0 %vm8954_vm2, %v7380_v38 }
 0x543   : > { %v8180_v57 = vpop.eup %8179 }
 0x544   : > { %v927_v58 = vmul.f32 %v8180_v57, %v9072_v62  ;;  %v1102_v62 = vpop.permute.xlu0 %1101 }
 0x546   : > { %6734 = vmatprep.mubr.msk.f32.mxu0 %vm834_vm3, %v927_v58 }
 0x547   : > { %6735 = vmatmul.mubr.msk.f32.gmra.mrb[4].mxu0 %vm834_vm3, %v928_v47  ;;  %v5995_v47 = vld [vmem:[%s10781_s2 + $0x70] sm:$0xff] }
 0x548   : > { %7385 = vmatpush3.bf16.xpose.msk.msra.mxu0 %vm8954_vm2, %v7380_v38  ;;  %v1106_v7 = vpop.permute.xlu0 %1105  ;;  %v5996_v38 = vld [vmem:[%s10781_s2 + $0x78] sm:$0xff] }
 0x549   : > { %7388 = vmatprep.subr.msk.bf16.mxu0 %vm8954_vm2, %v7386_v59 }
 0x54c   : > { %v1110_v10 = vpop.permute.xlu0 %1109 }
 0x550   : > { %7391 = vmatpush3.bf16.xpose.msk.msra.mxu0 %vm8954_vm2, %v7386_v59  ;;  %v1114_v12 = vpop.permute.xlu0 %1113 }
 0x561   : > { %v906_v60 = vpop.xlane.xlu1 %905 }
 0x562   : > { %8181 = vrcp.f32 %v906_v60 }
 0x565   : > { %v903_v61 = vpop.xlane.xlu1 %902 }
 0x566   : > { %8183 = vrcp.f32 %v903_v61 }
 0x569   : > { %v1104_v2 = vpop.permute.xlu1 %1103 }
 0x56c   : > { %v8182_v39 = vpop.eup %8181 }
 0x56d   : > { %v930_v5 = vmul.f32 %v8182_v39, %v9090_v1  ;;  %v1108_v8 = vpop.permute.xlu1 %1107 }
 0x570   : > { %v8184_v0 = vpop.eup %8183 }
 0x571   : > { %v929_v3 = vmul.f32 %v8184_v0, %v9096_v19  ;;  %v1112_v11 = vpop.permute.xlu1 %1111 }
 0x573   : > { %6737 = vmatprep.mubr.msk.f32.mxu0 %vm834_vm3, %v929_v3 }
 0x574   : > { %6738 = vmatmul.mubr.msk.f32.gmra.mrb[6].mxu0 %vm834_vm3, %v930_v5 }
 0x575   : > { %6756 = vmatprep.mubr.msk.f32.mxu0 %vm688_vm1, %v1102_v62  ;;  %v1116_v14 = vpop.permute.xlu1 %1115 }
 0x578   : > { %6757 = vmatmul.mubr.msk.f32.vlgmr.msra.gmra.mrb[8].mxu0 %vm688_vm1, %v1104_v2 }
 0x579   : > { %6759 = vmatprep.mubr.msk.f32.mxu0 %vm688_vm1, %v1106_v7 }
 0x57c   : > { %6760 = vmatmul.mubr.msk.f32.gmra.mrb[10].mxu0 %vm688_vm1, %v1108_v8 }
 0x57d   : > { %6762 = vmatprep.mubr.msk.f32.mxu0 %vm688_vm1, %v1110_v10 }
 0x580   : > { %6763 = vmatmul.mubr.msk.f32.gmra.mrb[12].mxu0 %vm688_vm1, %v1112_v11 }
 0x581   : > { %6765 = vmatprep.mubr.msk.f32.mxu0 %vm688_vm1, %v1114_v12 }
 0x584   : > { %6766 = vmatmul.mubr.msk.f32.gmra.mrb[14].mxu0 %vm688_vm1, %v1116_v14 }
 0x60a   : > { %v6730_v15 = vpop.f32.mrb[0].mxu0 }
 0x60b   : > { %1085 = vst.msk [vmem:[#allocation2 + $0x8] sm:$0xff] %vm688_vm1, %v6730_v15  ;;  %v1045_v16 = vpop.f32.mrb[1].mxu0 }
 0x60c   : > { %1084 = vst.msk [vmem:[#allocation2] sm:$0xff] %vm688_vm1, %v1045_v16 }
 0x612   : > { %v6733_v18 = vpop.f32.mrb[2].mxu0 }
 0x613   : > { %1087 = vst.msk [vmem:[#allocation2 + $0x18] sm:$0xff] %vm688_vm1, %v6733_v18  ;;  %v1055_v1 = vpop.f32.mrb[3].mxu0 }
 0x614   : > { %1086 = vst.msk [vmem:[#allocation2 + $0x10] sm:$0xff] %vm688_vm1, %v1055_v1 }
 0x61a   : > { %v6736_v6 = vpop.f32.mrb[4].mxu0 }
 0x61b   : > { %1089 = vst.msk [vmem:[#allocation2 + $0x28] sm:$0xff] %vm688_vm1, %v6736_v6  ;;  %v1065_v19 = vpop.f32.mrb[5].mxu0 }
 0x61c   : > { %1088 = vst.msk [vmem:[#allocation2 + $0x20] sm:$0xff] %vm688_vm1, %v1065_v19 }
 0x647   : > { %v6739_v22 = vpop.f32.mrb[6].mxu0 }
 0x648   : > { %1091 = vst.msk [vmem:[#allocation2 + $0x38] sm:$0xff] %vm688_vm1, %v6739_v22  ;;  %v1075_v23 = vpop.f32.mrb[7].mxu0 }
 0x649   : > { %1090 = vst.msk [vmem:[#allocation2 + $0x30] sm:$0xff] %vm688_vm1, %v1075_v23 }
 0x64b   : > { %v6758_v26 = vpop.f32.mrb[8].mxu0 }
 0x64c   : > { %v1237_v27 = vadd.f32 %v6758_v26, %v5990_v24  ;;  %v1231_v30 = vpop.f32.mrb[9].mxu0 }
 0x64d   : > { %v1232_v31 = vadd.f32 %v5989_v25, %v1231_v30 }
 0x64e   : > { %v1273_v33 = vsel %vm834_vm3, %v1237_v27, -inf }
 0x64f   : > { %1274 = vmax.xlane.f32.xlu1 %v1273_v33  ;;  %v6761_v44 = vpop.f32.mrb[10].mxu0  ;;  %v1270_v45 = vsel %vm834_vm3, %v1232_v31, -inf }
 0x650   : > { %v1247_v46 = vadd.f32 %v6761_v44, %v5992_v32  ;;  %v1241_v28 = vpop.f32.mrb[11].mxu0  ;;  %1271 = vmax.xlane.f32.xlu0 %v1270_v45 }
 0x651   : > { %v1242_v52 = vadd.f32 %v5991_v21, %v1241_v28 }
 0x652   : > { %v1279_v51 = vsel %vm834_vm3, %v1247_v46, -inf }
 0x653   : > { %v6764_v43 = vpop.f32.mrb[12].mxu0  ;;  %v1276_v48 = vsel %vm834_vm3, %v1242_v52, -inf }
 0x654   : > { %v1257_v34 = vadd.f32 %v6764_v43, %v5994_v50  ;;  %v1251_v29 = vpop.f32.mrb[13].mxu0  ;;  %1280 = vmax.xlane.f32.xlu0 %v1279_v51 }
 0x655   : > { %v1252_v56 = vadd.f32 %v5993_v53, %v1251_v29 }
 0x656   : > { %v1285_v54 = vsel %vm834_vm3, %v1257_v34, -inf }
 0x657   : > { %1286 = vmax.xlane.f32.xlu1 %v1285_v54  ;;  %v6767_v57 = vpop.f32.mrb[14].mxu0  ;;  %v1282_v61 = vsel %vm834_vm3, %v1252_v56, -inf }
 0x658   : > { %v9180_v55 = vadd.f32 %v6767_v57, %v5996_v38  ;;  %v1261_v58 = vpop.f32.mrb[15].mxu0  ;;  %1277 = vmax.xlane.f32.xlu0 %v1276_v48 }
 0x659   : > { %v9187_v60 = vadd.f32 %v5995_v47, %v1261_v58 }
 0x65a   : > { %v1291_v59 = vsel %vm834_vm3, %v9180_v55, -inf }
 0x65b   : > { %1292 = vmax.xlane.f32.xlu1 %v1291_v59  ;;  %v1288_v62 = vsel %vm834_vm3, %v9187_v60, -inf }
 0x65c   : > { %1283 = vmax.xlane.f32.xlu0 %v1282_v61 }
 0x660   : > { %1289 = vmax.xlane.f32.xlu0 %v1288_v62 }
 0x66c   : > { %7883 = vrot.lane.b32.xlu1 %v8940_v4, %s8639_s24 }
 0x670   : > { %7888 = vrot.lane.b32.xlu1 %v8944_v9, %s8639_s24 }
 0x674   : > { %7893 = vrot.lane.b32.xlu1 %v8948_v13, %s8639_s24 }
 0x676   : > { %7878 = vrot.lane.b32.xlu0 %v8932_v49, %s8639_s24 }
 0x678   : > { %7903 = vrot.lane.b32.xlu1 %v8940_v4, %s8640_s25 }
 0x67a   : > { %7898 = vrot.lane.b32.xlu0 %v8932_v49, %s8640_s25 }
 0x6dc   : > { %v1275_v39 = vpop.xlane.xlu1 %1274 }
 0x6dd   : > { %v1295_v0 = vsub.f32 %v1237_v27, %v1275_v39  ;;  %v1272_v2 = vpop.xlane.xlu0 %1271 }
 0x6de   : > { %v1294_v3 = vsub.f32 %v1232_v31, %v1272_v2 }
 0x6df   : > { %v1304_v5 = vmul.f32 1.442695, %v1295_v0 }
 0x6e0   : > { %v1302_v7 = vmul.f32 1.442695, %v1294_v3 }
 0x6e1   : > { %8185 = vpow2.f32 %v1304_v5  ;;  %v1281_v8 = vpop.xlane.xlu0 %1280 }
 0x6e2   : > { %8187 = vpow2.f32 %v1302_v7  ;;  %v1297_v10 = vsub.f32 %v1247_v46, %v1281_v8 }
 0x6e4   : > { %v1308_v11 = vmul.f32 1.442695, %v1297_v10  ;;  %v1287_v12 = vpop.xlane.xlu1 %1286 }
 0x6e5   : > { %v1299_v14 = vsub.f32 %v1257_v34, %v1287_v12  ;;  %v1278_v15 = vpop.xlane.xlu0 %1277 }
 0x6e6   : > { %8189 = vpow2.f32 %v1308_v11  ;;  %v1296_v16 = vsub.f32 %v1242_v52, %v1278_v15 }
 0x6e7   : > { %v1312_v18 = vmul.f32 1.442695, %v1299_v14 }
 0x6e8   : > { %v1306_v1 = vmul.f32 1.442695, %v1296_v16  ;;  %v1293_v6 = vpop.xlane.xlu1 %1292 }
 0x6e9   : > { %v1284_v19 = vpop.xlane.xlu0 %1283  ;;  %v1301_v3 = vsub.f32 %v9180_v55, %v1293_v6 }
 0x6ea   : > { %8191 = vpow2.f32 %v1306_v1  ;;  %v1298_v22 = vsub.f32 %v1252_v56, %v1284_v19 }
 0x6eb   : > { %v9204_v23 = vpop.eup %8185  ;;  %8193 = vpow2.f32 %v1312_v18  ;;  %v1316_v5 = vmul.f32 1.442695, %v1301_v3 }
 0x6ec   : > { %v9206_v24 = vpop.eup %8187  ;;  %v1310_v25 = vmul.f32 1.442695, %v1298_v22  ;;  %v7884_v26 = vpop.permute.xlu1 %7883  ;;  %v1321_v27 = vsel %vm834_vm3, %v9204_v23, 0.0 }
 0x6ed   : > { %1322 = vadd.xlane.f32.xlu1 %v1321_v27  ;;  %v1290_v30 = vpop.xlane.xlu0 %1289  ;;  %v1318_v31 = vsel %vm834_vm3, %v9206_v24, 0.0  ;;  %v7886_v46 = vunpack.i.h.bf16 %v7884_v26  ;;  %v7885_v28 = vunpack.i.l.bf16 %v7884_v26 }
 0x6ee   : > { %1319 = vadd.xlane.f32.xlu0 %v1318_v31  ;;  %8195 = vpow2.f32 %v1310_v25  ;;  %v1300_v7 = vsub.f32 %v9187_v60, %v1290_v30 }
 0x6ef   : > { %v7396_v38 = vpack.c.bf16 %v7886_v46, %v7885_v28  ;;  %8197 = vpow2.f32 %v1316_v5 }
 0x6f0   : > { %v9212_v32 = vpop.eup %8189  ;;  %v7889_v33 = vpop.permute.xlu1 %7888  ;;  %v1314_v8 = vmul.f32 1.442695, %v1300_v7 }
 0x6f1   : > { %v7879_v44 = vpop.permute.xlu0 %7878  ;;  %v1327_v45 = vsel %vm834_vm3, %v9212_v32, 0.0  ;;  %v7891_v29 = vunpack.i.h.bf16 %v7889_v33  ;;  %v7890_v53 = vunpack.i.l.bf16 %v7889_v33 }
 0x6f2   : > { %v7881_v21 = vunpack.i.h.bf16 %v7879_v44  ;;  %v7880_v50 = vunpack.i.l.bf16 %v7879_v44  ;;  %1328 = vadd.xlane.f32.xlu1 %v1327_v45  ;;  %8199 = vpow2.f32 %v1314_v8 }
 0x6f3   : > { %v7400_v47 = vpack.c.bf16 %v7891_v29, %v7890_v53 }
 0x6f4   : > { %v9216_v51 = vpop.eup %8191  ;;  %v7392_v52 = vpack.c.bf16 %v7881_v21, %v7880_v50  ;;  %v7894_v54 = vpop.permute.xlu1 %7893 }
 0x6f5   : > { %v1324_v43 = vsel %vm834_vm3, %v9216_v51, 0.0  ;;  %v9220_v34 = vpop.eup %8193  ;;  %v7896_v48 = vunpack.i.h.bf16 %v7894_v54  ;;  %v7895_v58 = vunpack.i.l.bf16 %v7894_v54  ;;  %v7899_v59 = vpop.permute.xlu0 %7898 }
 0x6f6   : > { %1325 = vadd.xlane.f32.xlu0 %v1324_v43  ;;  %7393 = vmatprep.subr.bf16.mxu1 %v7392_v52  ;;  %v1333_v56 = vsel %vm834_vm3, %v9220_v34, 0.0  ;;  %v7901_v62 = vunpack.i.h.bf16 %v7899_v59  ;;  %v7900_v39 = vunpack.i.l.bf16 %v7899_v59 }
 0x6f7   : > { %7395 = vmatpush3.bf16.msra.mxu1 %v7392_v52  ;;  %v7404_v0 = vpack.c.bf16 %v7896_v48, %v7895_v58 }
 0x6f8   : > { %7397 = vmatprep.subr.bf16.mxu1 %v7396_v38  ;;  %v9224_v57 = vpop.eup %8195  ;;  %v7408_v2 = vpack.c.bf16 %v7901_v62, %v7900_v39  ;;  %v7904_v12 = vpop.permute.xlu1 %7903 }
 0x6f9   : > { %v1330_v61 = vsel %vm834_vm3, %v9224_v57, 0.0  ;;  %v9242_v55 = vpop.eup %8197  ;;  %v7906_v19 = vunpack.i.h.bf16 %v7904_v12  ;;  %v7905_v22 = vunpack.i.l.bf16 %v7904_v12 }
 0x6fa   : > { %1334 = vadd.xlane.f32.xlu0 %v1333_v56  ;;  %v1339_v60 = vsel %vm834_vm3, %v9242_v55, 0.0 }
 0x6fb   : > { %7399 = vmatpush3.bf16.msra.mxu1 %v7396_v38  ;;  %v7414_v30 = vpack.c.bf16 %v7906_v19, %v7905_v22  ;;  %v6024_v19 = vld [vmem:[%s10781_s2 + $0x98] sm:$0xff] }
 0x6fc   : > { %7401 = vmatprep.subr.bf16.mxu1 %v7400_v47  ;;  %v9248_v10 = vpop.eup %8199 }
 0x6fd   : > { %v1336_v11 = vsel %vm834_vm3, %v9248_v10, 0.0 }
 0x6fe   : > { %1331 = vadd.xlane.f32.xlu0 %v1330_v61 }
 0x6ff   : > { %7403 = vmatpush3.bf16.msra.mxu1 %v7400_v47 }
 0x700   : > { %7405 = vmatprep.subr.bf16.mxu1 %v7404_v0 }
 0x703   : > { %7913 = vrot.lane.b32.xlu1 %v8948_v13, %s8640_s25  ;;  %7407 = vmatpush3.bf16.msra.mxu1 %v7404_v0 }
 0x704   : > { %7410 = vmatprep.subr.msk.bf16.mxu1 %vm8954_vm2, %v7408_v2 }
 0x714   : > { %7908 = vrot.lane.b32.xlu0 %v8944_v9, %s8640_s25 }
 0x718   : > { %1569 = vrot.lane.b32.xlu0 %v8934_v63, %s8641_s10 }
 0x71c   : > { %1573 = vrot.lane.b32.xlu0 %v8976_v36, %s8641_s10 }
 0x720   : > { %1577 = vrot.lane.b32.xlu0 %v8984_v40, %s8641_s10 }
 0x724   : > { %1581 = vrot.lane.b32.xlu0 %v8992_v41, %s8641_s10 }
 0x727   : > { %1340 = vadd.xlane.f32.xlu1 %v1339_v60 }
 0x72b   : > { %1337 = vadd.xlane.f32.xlu1 %v1336_v11 }
 0x73c   : > { %1571 = vrot.lane.b32.xlu1 %v8974_v35, %s8641_s10 }
 0x740   : > { %1575 = vrot.lane.b32.xlu1 %v8982_v37, %s8641_s10 }
 0x744   : > { %1579 = vrot.lane.b32.xlu1 %v8990_v20, %s8641_s10 }
 0x748   : > { %1583 = vrot.lane.b32.xlu1 %v8998_v42, %s8641_s10 }
 0x77a   : > { %v1323_v14 = vpop.xlane.xlu1 %1322 }
 0x77b   : > { %8201 = vrcp.f32 %v1323_v14  ;;  %v1320_v15 = vpop.xlane.xlu0 %1319  ;;  %v6022_v14 = vld [vmem:[%s10781_s2 + $0x88] sm:$0xff] }
 0x77c   : > { %8203 = vrcp.f32 %v1320_v15  ;;  %v6021_v15 = vld [vmem:[%s10781_s2 + $0x80] sm:$0xff] }
 0x77f   : > { %v1329_v16 = vpop.xlane.xlu1 %1328 }
 0x780   : > { %8205 = vrcp.f32 %v1329_v16 }
 0x783   : > { %v1326_v18 = vpop.xlane.xlu0 %1325  ;;  %v7914_v50 = vpop.permute.xlu1 %7913 }
 0x784   : > { %8207 = vrcp.f32 %v1326_v18  ;;  %v7916_v29 = vunpack.i.h.bf16 %v7914_v50 }
 0x785   : > { %v8202_v1 = vpop.eup %8201 }
 0x786   : > { %v8204_v6 = vpop.eup %8203  ;;  %v1359_v27 = vmul.f32 %v8202_v1, %v9204_v23 }
 0x787   : > { %v1335_v25 = vpop.xlane.xlu0 %1334  ;;  %v1358_v26 = vmul.f32 %v8204_v6, %v9206_v24 }
 0x788   : > { %8209 = vrcp.f32 %v1335_v25 }
 0x789   : > { %6784 = vmatprep.mubr.msk.f32.mxu1 %vm834_vm3, %v1358_v26 }
 0x78a   : > { %6785 = vmatmul.mubr.msk.f32.vlgmr.msra.gmra.mrb[16].mxu1 %vm834_vm3, %v1359_v27  ;;  %v8206_v33 = vpop.eup %8205 }
 0x78b   : > { %7413 = vmatpush3.bf16.xpose.msk.msra.mxu1 %vm8954_vm2, %v7408_v2  ;;  %v1332_v31 = vpop.xlane.xlu0 %1331  ;;  %v1361_v28 = vmul.f32 %v8206_v33, %v9212_v32  ;;  %v6026_v33 = vld [vmem:[%s10781_s2 + $0xa8] sm:$0xff] }
 0x78c   : > { %8211 = vrcp.f32 %v1332_v31  ;;  %7416 = vmatprep.subr.msk.bf16.mxu1 %vm8954_vm2, %v7414_v30  ;;  %v6023_v31 = vld [vmem:[%s10781_s2 + $0x90] sm:$0xff] }
 0x78e   : > { %v8208_v44 = vpop.eup %8207 }
 0x78f   : > { %v7909_v45 = vpop.permute.xlu0 %7908  ;;  %v1360_v24 = vmul.f32 %v8208_v44, %v9216_v51  ;;  %v7915_v51 = vunpack.i.l.bf16 %v7914_v50 }
 0x790   : > { %v7911_v23 = vunpack.i.h.bf16 %v7909_v45  ;;  %v7910_v46 = vunpack.i.l.bf16 %v7909_v45 }
 0x791   : > { %6787 = vmatprep.mubr.msk.f32.mxu1 %vm834_vm3, %v1360_v24  ;;  %v7426_v38 = vpack.c.bf16 %v7916_v29, %v7915_v51 }
 0x792   : > { %v7420_v21 = vpack.c.bf16 %v7911_v23, %v7910_v46  ;;  %6788 = vmatmul.mubr.msk.f32.gmra.mrb[18].mxu1 %vm834_vm3, %v1361_v28  ;;  %v8210_v52 = vpop.eup %8209  ;;  %v6025_v28 = vld [vmem:[%s10781_s2 + $0xa0] sm:$0xff] }
 0x793   : > { %7419 = vmatpush3.bf16.xpose.msk.msra.mxu1 %vm8954_vm2, %v7414_v30  ;;  %v1363_v32 = vmul.f32 %v8210_v52, %v9220_v34 }
 0x794   : > { %7422 = vmatprep.subr.msk.bf16.mxu1 %vm8954_vm2, %v7420_v21 }
 0x796   : > { %v8212_v43 = vpop.eup %8211 }
 0x797   : > { %v1362_v53 = vmul.f32 %v8212_v43, %v9224_v57  ;;  %v1570_v57 = vpop.permute.xlu0 %1569 }
 0x799   : > { %6790 = vmatprep.mubr.msk.f32.mxu1 %vm834_vm3, %v1362_v53 }
 0x79a   : > { %6791 = vmatmul.mubr.msk.f32.gmra.mrb[20].mxu1 %vm834_vm3, %v1363_v32  ;;  %v6027_v32 = vld [vmem:[%s10781_s2 + $0xb0] sm:$0xff] }
 0x79b   : > { %7425 = vmatpush3.bf16.xpose.msk.msra.mxu1 %vm8954_vm2, %v7420_v21  ;;  %v1574_v61 = vpop.permute.xlu0 %1573  ;;  %v6028_v21 = vld [vmem:[%s10781_s2 + $0xb8] sm:$0xff] }
 0x79c   : > { %7428 = vmatprep.subr.msk.bf16.mxu1 %vm8954_vm2, %v7426_v38 }
 0x79f   : > { %v1578_v39 = vpop.permute.xlu0 %1577 }
 0x7a3   : > { %7431 = vmatpush3.bf16.xpose.msk.msra.mxu1 %vm8954_vm2, %v7426_v38  ;;  %v1582_v2 = vpop.permute.xlu0 %1581 }
 0x7b4   : > { %v1341_v54 = vpop.xlane.xlu1 %1340 }
 0x7b5   : > { %8213 = vrcp.f32 %v1341_v54 }
 0x7b8   : > { %v1338_v56 = vpop.xlane.xlu1 %1337 }
 0x7b9   : > { %8215 = vrcp.f32 %v1338_v56 }
 0x7bc   : > { %v1572_v58 = vpop.permute.xlu1 %1571 }
 0x7bf   : > { %v8214_v34 = vpop.eup %8213 }
 0x7c0   : > { %v1365_v59 = vmul.f32 %v8214_v34, %v9242_v55  ;;  %v1576_v62 = vpop.permute.xlu1 %1575 }
 0x7c3   : > { %v8216_v48 = vpop.eup %8215 }
 0x7c4   : > { %v1364_v47 = vmul.f32 %v8216_v48, %v9248_v10  ;;  %v1580_v0 = vpop.permute.xlu1 %1579 }
 0x7c6   : > { %6793 = vmatprep.mubr.msk.f32.mxu1 %vm834_vm3, %v1364_v47 }
 0x7c7   : > { %6794 = vmatmul.mubr.msk.f32.gmra.mrb[22].mxu1 %vm834_vm3, %v1365_v59 }
 0x7c8   : > { %6812 = vmatprep.mubr.msk.f32.mxu1 %vm688_vm1, %v1570_v57  ;;  %v1584_v3 = vpop.permute.xlu1 %1583 }
 0x7cb   : > { %6813 = vmatmul.mubr.msk.f32.vlgmr.msra.gmra.mrb[24].mxu1 %vm688_vm1, %v1572_v58 }
 0x7cc   : > { %6815 = vmatprep.mubr.msk.f32.mxu1 %vm688_vm1, %v1574_v61 }
 0x7cf   : > { %6816 = vmatmul.mubr.msk.f32.gmra.mrb[26].mxu1 %vm688_vm1, %v1576_v62 }
 0x7d0   : > { %6818 = vmatprep.mubr.msk.f32.mxu1 %vm688_vm1, %v1578_v39 }
 0x7d3   : > { %6819 = vmatmul.mubr.msk.f32.gmra.mrb[28].mxu1 %vm688_vm1, %v1580_v0 }
 0x7d4   : > { %6821 = vmatprep.mubr.msk.f32.mxu1 %vm688_vm1, %v1582_v2 }
 0x7d7   : > { %6822 = vmatmul.mubr.msk.f32.gmra.mrb[30].mxu1 %vm688_vm1, %v1584_v3 }
 0x85d   : > { %v9298_v5 = vpop.f32.mrb[16].mxu1 }
 0x85e   : > { %v9300_v7 = vpop.f32.mrb[17].mxu1 }
 0x865   : > { %v9302_v8 = vpop.f32.mrb[18].mxu1 }
 0x866   : > { %v9304_v55 = vpop.f32.mrb[19].mxu1 }
 0x86d   : > { %v9306_v60 = vpop.f32.mrb[20].mxu1 }
 0x86e   : > { %v9308_v10 = vpop.f32.mrb[21].mxu1 }
 0x89a   : > { %v9310_v11 = vpop.f32.mrb[22].mxu1 }
 0x89b   : > { %v9312_v12 = vpop.f32.mrb[23].mxu1 }
 0x89e   : > { %v6814_v16 = vpop.f32.mrb[24].mxu1 }
 0x89f   : > { %v1705_v18 = vadd.f32 %v6814_v16, %v6022_v14  ;;  %v1699_v1 = vpop.f32.mrb[25].mxu1 }
 0x8a0   : > { %v1700_v6 = vadd.f32 %v6021_v15, %v1699_v1 }
 0x8a1   : > { %v1741_v22 = vsel %vm834_vm3, %v1705_v18, -inf }
 0x8a2   : > { %1742 = vmax.xlane.f32.xlu1 %v1741_v22  ;;  %v6817_v25 = vpop.f32.mrb[26].mxu1  ;;  %v1738_v26 = vsel %vm834_vm3, %v1700_v6, -inf }
 0x8a3   : > { %v1715_v27 = vadd.f32 %v6817_v25, %v6024_v19  ;;  %v1709_v30 = vpop.f32.mrb[27].mxu1  ;;  %1739 = vmax.xlane.f32.xlu0 %v1738_v26 }
 0x8a4   : > { %v1710_v45 = vadd.f32 %v6023_v31, %v1709_v30 }
 0x8a5   : > { %v1747_v44 = vsel %vm834_vm3, %v1715_v27, -inf }
 0x8a6   : > { %v6820_v24 = vpop.f32.mrb[28].mxu1  ;;  %v1744_v29 = vsel %vm834_vm3, %v1710_v45, -inf }
 0x8a7   : > { %v1725_v23 = vadd.f32 %v6820_v24, %v6026_v33  ;;  %v1719_v46 = vpop.f32.mrb[29].mxu1  ;;  %1748 = vmax.xlane.f32.xlu0 %v1747_v44 }
 0x8a8   : > { %v1720_v52 = vadd.f32 %v6025_v28, %v1719_v46 }
 0x8a9   : > { %v1753_v50 = vsel %vm834_vm3, %v1725_v23, -inf }
 0x8aa   : > { %1754 = vmax.xlane.f32.xlu1 %v1753_v50  ;;  %v6823_v43 = vpop.f32.mrb[30].mxu1  ;;  %v1750_v56 = vsel %vm834_vm3, %v1720_v52, -inf }
 0x8ab   : > { %v9340_v51 = vadd.f32 %v6823_v43, %v6028_v21  ;;  %v1729_v53 = vpop.f32.mrb[31].mxu1  ;;  %1745 = vmax.xlane.f32.xlu0 %v1744_v29 }
 0x8ac   : > { %v9347_v54 = vadd.f32 %v6027_v32, %v1729_v53 }
 0x8ad   : > { %v1759_v38 = vsel %vm834_vm3, %v9340_v51, -inf }
 0x8ae   : > { %1760 = vmax.xlane.f32.xlu1 %v1759_v38  ;;  %v1756_v57 = vsel %vm834_vm3, %v9347_v54, -inf }
 0x8af   : > { %1751 = vmax.xlane.f32.xlu0 %v1750_v56 }
 0x8b3   : > { %1757 = vmax.xlane.f32.xlu0 %v1756_v57 }
 0x8bf   : > { %7923 = vrot.lane.b32.xlu1 %v8940_v4, %s8642_s19 }
 0x8c3   : > { %7928 = vrot.lane.b32.xlu1 %v8944_v9, %s8642_s19 }
 0x8c7   : > { %7933 = vrot.lane.b32.xlu1 %v8948_v13, %s8642_s19 }
 0x8c9   : > { %7918 = vrot.lane.b32.xlu0 %v8932_v49, %s8642_s19 }
 0x8cb   : > { %7943 = vrot.lane.b32.xlu1 %v8940_v4, %s8643_s12 }
 0x8cd   : > { %7938 = vrot.lane.b32.xlu0 %v8932_v49, %s8643_s12 }
 0x92f   : > { %v1743_v34 = vpop.xlane.xlu1 %1742 }
 0x930   : > { %v1763_v48 = vsub.f32 %v1705_v18, %v1743_v34  ;;  %v1740_v58 = vpop.xlane.xlu0 %1739 }
 0x931   : > { %v1762_v47 = vsub.f32 %v1700_v6, %v1740_v58 }
 0x932   : > { %v1772_v59 = vmul.f32 1.442695, %v1763_v48 }
 0x933   : > { %v1770_v61 = vmul.f32 1.442695, %v1762_v47 }
 0x934   : > { %8217 = vpow2.f32 %v1772_v59  ;;  %v1749_v62 = vpop.xlane.xlu0 %1748 }
 0x935   : > { %8219 = vpow2.f32 %v1770_v61  ;;  %v1765_v39 = vsub.f32 %v1715_v27, %v1749_v62 }
 0x937   : > { %v1776_v0 = vmul.f32 1.442695, %v1765_v39  ;;  %v1755_v2 = vpop.xlane.xlu1 %1754 }
 0x938   : > { %v1767_v3 = vsub.f32 %v1725_v23, %v1755_v2  ;;  %v1746_v14 = vpop.xlane.xlu0 %1745 }
 0x939   : > { %8221 = vpow2.f32 %v1776_v0  ;;  %v1764_v15 = vsub.f32 %v1710_v45, %v1746_v14 }
 0x93a   : > { %v1780_v16 = vmul.f32 1.442695, %v1767_v3 }
 0x93b   : > { %v1774_v1 = vmul.f32 1.442695, %v1764_v15  ;;  %v1761_v19 = vpop.xlane.xlu1 %1760 }
 0x93c   : > { %v1752_v22 = vpop.xlane.xlu0 %1751  ;;  %v1769_v14 = vsub.f32 %v9340_v51, %v1761_v19 }
 0x93d   : > { %8223 = vpow2.f32 %v1774_v1  ;;  %v1766_v18 = vsub.f32 %v1720_v52, %v1752_v22 }
 0x93e   : > { %v9364_v25 = vpop.eup %8217  ;;  %8225 = vpow2.f32 %v1780_v16  ;;  %v1784_v15 = vmul.f32 1.442695, %v1769_v14 }
 0x93f   : > { %v9366_v6 = vpop.eup %8219  ;;  %v1778_v26 = vmul.f32 1.442695, %v1766_v18  ;;  %v7924_v30 = vpop.permute.xlu1 %7923  ;;  %v1789_v27 = vsel %vm834_vm3, %v9364_v25, 0.0 }
 0x940   : > { %1790 = vadd.xlane.f32.xlu1 %v1789_v27  ;;  %v1758_v31 = vpop.xlane.xlu0 %1757  ;;  %v1786_v33 = vsel %vm834_vm3, %v9366_v6, 0.0  ;;  %v7926_v46 = vunpack.i.h.bf16 %v7924_v30  ;;  %v7925_v28 = vunpack.i.l.bf16 %v7924_v30 }
 0x941   : > { %1787 = vadd.xlane.f32.xlu0 %v1786_v33  ;;  %8227 = vpow2.f32 %v1778_v26  ;;  %v1768_v16 = vsub.f32 %v9347_v54, %v1758_v31 }
 0x942   : > { %v7436_v56 = vpack.c.bf16 %v7926_v46, %v7925_v28  ;;  %8229 = vpow2.f32 %v1784_v15 }
 0x943   : > { %v9372_v44 = vpop.eup %8221  ;;  %v7929_v45 = vpop.permute.xlu1 %7928  ;;  %v1782_v1 = vmul.f32 1.442695, %v1768_v16 }
 0x944   : > { %v7919_v24 = vpop.permute.xlu0 %7918  ;;  %v1795_v23 = vsel %vm834_vm3, %v9372_v44, 0.0  ;;  %v7931_v32 = vunpack.i.h.bf16 %v7929_v45  ;;  %v7930_v38 = vunpack.i.l.bf16 %v7929_v45 }
 0x945   : > { %v7921_v21 = vunpack.i.h.bf16 %v7919_v24  ;;  %v7920_v50 = vunpack.i.l.bf16 %v7919_v24  ;;  %1796 = vadd.xlane.f32.xlu1 %v1795_v23  ;;  %8231 = vpow2.f32 %v1782_v1 }
 0x946   : > { %v7440_v59 = vpack.c.bf16 %v7931_v32, %v7930_v38 }
 0x947   : > { %v9376_v52 = vpop.eup %8223  ;;  %v7432_v43 = vpack.c.bf16 %v7921_v21, %v7920_v50  ;;  %v7934_v57 = vpop.permute.xlu1 %7933 }
 0x948   : > { %v1792_v29 = vsel %vm834_vm3, %v9376_v52, 0.0  ;;  %v9380_v53 = vpop.eup %8225  ;;  %v7936_v58 = vunpack.i.h.bf16 %v7934_v57  ;;  %v7935_v47 = vunpack.i.l.bf16 %v7934_v57  ;;  %v7939_v61 = vpop.permute.xlu0 %7938 }
 0x949   : > { %1793 = vadd.xlane.f32.xlu0 %v1792_v29  ;;  %7433 = vmatprep.subr.bf16.mxu0 %v7432_v43  ;;  %v1801_v34 = vsel %vm834_vm3, %v9380_v53, 0.0  ;;  %v7941_v39 = vunpack.i.h.bf16 %v7939_v61  ;;  %v7940_v0 = vunpack.i.l.bf16 %v7939_v61 }
 0x94a   : > { %7435 = vmatpush3.bf16.msra.mxu0 %v7432_v43  ;;  %v7444_v2 = vpack.c.bf16 %v7936_v58, %v7935_v47 }
 0x94b   : > { %7437 = vmatprep.subr.bf16.mxu0 %v7436_v56  ;;  %v9384_v48 = vpop.eup %8227  ;;  %v7448_v3 = vpack.c.bf16 %v7941_v39, %v7940_v0 }
 0x94c   : > { %v1798_v62 = vsel %vm834_vm3, %v9384_v48, 0.0  ;;  %v9402_v51 = vpop.eup %8229 }
 0x94d   : > { %1802 = vadd.xlane.f32.xlu0 %v1801_v34  ;;  %v1807_v54 = vsel %vm834_vm3, %v9402_v51, 0.0 }
 0x94e   : > { %7439 = vmatpush3.bf16.msra.mxu0 %v7436_v56 }
 0x94f   : > { %7441 = vmatprep.subr.bf16.mxu0 %v7440_v59  ;;  %v9408_v19 = vpop.eup %8231 }
 0x951   : > { %1799 = vadd.xlane.f32.xlu0 %v1798_v62 }
 0x952   : > { %7443 = vmatpush3.bf16.msra.mxu0 %v7440_v59 }
 0x953   : > { %7445 = vmatprep.subr.bf16.mxu0 %v7444_v2 }
 0x956   : > { %7953 = vrot.lane.b32.xlu1 %v8948_v13, %s8643_s12  ;;  %7447 = vmatpush3.bf16.msra.mxu0 %v7444_v2 }
 0x957   : > { %7450 = vmatprep.subr.msk.bf16.mxu0 %vm8954_vm2, %v7448_v3 }
 0x967   : > { %7948 = vrot.lane.b32.xlu0 %v8944_v9, %s8643_s12 }
 0x96b   : > { %2037 = vrot.lane.b32.xlu0 %v8934_v63, %s8644_s16  ;;  %v1804_v63 = vsel %vm834_vm3, %v9408_v19, 0.0 }
 0x96f   : > { %2041 = vrot.lane.b32.xlu0 %v8976_v36, %s8644_s16  ;;  %v7944_v36 = vpop.permute.xlu1 %7943 }
 0x970   : > { %v7946_v30 = vunpack.i.h.bf16 %v7944_v36  ;;  %v7945_v27 = vunpack.i.l.bf16 %v7944_v36 }
 0x973   : > { %2045 = vrot.lane.b32.xlu0 %v8984_v40, %s8644_s16 }
 0x977   : > { %2049 = vrot.lane.b32.xlu0 %v8992_v41, %s8644_s16 }
 0x97a   : > { %1808 = vadd.xlane.f32.xlu1 %v1807_v54 }
 0x97e   : > { %1805 = vadd.xlane.f32.xlu1 %v1804_v63 }
 0x98f   : > { %2039 = vrot.lane.b32.xlu1 %v8974_v35, %s8644_s16 }
 0x993   : > { %2043 = vrot.lane.b32.xlu1 %v8982_v37, %s8644_s16 }
 0x997   : > { %2047 = vrot.lane.b32.xlu1 %v8990_v20, %s8644_s16 }
 0x99b   : > { %2051 = vrot.lane.b32.xlu1 %v8998_v42, %s8644_s16  ;;  %v7454_v42 = vpack.c.bf16 %v7946_v30, %v7945_v27  ;;  %v6056_v30 = vld [vmem:[%s10781_s2 + $0xd8] sm:$0xff] }
 0x9cd   : > { %v1791_v40 = vpop.xlane.xlu1 %1790 }
 0x9ce   : > { %8233 = vrcp.f32 %v1791_v40  ;;  %v1788_v41 = vpop.xlane.xlu0 %1787  ;;  %v6054_v40 = vld [vmem:[%s10781_s2 + $0xc8] sm:$0xff] }
 0x9cf   : > { %8235 = vrcp.f32 %v1788_v41  ;;  %v6053_v41 = vld [vmem:[%s10781_s2 + $0xc0] sm:$0xff] }
 0x9d2   : > { %v1797_v22 = vpop.xlane.xlu1 %1796 }
 0x9d3   : > { %8237 = vrcp.f32 %v1797_v22 }
 0x9d6   : > { %v1794_v18 = vpop.xlane.xlu0 %1793  ;;  %v7954_v50 = vpop.permute.xlu1 %7953 }
 0x9d7   : > { %8239 = vrcp.f32 %v1794_v18  ;;  %v7956_v32 = vunpack.i.h.bf16 %v7954_v50 }
 0x9d8   : > { %v8234_v26 = vpop.eup %8233 }
 0x9d9   : > { %v8236_v35 = vpop.eup %8235  ;;  %v1827_v20 = vmul.f32 %v8234_v26, %v9364_v25 }
 0x9da   : > { %v1803_v37 = vpop.xlane.xlu0 %1802  ;;  %v1826_v31 = vmul.f32 %v8236_v35, %v9366_v6 }
 0x9db   : > { %8241 = vrcp.f32 %v1803_v37 }
 0x9dc   : > { %6840 = vmatprep.mubr.msk.f32.mxu0 %vm834_vm3, %v1826_v31 }
 0x9dd   : > { %6841 = vmatmul.mubr.msk.f32.vlgmr.msra.gmra.mrb[16].mxu0 %vm834_vm3, %v1827_v20  ;;  %v8238_v45 = vpop.eup %8237 }
 0x9de   : > { %7453 = vmatpush3.bf16.xpose.msk.msra.mxu0 %vm8954_vm2, %v7448_v3  ;;  %v1800_v33 = vpop.xlane.xlu0 %1799  ;;  %v1829_v28 = vmul.f32 %v8238_v45, %v9372_v44  ;;  %v6058_v45 = vld [vmem:[%s10781_s2 + $0xe8] sm:$0xff] }
 0x9df   : > { %8243 = vrcp.f32 %v1800_v33  ;;  %7456 = vmatprep.subr.msk.bf16.mxu0 %vm8954_vm2, %v7454_v42  ;;  %v6055_v33 = vld [vmem:[%s10781_s2 + $0xd0] sm:$0xff] }
 0x9e1   : > { %v8240_v24 = vpop.eup %8239 }
 0x9e2   : > { %v7949_v23 = vpop.permute.xlu0 %7948  ;;  %v1828_v6 = vmul.f32 %v8240_v24, %v9376_v52  ;;  %v7955_v52 = vunpack.i.l.bf16 %v7954_v50 }
 0x9e3   : > { %v7951_v25 = vunpack.i.h.bf16 %v7949_v23  ;;  %v7950_v46 = vunpack.i.l.bf16 %v7949_v23 }
 0x9e4   : > { %6843 = vmatprep.mubr.msk.f32.mxu0 %vm834_vm3, %v1828_v6  ;;  %v7466_v56 = vpack.c.bf16 %v7956_v32, %v7955_v52 }
 0x9e5   : > { %v7460_v21 = vpack.c.bf16 %v7951_v25, %v7950_v46  ;;  %6844 = vmatmul.mubr.msk.f32.gmra.mrb[18].mxu0 %vm834_vm3, %v1829_v28  ;;  %v8242_v43 = vpop.eup %8241  ;;  %v6057_v28 = vld [vmem:[%s10781_s2 + $0xe0] sm:$0xff] }
 0x9e6   : > { %7459 = vmatpush3.bf16.xpose.msk.msra.mxu0 %vm8954_vm2, %v7454_v42  ;;  %v1831_v44 = vmul.f32 %v8242_v43, %v9380_v53 }
 0x9e7   : > { %7462 = vmatprep.subr.msk.bf16.mxu0 %vm8954_vm2, %v7460_v21 }
 0x9e9   : > { %v8244_v29 = vpop.eup %8243 }
 0x9ea   : > { %v1830_v38 = vmul.f32 %v8244_v29, %v9384_v48  ;;  %v2038_v48 = vpop.permute.xlu0 %2037 }
 0x9ec   : > { %6846 = vmatprep.mubr.msk.f32.mxu0 %vm834_vm3, %v1830_v38 }
 0x9ed   : > { %6847 = vmatmul.mubr.msk.f32.gmra.mrb[20].mxu0 %vm834_vm3, %v1831_v44  ;;  %v6059_v44 = vld [vmem:[%s10781_s2 + $0xf0] sm:$0xff] }
 0x9ee   : > { %7465 = vmatpush3.bf16.xpose.msk.msra.mxu0 %vm8954_vm2, %v7460_v21  ;;  %v2042_v62 = vpop.permute.xlu0 %2041  ;;  %v6060_v21 = vld [vmem:[%s10781_s2 + $0xf8] sm:$0xff] }
 0x9ef   : > { %7468 = vmatprep.subr.msk.bf16.mxu0 %vm8954_vm2, %v7466_v56 }
 0x9f2   : > { %v2046_v0 = vpop.permute.xlu0 %2045 }
 0x9f6   : > { %7471 = vmatpush3.bf16.xpose.msk.msra.mxu0 %vm8954_vm2, %v7466_v56  ;;  %v2050_v3 = vpop.permute.xlu0 %2049 }
 0xa07   : > { %v1809_v57 = vpop.xlane.xlu1 %1808 }
 0xa08   : > { %8245 = vrcp.f32 %v1809_v57 }
 0xa0b   : > { %v1806_v34 = vpop.xlane.xlu1 %1805 }
 0xa0c   : > { %8247 = vrcp.f32 %v1806_v34 }
 0xa0f   : > { %v2040_v47 = vpop.permute.xlu1 %2039 }
 0xa12   : > { %v8246_v53 = vpop.eup %8245 }
 0xa13   : > { %v1833_v61 = vmul.f32 %v8246_v53, %v9402_v51  ;;  %v2044_v39 = vpop.permute.xlu1 %2043 }
 0xa16   : > { %v8248_v58 = vpop.eup %8247 }
 0xa17   : > { %v1832_v59 = vmul.f32 %v8248_v58, %v9408_v19  ;;  %v2048_v2 = vpop.permute.xlu1 %2047 }
 0xa19   : > { %6849 = vmatprep.mubr.msk.f32.mxu0 %vm834_vm3, %v1832_v59 }
 0xa1a   : > { %6850 = vmatmul.mubr.msk.f32.gmra.mrb[22].mxu0 %vm834_vm3, %v1833_v61 }
 0xa1b   : > { %6868 = vmatprep.mubr.msk.f32.mxu0 %vm688_vm1, %v2038_v48  ;;  %v2052_v14 = vpop.permute.xlu1 %2051 }
 0xa1e   : > { %6869 = vmatmul.mubr.msk.f32.vlgmr.msra.gmra.mrb[24].mxu0 %vm688_vm1, %v2040_v47 }
 0xa1f   : > { %6871 = vmatprep.mubr.msk.f32.mxu0 %vm688_vm1, %v2042_v62 }
 0xa22   : > { %6872 = vmatmul.mubr.msk.f32.gmra.mrb[26].mxu0 %vm688_vm1, %v2044_v39 }
 0xa23   : > { %6874 = vmatprep.mubr.msk.f32.mxu0 %vm688_vm1, %v2046_v0 }
 0xa26   : > { %6875 = vmatmul.mubr.msk.f32.gmra.mrb[28].mxu0 %vm688_vm1, %v2048_v2 }
 0xa27   : > { %6877 = vmatprep.mubr.msk.f32.mxu0 %vm688_vm1, %v2050_v3 }
 0xa2a   : > { %6878 = vmatmul.mubr.msk.f32.gmra.mrb[30].mxu0 %vm688_vm1, %v2052_v14 }
 0xab0   : > { %v9458_v15 = vpop.f32.mrb[16].mxu0 }
 0xab1   : > { %v9460_v16 = vpop.f32.mrb[17].mxu0 }
 0xab8   : > { %v9462_v1 = vpop.f32.mrb[18].mxu0 }
 0xab9   : > { %v9464_v51 = vpop.f32.mrb[19].mxu0 }
 0xac0   : > { %v9466_v54 = vpop.f32.mrb[20].mxu0 }
 0xac1   : > { %v9468_v19 = vpop.f32.mrb[21].mxu0 }
 0xaed   : > { %v9470_v63 = vpop.f32.mrb[22].mxu0 }
 0xaee   : > { %v9472_v36 = vpop.f32.mrb[23].mxu0 }
 0xaf1   : > { %v6870_v22 = vpop.f32.mrb[24].mxu0 }
 0xaf2   : > { %v2173_v18 = vadd.f32 %v6870_v22, %v6054_v40  ;;  %v2167_v26 = vpop.f32.mrb[25].mxu0 }
 0xaf3   : > { %v2168_v35 = vadd.f32 %v6053_v41, %v2167_v26 }
 0xaf4   : > { %v2209_v27 = vsel %vm834_vm3, %v2173_v18, -inf }
 0xaf5   : > { %2210 = vmax.xlane.f32.xlu1 %v2209_v27  ;;  %v6873_v37 = vpop.f32.mrb[26].mxu0  ;;  %v2206_v31 = vsel %vm834_vm3, %v2168_v35, -inf }
 0xaf6   : > { %v2183_v20 = vadd.f32 %v6873_v37, %v6056_v30  ;;  %v2177_v42 = vpop.f32.mrb[27].mxu0  ;;  %2207 = vmax.xlane.f32.xlu0 %v2206_v31 }
 0xaf7   : > { %v2178_v23 = vadd.f32 %v6055_v33, %v2177_v42 }
 0xaf8   : > { %v2215_v24 = vsel %vm834_vm3, %v2183_v20, -inf }
 0xaf9   : > { %v6876_v6 = vpop.f32.mrb[28].mxu0  ;;  %v2212_v32 = vsel %vm834_vm3, %v2178_v23, -inf }
 0xafa   : > { %v2193_v25 = vadd.f32 %v6876_v6, %v6058_v45  ;;  %v2187_v46 = vpop.f32.mrb[29].mxu0  ;;  %2216 = vmax.xlane.f32.xlu0 %v2215_v24 }
 0xafb   : > { %v2188_v43 = vadd.f32 %v6057_v28, %v2187_v46 }
 0xafc   : > { %v2221_v50 = vsel %vm834_vm3, %v2193_v25, -inf }
 0xafd   : > { %2222 = vmax.xlane.f32.xlu1 %v2221_v50  ;;  %v6879_v29 = vpop.f32.mrb[30].mxu0  ;;  %v2218_v34 = vsel %vm834_vm3, %v2188_v43, -inf }
 0xafe   : > { %v9500_v52 = vadd.f32 %v6879_v29, %v6060_v21  ;;  %v2197_v38 = vpop.f32.mrb[31].mxu0  ;;  %2213 = vmax.xlane.f32.xlu0 %v2212_v32 }
 0xaff   : > { %v9507_v57 = vadd.f32 %v6059_v44, %v2197_v38 }
 0xb00   : > { %v2227_v56 = vsel %vm834_vm3, %v9500_v52, -inf }
 0xb01   : > { %2228 = vmax.xlane.f32.xlu1 %v2227_v56  ;;  %v2224_v48 = vsel %vm834_vm3, %v9507_v57, -inf }
 0xb02   : > { %2219 = vmax.xlane.f32.xlu0 %v2218_v34 }
 0xb06   : > { %2225 = vmax.xlane.f32.xlu0 %v2224_v48 }
 0xb12   : > { %7963 = vrot.lane.b32.xlu1 %v8940_v4, %s10797_s26 }
 0xb1c   : > { %7958 = vrot.lane.b32.xlu0 %v8932_v49, %s10797_s26 }
 0xb82   : > { %v2211_v53 = vpop.xlane.xlu1 %2210 }
 0xb83   : > { %v2231_v58 = vsub.f32 %v2173_v18, %v2211_v53  ;;  %v2208_v47 = vpop.xlane.xlu0 %2207 }
 0xb84   : > { %v2230_v59 = vsub.f32 %v2168_v35, %v2208_v47 }
 0xb85   : > { %v2240_v61 = vmul.f32 1.442695, %v2231_v58 }
 0xb86   : > { %v2238_v62 = vmul.f32 1.442695, %v2230_v59 }
 0xb87   : > { %8249 = vpow2.f32 %v2240_v61  ;;  %v2217_v39 = vpop.xlane.xlu0 %2216 }
 0xb88   : > { %8251 = vpow2.f32 %v2238_v62  ;;  %v2233_v0 = vsub.f32 %v2183_v20, %v2217_v39 }
 0xb8a   : > { %v2244_v2 = vmul.f32 1.442695, %v2233_v0  ;;  %v2223_v3 = vpop.xlane.xlu1 %2222 }
 0xb8b   : > { %v2235_v14 = vsub.f32 %v2193_v25, %v2223_v3  ;;  %v2214_v40 = vpop.xlane.xlu0 %2213 }
 0xb8c   : > { %8253 = vpow2.f32 %v2244_v2  ;;  %v2232_v41 = vsub.f32 %v2178_v23, %v2214_v40 }
 0xb8d   : > { %v2248_v4 = vmul.f32 1.442695, %v2235_v14 }
 0xb8e   : > { %v2242_v22 = vmul.f32 1.442695, %v2232_v41  ;;  %v2229_v26 = vpop.xlane.xlu1 %2228 }
 0xb8f   : > { %v2220_v49 = vpop.xlane.xlu0 %2219  ;;  %v2237_v56 = vsub.f32 %v9500_v52, %v2229_v26 }
 0xb90   : > { %8255 = vpow2.f32 %v2242_v22  ;;  %v2234_v18 = vsub.f32 %v2188_v43, %v2220_v49 }
 0xb91   : > { %v9516_v30 = vpop.eup %8249  ;;  %8257 = vpow2.f32 %v2248_v4  ;;  %v2252_v48 = vmul.f32 1.442695, %v2237_v56 }
 0xb92   : > { %v9518_v35 = vpop.eup %8251  ;;  %v2246_v27 = vmul.f32 1.442695, %v2234_v18  ;;  %v2257_v37 = vsel %vm834_vm3, %v9516_v30, 0.0  ;;  %v7964_v42 = vpop.permute.xlu1 %7963 }
 0xb93   : > { %2258 = vadd.xlane.f32.xlu1 %v2257_v37  ;;  %v2226_v31 = vpop.xlane.xlu0 %2225  ;;  %v2254_v20 = vsel %vm834_vm3, %v9518_v35, 0.0  ;;  %v7966_v23 = vunpack.i.h.bf16 %v7964_v42  ;;  %v7965_v6 = vunpack.i.l.bf16 %v7964_v42 }
 0xb94   : > { %8259 = vpow2.f32 %v2246_v27  ;;  %2255 = vadd.xlane.f32.xlu0 %v2254_v20  ;;  %v2236_v34 = vsub.f32 %v9507_v57, %v2226_v31 }
 0xb95   : > { %v7476_v29 = vpack.c.bf16 %v7966_v23, %v7965_v6  ;;  %8261 = vpow2.f32 %v2252_v48 }
 0xb96   : > { %v9524_v33 = vpop.eup %8253  ;;  %v2250_v53 = vmul.f32 1.442695, %v2236_v34 }
 0xb97   : > { %v7959_v45 = vpop.permute.xlu0 %7958  ;;  %v2263_v24 = vsel %vm834_vm3, %v9524_v33, 0.0 }
 0xb98   : > { %v7961_v25 = vunpack.i.h.bf16 %v7959_v45  ;;  %v7960_v46 = vunpack.i.l.bf16 %v7959_v45  ;;  %2264 = vadd.xlane.f32.xlu1 %v2263_v24  ;;  %8263 = vpow2.f32 %v2250_v53 }
 0xb9a   : > { %v9528_v28 = vpop.eup %8255  ;;  %v7472_v21 = vpack.c.bf16 %v7961_v25, %v7960_v46 }
 0xb9b   : > { %v2260_v50 = vsel %vm834_vm3, %v9528_v28, 0.0  ;;  %v9532_v43 = vpop.eup %8257 }
 0xb9c   : > { %2261 = vadd.xlane.f32.xlu0 %v2260_v50  ;;  %7473 = vmatprep.subr.bf16.mxu1 %v7472_v21  ;;  %v2269_v38 = vsel %vm834_vm3, %v9532_v43, 0.0  ;;  %v2505_v50 = vld [vmem:[#allocation5 + $0x8] sm:$0xff] }
 0xb9d   : > { %7475 = vmatpush3.bf16.msra.mxu1 %v7472_v21  ;;  %v2504_v21 = vld [vmem:[#allocation5] sm:$0xff] }
 0xb9e   : > { %v9534_v32 = vpop.eup %8259  ;;  %7477 = vmatprep.subr.bf16.mxu1 %v7476_v29 }
 0xb9f   : > { %v2266_v44 = vsel %vm834_vm3, %v9534_v32, 0.0  ;;  %v9546_v58 = vpop.eup %8261 }
 0xba0   : > { %2270 = vadd.xlane.f32.xlu0 %v2269_v38  ;;  %2267 = vadd.xlane.f32.xlu1 %v2266_v44  ;;  %v2275_v59 = vsel %vm834_vm3, %v9546_v58, 0.0 }
 0xba1   : > { %7479 = vmatpush3.bf16.msra.mxu1 %v7476_v29  ;;  %v2506_v29 = vld [vmem:[#allocation5 + $0x10] sm:$0xff] }
 0xba2   : > { %v9548_v47 = vpop.eup %8263 }
 0xbb1   : > { %7973 = vrot.lane.b32.xlu1 %v8948_v13, %s10797_s26  ;;  %v2272_v13 = vsel %vm834_vm3, %v9548_v47, 0.0 }
 0xbb6   : > { %7968 = vrot.lane.b32.xlu0 %v8944_v9, %s10797_s26 }
 0xbd5   : > { %2276 = vadd.xlane.f32.xlu0 %v2275_v59  ;;  %2273 = vadd.xlane.f32.xlu1 %v2272_v13 }
 0xbe6   : > { %1529 = vrot.lane.b32.xlu1 %v9298_v5, %s10795_s23 }
 0xbea   : > { %1995 = vrot.lane.b32.xlu1 %v9460_v16, %s10793_s9 }
 0xbeb   : > { %1527 = vrot.lane.b32.xlu0 %v9300_v7, %s10795_s23 }
 0xbee   : > { %1997 = vrot.lane.b32.xlu1 %v9458_v15, %s10793_s9 }
 0xbef   : > { %1531 = vrot.lane.b32.xlu0 %v9304_v55, %s10795_s23 }
 0xbf2   : > { %1533 = vrot.lane.b32.xlu1 %v9302_v8, %s10795_s23 }
 0xbf3   : > { %1999 = vrot.lane.b32.xlu0 %v9464_v51, %s10793_s9 }
 0xbf6   : > { %2001 = vrot.lane.b32.xlu1 %v9462_v1, %s10793_s9 }
 0xbf7   : > { %1535 = vrot.lane.b32.xlu0 %v9308_v10, %s10795_s23 }
 0xbfa   : > { %1537 = vrot.lane.b32.xlu1 %v9306_v60, %s10795_s23 }
 0xc20   : > { %v2259_v5 = vpop.xlane.xlu1 %2258 }
 0xc21   : > { %v2256_v9 = vpop.xlane.xlu0 %2255 }
 0xc22   : > { %8265 = vrcp.f32 %v2256_v9 }
 0xc23   : > { %8267 = vrcp.f32 %v2259_v5 }
 0xc25   : > { %v2265_v7 = vpop.xlane.xlu1 %2264 }
 0xc29   : > { %v2262_v55 = vpop.xlane.xlu0 %2261 }
 0xc2a   : > { %8269 = vrcp.f32 %v2262_v55 }
 0xc2b   : > { %8271 = vrcp.f32 %v2265_v7 }
 0xc2c   : > { %v8266_v15 = vpop.eup %8265 }
 0xc2d   : > { %v2268_v16 = vpop.xlane.xlu1 %2267  ;;  %v2271_v8 = vpop.xlane.xlu0 %2270  ;;  %v2294_v52 = vmul.f32 %v8266_v15, %v9518_v35 }
 0xc2e   : > { %8273 = vrcp.f32 %v2268_v16  ;;  %v8268_v0 = vpop.eup %8267 }
 0xc2f   : > { %6896 = vmatprep.mubr.msk.f32.mxu1 %vm834_vm3, %v2294_v52  ;;  %8275 = vrcp.f32 %v2271_v8  ;;  %v2295_v3 = vmul.f32 %v8268_v0, %v9516_v30 }
 0xc31   : > { %v7974_v1 = vpop.permute.xlu1 %7973  ;;  %v7969_v51 = vpop.permute.xlu0 %7968 }
 0xc32   : > { %v7976_v10 = vunpack.i.h.bf16 %v7974_v1  ;;  %v7975_v57 = vunpack.i.l.bf16 %v7974_v1  ;;  %v7971_v61 = vunpack.i.h.bf16 %v7969_v51  ;;  %v7970_v60 = vunpack.i.l.bf16 %v7969_v51 }
 0xc34   : > { %v7480_v62 = vpack.c.bf16 %v7971_v61, %v7970_v60  ;;  %v7484_v39 = vpack.c.bf16 %v7976_v10, %v7975_v57  ;;  %v8270_v2 = vpop.eup %8269 }
 0xc35   : > { %v8272_v14 = vpop.eup %8271  ;;  %v2296_v40 = vmul.f32 %v8270_v2, %v9528_v28  ;;  %v8489_v2 = vld [vmem:[%s8855_s22 + $0x8] sm:$0xff] }
 0xc36   : > { %7481 = vmatprep.subr.bf16.mxu1 %v7480_v62  ;;  %v2297_v4 = vmul.f32 %v8272_v14, %v9524_v33 }
 0xc37   : > { %7483 = vmatpush3.bf16.msra.mxu1 %v7480_v62 }
 0xc38   : > { %7485 = vmatprep.subr.bf16.mxu1 %v7484_v39  ;;  %v8274_v41 = vpop.eup %8273 }
 0xc39   : > { %v8276_v22 = vpop.eup %8275  ;;  %v2298_v26 = vmul.f32 %v8274_v41, %v9534_v32  ;;  %v2507_v32 = vld [vmem:[#allocation5 + $0x18] sm:$0xff] }
 0xc3a   : > { %v2299_v49 = vmul.f32 %v8276_v22, %v9532_v43  ;;  %v7488_v43 = vpack.c.bf16 %v2505_v50, %v2504_v21  ;;  %v7492_v38 = vpack.c.bf16 %v2507_v32, %v2506_v29 }
 0xc3b   : > { %7487 = vmatpush3.bf16.msra.mxu1 %v7484_v39  ;;  %v6093_v39 = vld [vmem:[#allocation8 + $0x2] ss:$0 sm:$0xff] }
 0xc3c   : > { %7489 = vmatprep.subr.bf16.mxu1 %v7488_v43 }
 0xc3e   : > { %6897 = vmatmul.mubr.msk.f32.vlgmr.msra.gmra.mrb[32].mxu1 %vm834_vm3, %v2295_v3 }
 0xc3f   : > { %6899 = vmatprep.mubr.msk.f32.mxu1 %vm834_vm3, %v2296_v40  ;;  %7491 = vmatpush3.bf16.msra.mxu1 %v7488_v43  ;;  %v8490_v40 = vld [vmem:[%s8855_s22] sm:$0xff] }
 0xc40   : > { %7493 = vmatprep.subr.bf16.mxu1 %v7492_v38 }
 0xc42   : > { %6900 = vmatmul.mubr.msk.f32.gmra.mrb[34].mxu1 %vm834_vm3, %v2297_v4 }
 0xc43   : > { %6902 = vmatprep.mubr.msk.f32.mxu1 %vm834_vm3, %v2298_v26  ;;  %7495 = vmatpush3.bf16.msra.mxu1 %v7492_v38  ;;  %v8495_v38 = vld [vmem:[%s8855_s22 + $0x38] sm:$0xff] }
 0xc46   : > { %6903 = vmatmul.mubr.msk.f32.gmra.mrb[36].mxu1 %vm834_vm3, %v2299_v49 }
 0xc62   : > { %v2274_v18 = vpop.xlane.xlu1 %2273  ;;  %v2277_v30 = vpop.xlane.xlu0 %2276 }
 0xc63   : > { %8277 = vrcp.f32 %v2274_v18 }
 0xc64   : > { %8279 = vrcp.f32 %v2277_v30 }
 0xc66   : > { %v1530_v35 = vpop.permute.xlu1 %1529  ;;  %v1528_v27 = vpop.permute.xlu0 %1527 }
 0xc67   : > { %1553 = vst.msk [vmem:[#allocation2 + $0x8] sm:$0xff] %vm1551_vm4, %v1530_v35  ;;  %1552 = vst.msk [vmem:[#allocation2] sm:$0xff] %vm1551_vm4, %v1528_v27  ;;  %v8491_v35 = vld [vmem:[%s8855_s22 + $0x18] sm:$0xff] }
 0xc6a   : > { %v1996_v37 = vpop.permute.xlu1 %1995  ;;  %v1532_v31 = vpop.permute.xlu0 %1531 }
 0xc6b   : > { %2020 = vst.msk [vmem:[#allocation2] sm:$0xff] %vm2019_vm5, %v1996_v37  ;;  %v8492_v37 = vld [vmem:[%s8855_s22 + $0x10] sm:$0xff] }
 0xc6c   : > { %1554 = vst.msk [vmem:[#allocation2 + $0x10] sm:$0xff] %vm1551_vm4, %v1532_v31 }
 0xc6d   : > { %v8278_v20 = vpop.eup %8277 }
 0xc6e   : > { %v8280_v42 = vpop.eup %8279  ;;  %v1998_v33 = vpop.permute.xlu1 %1997  ;;  %v2300_v24 = vmul.f32 %v8278_v20, %v9548_v47 }
 0xc6f   : > { %v2000_v45 = vpop.permute.xlu0 %1999  ;;  %2021 = vst.msk [vmem:[#allocation2 + $0x8] sm:$0xff] %vm2019_vm5, %v1998_v33  ;;  %v2301_v23 = vmul.f32 %v8280_v42, %v9546_v58 }
 0xc70   : > { %2022 = vst.msk [vmem:[#allocation2 + $0x10] sm:$0xff] %vm2019_vm5, %v2000_v45  ;;  %6905 = vmatprep.mubr.msk.f32.mxu1 %vm834_vm3, %v2300_v24  ;;  %v8493_v24 = vld [vmem:[%s8855_s22 + $0x28] sm:$0xff] }
 0xc71   : > { %6906 = vmatmul.mubr.msk.f32.gmra.mrb[38].mxu1 %vm834_vm3, %v2301_v23 }
 0xc72   : > { %v1534_v6 = vpop.permute.xlu1 %1533 }
 0xc73   : > { %v1536_v25 = vpop.permute.xlu0 %1535  ;;  %1555 = vst.msk [vmem:[#allocation2 + $0x18] sm:$0xff] %vm1551_vm4, %v1534_v6 }
 0xc74   : > { %1556 = vst.msk [vmem:[#allocation2 + $0x20] sm:$0xff] %vm1551_vm4, %v1536_v25  ;;  %v8494_v25 = vld [vmem:[%s8855_s22 + $0x20] sm:$0xff] }
 0xc76   : > { %v2002_v46 = vpop.permute.xlu1 %2001 }
 0xc77   : > { %2023 = vst.msk [vmem:[#allocation2 + $0x18] sm:$0xff] %vm2019_vm5, %v2002_v46 }
 0xc7a   : > { %v1538_v28 = vpop.permute.xlu1 %1537 }
 0xc7b   : > { %1557 = vst.msk [vmem:[#allocation2 + $0x28] sm:$0xff] %vm1551_vm4, %v1538_v28 }
 0xd11   : > { %v6898_v44 = vpop.f32.mrb[32].mxu1 }
 0xd12   : > { %2465 = vrot.lane.b32.xlu1 %v6898_v44, %s10791_s13  ;;  %v2416_v56 = vpop.f32.mrb[33].mxu1 }
 0xd13   : > { %2463 = vrot.lane.b32.xlu0 %v2416_v56, %s10791_s13 }
 0xd15   : > { %v6901_v34 = vpop.f32.mrb[34].mxu1 }
 0xd16   : > { %2005 = vrot.lane.b32.xlu1 %v9466_v54, %s10793_s9  ;;  %v2426_v48 = vpop.f32.mrb[35].mxu1 }
 0xd17   : > { %2003 = vrot.lane.b32.xlu0 %v9468_v19, %s10793_s9 }
 0xd19   : > { %v6904_v53 = vpop.f32.mrb[36].mxu1 }
 0xd1a   : > { %2469 = vrot.lane.b32.xlu1 %v6901_v34, %s10791_s13  ;;  %v2436_v58 = vpop.f32.mrb[37].mxu1  ;;  %v8496_v34 = vld [vmem:[%s8855_s22 + $0x30] sm:$0xff] }
 0xd1b   : > { %2467 = vrot.lane.b32.xlu0 %v2426_v48, %s10791_s13 }
 0xd1e   : > { %1541 = vrot.lane.b32.xlu1 %v9310_v11, %s10795_s23 }
 0xd1f   : > { %1539 = vrot.lane.b32.xlu0 %v9312_v12, %s10795_s23 }
 0xd22   : > { %2473 = vrot.lane.b32.xlu1 %v6904_v53, %s10791_s13 }
 0xd23   : > { %2471 = vrot.lane.b32.xlu0 %v2436_v58, %s10791_s13 }
 0xd26   : > { %2009 = vrot.lane.b32.xlu1 %v9470_v63, %s10793_s9 }
 0xd27   : > { %2007 = vrot.lane.b32.xlu0 %v9472_v36, %s10793_s9 }
 0xd44   : > { %v6907_v54 = vpop.f32.mrb[38].mxu1 }
 0xd45   : > { %2477 = vrot.lane.b32.xlu1 %v6907_v54, %s10791_s13  ;;  %v2446_v19 = vpop.f32.mrb[39].mxu1 }
 0xd46   : > { %2475 = vrot.lane.b32.xlu0 %v2446_v19, %s10791_s13 }
 0xd84   : > { %v2466_v11 = vpop.permute.xlu1 %2465 }
 0xd85   : > { %2489 = vst.msk [vmem:[#allocation2 + $0x8] sm:$0xff] %vm2487_vm6, %v2466_v11  ;;  %v2464_v12 = vpop.permute.xlu0 %2463 }
 0xd86   : > { %2488 = vst.msk [vmem:[#allocation2] sm:$0xff] %vm2487_vm6, %v2464_v12 }
 0xd88   : > { %v2006_v47 = vpop.permute.xlu1 %2005 }
 0xd89   : > { %2025 = vst.msk [vmem:[#allocation2 + $0x28] sm:$0xff] %vm2019_vm5, %v2006_v47  ;;  %v2004_v63 = vpop.permute.xlu0 %2003 }
 0xd8a   : > { %2024 = vst.msk [vmem:[#allocation2 + $0x20] sm:$0xff] %vm2019_vm5, %v2004_v63 }
 0xd8c   : > { %v2470_v36 = vpop.permute.xlu1 %2469  ;;  %v2497_v9 = vld [vmem:[#allocation2 + $0x8] sm:$0xff] }
 0xd8d   : > { %2491 = vst.msk [vmem:[#allocation2 + $0x18] sm:$0xff] %vm2487_vm6, %v2470_v36  ;;  %v2468_v59 = vpop.permute.xlu0 %2467  ;;  %v2496_v13 = vld [vmem:[#allocation2] sm:$0xff] }
 0xd8e   : > { %2490 = vst.msk [vmem:[#allocation2 + $0x10] sm:$0xff] %vm2487_vm6, %v2468_v59  ;;  %6916 = vmatprep.mubr.msk.f32.mxu1 %vm381_vm0, %v2496_v13 }
 0xd8f   : > { %6917 = vmatmul.mubr.msk.f32.vlgmr.msra.gmra.mrb[40].mxu1 %vm381_vm0, %v2497_v9 }
 0xd90   : > { %v1542_v5 = vpop.permute.xlu1 %1541 }
 0xd91   : > { %1559 = vst.msk [vmem:[#allocation2 + $0x38] sm:$0xff] %vm1551_vm4, %v1542_v5  ;;  %v1540_v7 = vpop.permute.xlu0 %1539 }
 0xd92   : > { %1558 = vst.msk [vmem:[#allocation2 + $0x30] sm:$0xff] %vm1551_vm4, %v1540_v7 }
 0xd94   : > { %v2474_v55 = vpop.permute.xlu1 %2473  ;;  %v2499_v8 = vld [vmem:[#allocation2 + $0x18] sm:$0xff] }
 0xd95   : > { %2493 = vst.msk [vmem:[#allocation2 + $0x28] sm:$0xff] %vm2487_vm6, %v2474_v55  ;;  %v2472_v15 = vpop.permute.xlu0 %2471  ;;  %v2498_v16 = vld [vmem:[#allocation2 + $0x10] sm:$0xff] }
 0xd96   : > { %2492 = vst.msk [vmem:[#allocation2 + $0x20] sm:$0xff] %vm2487_vm6, %v2472_v15  ;;  %6919 = vmatprep.mubr.msk.f32.mxu1 %vm381_vm0, %v2498_v16 }
 0xd97   : > { %6920 = vmatmul.mubr.msk.f32.gmra.mrb[42].mxu1 %vm381_vm0, %v2499_v8 }
 0xd98   : > { %v2010_v52 = vpop.permute.xlu1 %2009 }
 0xd99   : > { %2027 = vst.msk [vmem:[#allocation2 + $0x38] sm:$0xff] %vm2019_vm5, %v2010_v52  ;;  %v2008_v1 = vpop.permute.xlu0 %2007 }
 0xd9a   : > { %2026 = vst.msk [vmem:[#allocation2 + $0x30] sm:$0xff] %vm2019_vm5, %v2008_v1 }
 0xd9c   : > { %v2501_v10 = vld [vmem:[#allocation2 + $0x28] sm:$0xff] }
 0xd9d   : > { %v2500_v51 = vld [vmem:[#allocation2 + $0x20] sm:$0xff] }
 0xd9e   : > { %6922 = vmatprep.mubr.msk.f32.mxu1 %vm381_vm0, %v2500_v51 }
 0xd9f   : > { %6923 = vmatmul.mubr.msk.f32.gmra.mrb[44].mxu1 %vm381_vm0, %v2501_v10 }
 0xdb7   : > { %v2478_v57 = vpop.permute.xlu1 %2477 }
 0xdb8   : > { %2495 = vst.msk [vmem:[#allocation2 + $0x38] sm:$0xff] %vm2487_vm6, %v2478_v57  ;;  %v2476_v61 = vpop.permute.xlu0 %2475 }
 0xdb9   : > { %2494 = vst.msk [vmem:[#allocation2 + $0x30] sm:$0xff] %vm2487_vm6, %v2476_v61 }
 0xdbf   : > { %v2503_v62 = vld [vmem:[#allocation2 + $0x38] sm:$0xff] }
 0xdc0   : > { %v2502_v60 = vld [vmem:[#allocation2 + $0x30] sm:$0xff] }
 0xdc1   : > { %6925 = vmatprep.mubr.msk.f32.mxu1 %vm381_vm0, %v2502_v60 }
 0xdc2   : > { %6926 = vmatmul.mubr.msk.f32.gmra.mrb[46].mxu1 %vm381_vm0, %v2503_v62 }
 0xe62   : > { %v6918_v0 = vpop.f32.mrb[40].mxu1 }
 0xe63   : > { %v2638_v3 = vadd.f32 %v8489_v2, %v6918_v0  ;;  %v2598_v14 = vpop.f32.mrb[41].mxu1 }
 0xe64   : > { %v2637_v41 = vadd.f32 %v8490_v40, %v2598_v14 }
 0xe65   : > { %v9644_v4 = vadd.f32 %v6093_v39, %v2638_v3 }
 0xe66   : > { %v9646_v22 = vadd.f32 %v6093_v39, %v2637_v41 }
 0xe67   : > { %v2660_v26 = vsel %vm381_vm0, %v9644_v4, 0.0 }
 0xe68   : > { %2661 = vadd.xlane.f32.xlu1 %v2660_v26  ;;  %v2657_v49 = vsel %vm381_vm0, %v9646_v22, 0.0 }
 0xe69   : > { %2658 = vadd.xlane.f32.xlu0 %v2657_v49  ;;  %v2785_v49 = vld [vmem:[#allocation7] sm:$0xff] }
 0xe6a   : > { %v6921_v18 = vpop.f32.mrb[42].mxu1 }
 0xe6b   : > { %v2608_v30 = vpop.f32.mrb[43].mxu1  ;;  %v2640_v27 = vadd.f32 %v8491_v35, %v6921_v18  ;;  %v2786_v18 = vld [vmem:[#allocation7 + $0x8] sm:$0xff]  ;;  %v2787_v35 = vld [vmem:[#allocation7 + $0x10] sm:$0xff] }
 0xe6c   : > { %v2639_v31 = vadd.f32 %v8492_v37, %v2608_v30  ;;  %v7496_v30 = vpack.c.bf16 %v2786_v18, %v2785_v49 }
 0xe6d   : > { %v9656_v42 = vadd.f32 %v6093_v39, %v2640_v27  ;;  %v2788_v27 = vld [vmem:[#allocation7 + $0x18] sm:$0xff] }
 0xe6e   : > { %v9654_v20 = vadd.f32 %v6093_v39, %v2639_v31  ;;  %7497 = vmatprep.subr.bf16.mxu0 %v7496_v30  ;;  %v7500_v37 = vpack.c.bf16 %v2788_v27, %v2787_v35 }
 0xe6f   : > { %v2666_v28 = vsel %vm381_vm0, %v9656_v42, 0.0  ;;  %7499 = vmatpush3.bf16.msra.mxu0 %v7496_v30 }
 0xe70   : > { %v2663_v33 = vsel %vm381_vm0, %v9654_v20, 0.0  ;;  %7501 = vmatprep.subr.bf16.mxu0 %v7500_v37 }
 0xe71   : > { %2664 = vadd.xlane.f32.xlu0 %v2663_v33 }
 0xe72   : > { %v6924_v45 = vpop.f32.mrb[44].mxu1 }
 0xe73   : > { %v2642_v23 = vadd.f32 %v8493_v24, %v6924_v45  ;;  %v2618_v6 = vpop.f32.mrb[45].mxu1  ;;  %7503 = vmatpush3.bf16.msra.mxu0 %v7500_v37 }
 0xe74   : > { %v2641_v46 = vadd.f32 %v8494_v25, %v2618_v6 }
 0xe75   : > { %v9664_v21 = vadd.f32 %v6093_v39, %v2642_v23  ;;  %2667 = vadd.xlane.f32.xlu0 %v2666_v28 }
 0xe76   : > { %v9666_v50 = vadd.f32 %v6093_v39, %v2641_v46 }
 0xe77   : > { %v2672_v43 = vsel %vm381_vm0, %v9664_v21, 0.0 }
 0xe78   : > { %2673 = vadd.xlane.f32.xlu1 %v2672_v43  ;;  %v2669_v29 = vsel %vm381_vm0, %v9666_v50, 0.0 }
 0xe79   : > { %2670 = vadd.xlane.f32.xlu0 %v2669_v29  ;;  %v2962_v29 = vld [vmem:[%s10784_s5] sm:$0xff] }
 0xe95   : > { %v6927_v32 = vpop.f32.mrb[46].mxu1 }
 0xe96   : > { %v2644_v44 = vadd.f32 %v8495_v38, %v6927_v32  ;;  %v2628_v56 = vpop.f32.mrb[47].mxu1  ;;  %v2963_v32 = vld [vmem:[%s10784_s5 + $0x8] sm:$0xff]  ;;  %v2964_v38 = vld [vmem:[%s10784_s5 + $0x10] sm:$0xff] }
 0xe97   : > { %v2643_v48 = vadd.f32 %v8496_v34, %v2628_v56  ;;  %v2965_v56 = vld [vmem:[%s10784_s5 + $0x18] sm:$0xff] }
 0xe98   : > { %v9674_v53 = vadd.f32 %v6093_v39, %v2644_v44  ;;  %v7504_v44 = vpack.c.bf16 %v2963_v32, %v2962_v29  ;;  %v7508_v34 = vpack.c.bf16 %v2965_v56, %v2964_v38 }
 0xe99   : > { %v9676_v58 = vadd.f32 %v6093_v39, %v2643_v48  ;;  %v2966_v48 = vld [vmem:[%s10784_s5 + $0x20] sm:$0xff] }
 0xe9a   : > { %v2678_v54 = vsel %vm381_vm0, %v9674_v53, 0.0  ;;  %7505 = vmatprep.subr.bf16.mxu1 %v7504_v44 }
 0xe9b   : > { %2679 = vadd.xlane.f32.xlu1 %v2678_v54  ;;  %v2675_v19 = vsel %vm381_vm0, %v9676_v58, 0.0  ;;  %v2967_v54 = vld [vmem:[%s10784_s5 + $0x28] sm:$0xff]  ;;  %7507 = vmatpush3.bf16.msra.mxu1 %v7504_v44 }
 0xe9c   : > { %2676 = vadd.xlane.f32.xlu0 %v2675_v19  ;;  %7509 = vmatprep.subr.bf16.mxu1 %v7508_v34  ;;  %v7512_v19 = vpack.c.bf16 %v2967_v54, %v2966_v48 }
 0xe9f   : > { %7511 = vmatpush3.bf16.msra.mxu1 %v7508_v34 }
 0xea0   : > { %7513 = vmatprep.subr.bf16.mxu1 %v7512_v19 }
 0xea3   : > { %7515 = vmatpush3.bf16.msra.mxu1 %v7512_v19 }
 0xef5   : > { %v2662_v11 = vpop.xlane.xlu1 %2661 }
 0xef6   : > { %v2682_v12 = vmul.f32 0.03125, %v2662_v11  ;;  %v2659_v47 = vpop.xlane.xlu0 %2658 }
 0xef7   : > { %v2681_v63 = vmul.f32 0.03125, %v2659_v47 }
 0xef8   : > { %v9683_v36 = vsub.f32 %v9644_v4, %v2682_v12 }
 0xef9   : > { %v9686_v59 = vsub.f32 %v9646_v22, %v2681_v63 }
 0xefa   : > { %v2698_v13 = vmul.f32 %v9683_v36, %v9683_v36 }
 0xefb   : > { %v2697_v9 = vmul.f32 %v9686_v59, %v9686_v59 }
 0xefc   : > { %v2708_v5 = vsel %vm381_vm0, %v2698_v13, 0.0 }
 0xefd   : > { %2709 = vadd.xlane.f32.xlu1 %v2708_v5  ;;  %v2705_v7 = vsel %vm381_vm0, %v2697_v9, 0.0 }
 0xefe   : > { %v2665_v55 = vpop.xlane.xlu0 %2664  ;;  %2706 = vadd.xlane.f32.xlu0 %v2705_v7 }
 0xeff   : > { %v2683_v15 = vmul.f32 0.03125, %v2665_v55 }
 0xf01   : > { %v9695_v16 = vsub.f32 %v9654_v20, %v2683_v15 }
 0xf02   : > { %v2668_v8 = vpop.xlane.xlu0 %2667 }
 0xf03   : > { %v2684_v52 = vmul.f32 0.03125, %v2668_v8  ;;  %v2699_v1 = vmul.f32 %v9695_v16, %v9695_v16 }
 0xf05   : > { %v9700_v51 = vsub.f32 %v9656_v42, %v2684_v52  ;;  %v2674_v10 = vpop.xlane.xlu1 %2673  ;;  %v2711_v57 = vsel %vm381_vm0, %v2699_v1, 0.0  ;;  %v6094_v1 = vld [vmem:[#allocation8 + $0x3] ss:$0 sm:$0xff] }
 0xf06   : > { %v2686_v61 = vmul.f32 0.03125, %v2674_v10  ;;  %v2671_v60 = vpop.xlane.xlu0 %2670  ;;  %2712 = vadd.xlane.f32.xlu0 %v2711_v57 }
 0xf07   : > { %v2685_v62 = vmul.f32 0.03125, %v2671_v60  ;;  %v2700_v39 = vmul.f32 %v9700_v51, %v9700_v51 }
 0xf08   : > { %v9706_v0 = vsub.f32 %v9664_v21, %v2686_v61 }
 0xf09   : > { %v9709_v2 = vsub.f32 %v9666_v50, %v2685_v62  ;;  %v2714_v3 = vsel %vm381_vm0, %v2700_v39, 0.0 }
 0xf0a   : > { %2715 = vadd.xlane.f32.xlu1 %v2714_v3  ;;  %v2702_v14 = vmul.f32 %v9706_v0, %v9706_v0 }
 0xf0b   : > { %v2701_v40 = vmul.f32 %v9709_v2, %v9709_v2 }
 0xf0c   : > { %v2720_v41 = vsel %vm381_vm0, %v2702_v14, 0.0 }
 0xf0d   : > { %v2717_v26 = vsel %vm381_vm0, %v2701_v40, 0.0 }
 0xf0e   : > { %2721 = vadd.xlane.f32.xlu1 %v2720_v41  ;;  %2718 = vadd.xlane.f32.xlu0 %v2717_v26  ;;  %v6095_v41 = vld [vmem:[#allocation8 + $0x4] ss:$0 sm:$0xff] }
 0xf28   : > { %v2680_v31 = vpop.xlane.xlu1 %2679 }
 0xf29   : > { %v2688_v33 = vmul.f32 0.03125, %v2680_v31  ;;  %v2677_v45 = vpop.xlane.xlu0 %2676 }
 0xf2a   : > { %v2687_v24 = vmul.f32 0.03125, %v2677_v45 }
 0xf2b   : > { %v9719_v23 = vsub.f32 %v9674_v53, %v2688_v33 }
 0xf2c   : > { %v9722_v6 = vsub.f32 %v9676_v58, %v2687_v24 }
 0xf2d   : > { %v2704_v25 = vmul.f32 %v9719_v23, %v9719_v23 }
 0xf2e   : > { %v2703_v46 = vmul.f32 %v9722_v6, %v9722_v6 }
 0xf2f   : > { %v2726_v28 = vsel %vm381_vm0, %v2704_v25, 0.0 }
 0xf30   : > { %2727 = vadd.xlane.f32.xlu1 %v2726_v28  ;;  %v2723_v43 = vsel %vm381_vm0, %v2703_v46, 0.0 }
 0xf31   : > { %2724 = vadd.xlane.f32.xlu0 %v2723_v43 }
 0xf8a   : > { %v2710_v11 = vpop.xlane.xlu1 %2709 }
 0xf8b   : > { %v2730_v12 = vmul.f32 0.03125, %v2710_v11  ;;  %v2707_v47 = vpop.xlane.xlu0 %2706 }
 0xf8c   : > { %v2729_v63 = vmul.f32 0.03125, %v2707_v47 }
 0xf8d   : > { %v2738_v13 = vadd.f32 1e-05, %v2730_v12 }
 0xf8e   : > { %v2737_v9 = vadd.f32 1e-05, %v2729_v63 }
 0xf8f   : > { %8281 = vrsqrt.f32 %v2738_v13 }
 0xf90   : > { %8283 = vrsqrt.f32 %v2737_v9  ;;  %v2968_v9 = vld [vmem:[%s10784_s5 + $0x30] sm:$0xff] }
 0xf93   : > { %v2713_v5 = vpop.xlane.xlu0 %2712 }
 0xf94   : > { %v2731_v7 = vmul.f32 0.03125, %v2713_v5  ;;  %v2969_v5 = vld [vmem:[%s10784_s5 + $0x38] sm:$0xff] }
 0xf96   : > { %v2739_v55 = vadd.f32 1e-05, %v2731_v7  ;;  %v7516_v7 = vpack.c.bf16 %v2969_v5, %v2968_v9 }
 0xf97   : > { %v2716_v15 = vpop.xlane.xlu1 %2715 }
 0xf98   : > { %8285 = vrsqrt.f32 %v2739_v55  ;;  %v2732_v8 = vmul.f32 0.03125, %v2716_v15  ;;  %7517 = vmatprep.subr.bf16.mxu1 %v7516_v7  ;;  %v2972_v15 = vld [vmem:[%s10784_s5 + $0x50] sm:$0xff] }
 0xf99   : > { %v8282_v52 = vpop.eup %8281  ;;  %7519 = vmatpush3.bf16.msra.mxu1 %v7516_v7 }
 0xf9a   : > { %v8284_v10 = vpop.eup %8283  ;;  %v2754_v57 = vmul.f32 %v8282_v52, %v9683_v36  ;;  %v2740_v61 = vadd.f32 1e-05, %v2732_v8  ;;  %v2973_v8 = vld [vmem:[%s10784_s5 + $0x58] sm:$0xff] }
 0xf9b   : > { %v2722_v60 = vpop.xlane.xlu1 %2721  ;;  %v2719_v62 = vpop.xlane.xlu0 %2718  ;;  %v2753_v39 = vmul.f32 %v8284_v10, %v9686_v59  ;;  %v7524_v52 = vpack.c.bf16 %v2973_v8, %v2972_v15  ;;  %v2975_v10 = vld [vmem:[%s10784_s5 + $0x68] sm:$0xff] }
 0xf9c   : > { %v2766_v3 = vmul.f32 %v6094_v1, %v2754_v57  ;;  %8287 = vrsqrt.f32 %v2740_v61  ;;  %v2734_v14 = vmul.f32 0.03125, %v2722_v60  ;;  %v2733_v40 = vmul.f32 0.03125, %v2719_v62  ;;  %v2976_v61 = vld [vmem:[%s10784_s5 + $0x70] sm:$0xff]  ;;  %v2977_v60 = vld [vmem:[%s10784_s5 + $0x78] sm:$0xff] }
 0xf9d   : > { %v2765_v26 = vmul.f32 %v6094_v1, %v2753_v39  ;;  %v7532_v62 = vpack.c.bf16 %v2977_v60, %v2976_v61  ;;  %v6096_v39 = vld [vmem:[%s10786_s7 + $0x1] ss:$0 sm:$0xff] }
 0xf9e   : > { %v2742_v49 = vadd.f32 1e-05, %v2734_v14  ;;  %v2741_v18 = vadd.f32 1e-05, %v2733_v40  ;;  %v2778_v35 = vadd.f32 %v6095_v41, %v2766_v3 }
 0xf9f   : > { %v2777_v30 = vadd.f32 %v6095_v41, %v2765_v26 }
 0xfa0   : > { %8289 = vrsqrt.f32 %v2742_v49 }
 0xfa1   : > { %8291 = vrsqrt.f32 %v2741_v18  ;;  %6936 = vmatprep.mubr.msk.f32.mxu0 %vm381_vm0, %v2777_v30 }
 0xfa2   : > { %v8286_v36 = vpop.eup %8285  ;;  %6937 = vmatmul.mubr.msk.f32.vlgmr.msra.gmra.mrb[32].mxu0 %vm381_vm0, %v2778_v35 }
 0xfa3   : > { %v2755_v27 = vmul.f32 %v8286_v36, %v9695_v16 }
 0xfa5   : > { %v2767_v59 = vmul.f32 %v6094_v1, %v2755_v27 }
 0xfa6   : > { %v8288_v37 = vpop.eup %8287 }
 0xfa7   : > { %v2779_v31 = vadd.f32 %v6095_v41, %v2767_v59  ;;  %v2756_v33 = vmul.f32 %v8288_v37, %v9700_v51 }
 0xfa9   : > { %6939 = vmatprep.mubr.msk.f32.mxu0 %vm381_vm0, %v2779_v31  ;;  %v2768_v45 = vmul.f32 %v6094_v1, %v2756_v33 }
 0xfaa   : > { %v8290_v24 = vpop.eup %8289 }
 0xfab   : > { %v8292_v25 = vpop.eup %8291  ;;  %v2780_v46 = vadd.f32 %v6095_v41, %v2768_v45  ;;  %v2758_v28 = vmul.f32 %v8290_v24, %v9706_v0 }
 0xfac   : > { %v2757_v43 = vmul.f32 %v8292_v25, %v9709_v2 }
 0xfad   : > { %6940 = vmatmul.mubr.msk.f32.gmra.mrb[34].mxu0 %vm381_vm0, %v2780_v46  ;;  %v2770_v29 = vmul.f32 %v6094_v1, %v2758_v28 }
 0xfae   : > { %v2769_v32 = vmul.f32 %v6094_v1, %v2757_v43 }
 0xfaf   : > { %v2782_v16 = vadd.f32 %v6095_v41, %v2770_v29 }
 0xfb0   : > { %v2781_v38 = vadd.f32 %v6095_v41, %v2769_v32 }
 0xfb2   : > { %6942 = vmatprep.mubr.msk.f32.mxu0 %vm381_vm0, %v2781_v38 }
 0xfb3   : > { %6943 = vmatmul.mubr.msk.f32.gmra.mrb[36].mxu0 %vm381_vm0, %v2782_v16 }
 0xfbd   : > { %v2728_v51 = vpop.xlane.xlu1 %2727 }
 0xfbe   : > { %v2736_v44 = vmul.f32 0.03125, %v2728_v51  ;;  %v2725_v56 = vpop.xlane.xlu0 %2724 }
 0xfbf   : > { %v2735_v34 = vmul.f32 0.03125, %v2725_v56 }
 0xfc0   : > { %v2744_v48 = vadd.f32 1e-05, %v2736_v44 }
 0xfc1   : > { %v2743_v54 = vadd.f32 1e-05, %v2735_v34 }
 0xfc2   : > { %8293 = vrsqrt.f32 %v2744_v48 }
 0xfc3   : > { %8295 = vrsqrt.f32 %v2743_v54 }
 0xfcc   : > { %v8294_v0 = vpop.eup %8293 }
 0xfcd   : > { %v8296_v2 = vpop.eup %8295  ;;  %v2760_v19 = vmul.f32 %v8294_v0, %v9719_v23  ;;  %v2970_v23 = vld [vmem:[%s10784_s5 + $0x40] sm:$0xff] }
 0xfce   : > { %v2759_v11 = vmul.f32 %v8296_v2, %v9722_v6  ;;  %v2971_v6 = vld [vmem:[%s10784_s5 + $0x48] sm:$0xff] }
 0xfcf   : > { %v2772_v12 = vmul.f32 %v6094_v1, %v2760_v19  ;;  %v7520_v55 = vpack.c.bf16 %v2971_v6, %v2970_v23 }
 0xfd0   : > { %v2771_v47 = vmul.f32 %v6094_v1, %v2759_v11  ;;  %v2974_v1 = vld [vmem:[%s10784_s5 + $0x60] sm:$0xff] }
 0xfd1   : > { %v2784_v13 = vadd.f32 %v6095_v41, %v2772_v12  ;;  %7521 = vmatprep.subr.bf16.mxu1 %v7520_v55  ;;  %v7528_v57 = vpack.c.bf16 %v2975_v10, %v2974_v1 }
 0xfd2   : > { %v2783_v63 = vadd.f32 %v6095_v41, %v2771_v47  ;;  %7523 = vmatpush3.bf16.msra.mxu1 %v7520_v55 }
 0xfd3   : > { %7525 = vmatprep.subr.bf16.mxu1 %v7524_v52 }
 0xfd4   : > { %6945 = vmatprep.mubr.msk.f32.mxu0 %vm381_vm0, %v2783_v63 }
 0xfd5   : > { %6946 = vmatmul.mubr.msk.f32.gmra.mrb[38].mxu0 %vm381_vm0, %v2784_v13 }
 0xfd6   : > { %7527 = vmatpush3.bf16.msra.mxu1 %v7524_v52 }
 0xfd7   : > { %7529 = vmatprep.subr.bf16.mxu1 %v7528_v57 }
 0xfda   : > { %7531 = vmatpush3.bf16.msra.mxu1 %v7528_v57 }
 0xfdb   : > { %7533 = vmatprep.subr.bf16.mxu1 %v7532_v62 }
 0xfde   : > { %7535 = vmatpush3.bf16.msra.mxu1 %v7532_v62 }
0x1075   : > { %v6938_v3 = vpop.f32.mrb[32].mxu0 }
0x1076   : > { %v2889_v14 = vadd.f32 %v6938_v3, %v6096_v39  ;;  %v2883_v40 = vpop.f32.mrb[33].mxu0 }
0x1077   : > { %v2884_v41 = vadd.f32 %v6096_v39, %v2883_v40  ;;  %v6105_v40 = vld [vmem:[#allocation8 + $0x5] ss:$0 sm:$0xff] }
0x1078   : > { %v2931_v26 = vmul.f32 0.70710677, %v2889_v14  ;;  %v2923_v46 = vmul.f32 0.5, %v2889_v14 }
0x1079   : > { %v2930_v49 = vmul.f32 0.70710677, %v2884_v41  ;;  %v2922_v45 = vmul.f32 0.5, %v2884_v41 }
0x107a   : > { %8297 = verf.f32 %v2931_v26 }
0x107b   : > { %8299 = verf.f32 %v2930_v49 }
0x1080   : > { %v6941_v18 = vpop.f32.mrb[34].mxu0 }
0x1081   : > { %v2899_v30 = vadd.f32 %v6941_v18, %v6096_v39  ;;  %v2893_v35 = vpop.f32.mrb[35].mxu0 }
0x1082   : > { %v2894_v36 = vadd.f32 %v6096_v39, %v2893_v35 }
0x1083   : > { %v2933_v27 = vmul.f32 0.70710677, %v2899_v30  ;;  %v2925_v0 = vmul.f32 0.5, %v2899_v30 }
0x1084   : > { %v8298_v59 = vpop.eup %8297  ;;  %v2932_v37 = vmul.f32 0.70710677, %v2894_v36  ;;  %v2924_v48 = vmul.f32 0.5, %v2894_v36 }
0x1085   : > { %v8300_v31 = vpop.eup %8299  ;;  %v2947_v33 = vadd.f32 1.0, %v8298_v59  ;;  %8301 = verf.f32 %v2933_v27 }
0x1086   : > { %v2946_v24 = vadd.f32 1.0, %v8300_v31  ;;  %8303 = verf.f32 %v2932_v37  ;;  %v6944_v25 = vpop.f32.mrb[36].mxu0 }
0x1087   : > { %v2909_v28 = vadd.f32 %v6944_v25, %v6096_v39  ;;  %v2903_v43 = vpop.f32.mrb[37].mxu0  ;;  %v2955_v16 = vmul.f32 %v2947_v33, %v2923_v46 }
0x1088   : > { %v2904_v29 = vadd.f32 %v6096_v39, %v2903_v43  ;;  %v2954_v32 = vmul.f32 %v2946_v24, %v2922_v45 }
0x1089   : > { %v2935_v38 = vmul.f32 0.70710677, %v2909_v28  ;;  %v2927_v9 = vmul.f32 0.5, %v2909_v28 }
0x108a   : > { %v2934_v51 = vmul.f32 0.70710677, %v2904_v29  ;;  %6980 = vmatprep.mubr.f32.mxu1 %v2954_v32  ;;  %v2926_v63 = vmul.f32 0.5, %v2904_v29 }
0x108b   : > { %8305 = verf.f32 %v2935_v38  ;;  %6981 = vmatmul.mubr.f32.vlgmr.msra.gmra.mrb[48].mxu1 %v2955_v16 }
0x108c   : > { %8307 = verf.f32 %v2934_v51 }
0x108f   : > { %v8302_v44 = vpop.eup %8301 }
0x1090   : > { %v8304_v56 = vpop.eup %8303  ;;  %v2949_v34 = vadd.f32 1.0, %v8302_v44 }
0x1091   : > { %v2948_v54 = vadd.f32 1.0, %v8304_v56 }
0x1092   : > { %v2957_v19 = vmul.f32 %v2949_v34, %v2925_v0 }
0x1093   : > { %v2956_v2 = vmul.f32 %v2948_v54, %v2924_v48 }
0x1095   : > { %v8306_v11 = vpop.eup %8305  ;;  %6983 = vmatprep.mubr.f32.mxu1 %v2956_v2 }
0x1096   : > { %v8308_v12 = vpop.eup %8307  ;;  %v2951_v47 = vadd.f32 1.0, %v8306_v11  ;;  %6984 = vmatmul.mubr.f32.gmra.mrb[50].mxu1 %v2957_v19 }
0x1097   : > { %v2950_v13 = vadd.f32 1.0, %v8308_v12 }
0x1098   : > { %v2959_v7 = vmul.f32 %v2951_v47, %v2927_v9 }
0x1099   : > { %v2958_v5 = vmul.f32 %v2950_v13, %v2926_v63 }
0x109b   : > { %6986 = vmatprep.mubr.f32.mxu1 %v2958_v5 }
0x109c   : > { %6987 = vmatmul.mubr.f32.gmra.mrb[52].mxu1 %v2959_v7 }
0x10a8   : > { %v6947_v23 = vpop.f32.mrb[38].mxu0 }
0x10a9   : > { %v2919_v6 = vadd.f32 %v6947_v23, %v6096_v39  ;;  %v2913_v55 = vpop.f32.mrb[39].mxu0 }
0x10aa   : > { %v2914_v15 = vadd.f32 %v6096_v39, %v2913_v55 }
0x10ab   : > { %v2937_v8 = vmul.f32 0.70710677, %v2919_v6  ;;  %v2929_v62 = vmul.f32 0.5, %v2919_v6 }
0x10ac   : > { %v2936_v52 = vmul.f32 0.70710677, %v2914_v15  ;;  %v2928_v61 = vmul.f32 0.5, %v2914_v15 }
0x10ad   : > { %8309 = verf.f32 %v2937_v8 }
0x10ae   : > { %8311 = verf.f32 %v2936_v52 }
0x10b7   : > { %v8310_v1 = vpop.eup %8309 }
0x10b8   : > { %v8312_v10 = vpop.eup %8311  ;;  %v2953_v57 = vadd.f32 1.0, %v8310_v1 }
0x10b9   : > { %v2952_v60 = vadd.f32 1.0, %v8312_v10 }
0x10ba   : > { %v2961_v14 = vmul.f32 %v2953_v57, %v2929_v62 }
0x10bb   : > { %v2960_v3 = vmul.f32 %v2952_v60, %v2928_v61 }
0x10bd   : > { %6989 = vmatprep.mubr.f32.mxu1 %v2960_v3 }
0x10be   : > { %6990 = vmatmul.mubr.f32.gmra.mrb[54].mxu1 %v2961_v14 }
0x115e   : > { %v6982_v41 = vpop.f32.mrb[48].mxu1 }
0x115f   : > { %v3084_v26 = vadd.f32 %v6982_v41, %v9644_v4  ;;  %v3044_v49 = vpop.f32.mrb[49].mxu1  ;;  %v3243_v41 = vld [vmem:[#allocation3 + $0x28] sm:$0xff] }
0x1160   : > { %v3083_v39 = vadd.f32 %v3044_v49, %v9646_v22  ;;  %v3244_v49 = vld [vmem:[#allocation3 + $0x30] sm:$0xff] }
0x1161   : > { %v9799_v18 = vadd.f32 %v6105_v40, %v3084_v26 }
0x1162   : > { %v9801_v30 = vadd.f32 %v6105_v40, %v3083_v39  ;;  %v3245_v39 = vld [vmem:[#allocation3 + $0x38] sm:$0xff] }
0x1163   : > { %v3116_v35 = vsel %vm381_vm0, %v9799_v18, 0.0 }
0x1164   : > { %3117 = vadd.xlane.f32.xlu1 %v3116_v35  ;;  %v3113_v36 = vsel %vm381_vm0, %v9801_v30, 0.0  ;;  %v7540_v35 = vpack.c.bf16 %v3245_v39, %v3244_v49 }
0x1165   : > { %3114 = vadd.xlane.f32.xlu0 %v3113_v36 }
0x1169   : > { %v6985_v27 = vpop.f32.mrb[50].mxu1 }
0x116a   : > { %v3086_v59 = vadd.f32 %v6985_v27, %v9656_v42  ;;  %v3054_v37 = vpop.f32.mrb[51].mxu1 }
0x116b   : > { %v3085_v4 = vadd.f32 %v3054_v37, %v9654_v20 }
0x116c   : > { %v9809_v31 = vadd.f32 %v6105_v40, %v3086_v59 }
0x116d   : > { %v9811_v22 = vadd.f32 %v6105_v40, %v3085_v4 }
0x116e   : > { %v3122_v33 = vsel %vm381_vm0, %v9809_v31, 0.0 }
0x116f   : > { %v6988_v45 = vpop.f32.mrb[52].mxu1  ;;  %3123 = vadd.xlane.f32.xlu1 %v3122_v33  ;;  %v3119_v24 = vsel %vm381_vm0, %v9811_v22, 0.0 }
0x1170   : > { %v3088_v25 = vadd.f32 %v6988_v45, %v9664_v21  ;;  %v3064_v46 = vpop.f32.mrb[53].mxu1  ;;  %3120 = vadd.xlane.f32.xlu0 %v3119_v24 }
0x1171   : > { %v3087_v42 = vadd.f32 %v3064_v46, %v9666_v50 }
0x1172   : > { %v9819_v28 = vadd.f32 %v6105_v40, %v3088_v25 }
0x1173   : > { %v9821_v20 = vadd.f32 %v6105_v40, %v3087_v42 }
0x1174   : > { %v3128_v43 = vsel %vm381_vm0, %v9819_v28, 0.0 }
0x1175   : > { %3129 = vadd.xlane.f32.xlu1 %v3128_v43  ;;  %v3125_v29 = vsel %vm381_vm0, %v9821_v20, 0.0 }
0x1176   : > { %3126 = vadd.xlane.f32.xlu0 %v3125_v29 }
0x1191   : > { %v6991_v32 = vpop.f32.mrb[54].mxu1 }
0x1192   : > { %v3090_v16 = vadd.f32 %v6991_v32, %v9674_v53  ;;  %v3074_v21 = vpop.f32.mrb[55].mxu1 }
0x1193   : > { %v3089_v38 = vadd.f32 %v3074_v21, %v9676_v58 }
0x1194   : > { %v9829_v51 = vadd.f32 %v6105_v40, %v3090_v16 }
0x1195   : > { %v9831_v50 = vadd.f32 %v6105_v40, %v3089_v38  ;;  %v3242_v40 = vld [vmem:[#allocation3 + $0x20] sm:$0xff] }
0x1196   : > { %v3134_v44 = vsel %vm381_vm0, %v9829_v51, 0.0  ;;  %v7536_v26 = vpack.c.bf16 %v3243_v41, %v3242_v40 }
0x1197   : > { %3135 = vadd.xlane.f32.xlu1 %v3134_v44  ;;  %v3131_v56 = vsel %vm381_vm0, %v9831_v50, 0.0 }
0x1198   : > { %3132 = vadd.xlane.f32.xlu0 %v3131_v56  ;;  %7537 = vmatprep.subr.bf16.mxu0 %v7536_v26 }
0x1199   : > { %7539 = vmatpush3.bf16.msra.mxu0 %v7536_v26 }
0x119a   : > { %7541 = vmatprep.subr.bf16.mxu0 %v7540_v35 }
0x119d   : > { %7543 = vmatpush3.bf16.msra.mxu0 %v7540_v35 }
0x11f1   : > { %v3118_v34 = vpop.xlane.xlu1 %3117 }
0x11f2   : > { %v3138_v48 = vmul.f32 0.03125, %v3118_v34  ;;  %v3115_v54 = vpop.xlane.xlu0 %3114 }
0x11f3   : > { %v3137_v0 = vmul.f32 0.03125, %v3115_v54 }
0x11f4   : > { %v9838_v53 = vsub.f32 %v9799_v18, %v3138_v48 }
0x11f5   : > { %v9841_v58 = vsub.f32 %v9801_v30, %v3137_v0  ;;  %v6108_v0 = vld [vmem:[#allocation8 + $0x8] ss:$0 sm:$0xff] }
0x11f6   : > { %v3154_v2 = vmul.f32 %v9838_v53, %v9838_v53 }
0x11f7   : > { %v3153_v19 = vmul.f32 %v9841_v58, %v9841_v58 }
0x11f8   : > { %v3164_v11 = vsel %vm381_vm0, %v3154_v2, 0.0 }
0x11f9   : > { %3165 = vadd.xlane.f32.xlu1 %v3164_v11  ;;  %v3161_v12 = vsel %vm381_vm0, %v3153_v19, 0.0 }
0x11fa   : > { %3162 = vadd.xlane.f32.xlu0 %v3161_v12 }
0x11fc   : > { %v3124_v47 = vpop.xlane.xlu1 %3123 }
0x11fd   : > { %v3140_v63 = vmul.f32 0.03125, %v3124_v47  ;;  %v3121_v13 = vpop.xlane.xlu0 %3120 }
0x11fe   : > { %v3139_v9 = vmul.f32 0.03125, %v3121_v13 }
0x11ff   : > { %v9850_v5 = vsub.f32 %v9809_v31, %v3140_v63 }
0x1200   : > { %v9853_v7 = vsub.f32 %v9811_v22, %v3139_v9 }
0x1201   : > { %v3156_v23 = vmul.f32 %v9850_v5, %v9850_v5 }
0x1202   : > { %v3130_v6 = vpop.xlane.xlu1 %3129  ;;  %v3155_v55 = vmul.f32 %v9853_v7, %v9853_v7 }
0x1203   : > { %v3142_v15 = vmul.f32 0.03125, %v3130_v6  ;;  %v3127_v8 = vpop.xlane.xlu0 %3126  ;;  %v3170_v52 = vsel %vm381_vm0, %v3156_v23, 0.0  ;;  %v6109_v23 = vld [vmem:[#allocation8 + $0x9] ss:$0 sm:$0xff] }
0x1204   : > { %v3141_v1 = vmul.f32 0.03125, %v3127_v8  ;;  %3171 = vadd.xlane.f32.xlu1 %v3170_v52  ;;  %v3167_v10 = vsel %vm381_vm0, %v3155_v55, 0.0 }
0x1205   : > { %v9862_v57 = vsub.f32 %v9819_v28, %v3142_v15  ;;  %3168 = vadd.xlane.f32.xlu0 %v3167_v10 }
0x1206   : > { %v9865_v61 = vsub.f32 %v9821_v20, %v3141_v1 }
0x1207   : > { %v3158_v60 = vmul.f32 %v9862_v57, %v9862_v57 }
0x1208   : > { %v3157_v62 = vmul.f32 %v9865_v61, %v9865_v61 }
0x1209   : > { %v3176_v3 = vsel %vm381_vm0, %v3158_v60, 0.0 }
0x120a   : > { %3177 = vadd.xlane.f32.xlu1 %v3176_v3  ;;  %v3173_v14 = vsel %vm381_vm0, %v3157_v62, 0.0 }
0x120b   : > { %3174 = vadd.xlane.f32.xlu0 %v3173_v14 }
0x1224   : > { %v3136_v36 = vpop.xlane.xlu1 %3135 }
0x1225   : > { %v3144_v27 = vmul.f32 0.03125, %v3136_v36  ;;  %v3133_v59 = vpop.xlane.xlu0 %3132 }
0x1226   : > { %v3143_v37 = vmul.f32 0.03125, %v3133_v59 }
0x1227   : > { %v9874_v4 = vsub.f32 %v9829_v51, %v3144_v27 }
0x1228   : > { %v9877_v33 = vsub.f32 %v9831_v50, %v3143_v37 }
0x1229   : > { %v3160_v45 = vmul.f32 %v9874_v4, %v9874_v4 }
0x122a   : > { %v3159_v24 = vmul.f32 %v9877_v33, %v9877_v33 }
0x122b   : > { %v3182_v25 = vsel %vm381_vm0, %v3160_v45, 0.0 }
0x122c   : > { %3183 = vadd.xlane.f32.xlu1 %v3182_v25  ;;  %v3179_v46 = vsel %vm381_vm0, %v3159_v24, 0.0 }
0x122d   : > { %3180 = vadd.xlane.f32.xlu0 %v3179_v46 }
0x1286   : > { %v3166_v42 = vpop.xlane.xlu1 %3165 }
0x1287   : > { %v3186_v43 = vmul.f32 0.03125, %v3166_v42  ;;  %v3163_v29 = vpop.xlane.xlu0 %3162 }
0x1288   : > { %v3185_v32 = vmul.f32 0.03125, %v3163_v29 }
0x1289   : > { %v3194_v16 = vadd.f32 1e-05, %v3186_v43 }
0x128a   : > { %v3193_v21 = vadd.f32 1e-05, %v3185_v32 }
0x128b   : > { %8313 = vrsqrt.f32 %v3194_v16 }
0x128c   : > { %8315 = vrsqrt.f32 %v3193_v21  ;;  %v6110_v21 = vld [vmem:[%s10786_s7 + $0x2] ss:$0 sm:$0xff] }
0x1291   : > { %v3172_v38 = vpop.xlane.xlu1 %3171 }
0x1292   : > { %v3188_v44 = vmul.f32 0.03125, %v3172_v38  ;;  %v3169_v56 = vpop.xlane.xlu0 %3168 }
0x1293   : > { %v3187_v34 = vmul.f32 0.03125, %v3169_v56 }
0x1294   : > { %v3196_v48 = vadd.f32 1e-05, %v3188_v44 }
0x1295   : > { %v8314_v54 = vpop.eup %8313  ;;  %v3195_v2 = vadd.f32 1e-05, %v3187_v34 }
0x1296   : > { %v8316_v19 = vpop.eup %8315  ;;  %v3210_v11 = vmul.f32 %v8314_v54, %v9838_v53  ;;  %8317 = vrsqrt.f32 %v3196_v48 }
0x1297   : > { %8319 = vrsqrt.f32 %v3195_v2  ;;  %v3178_v12 = vpop.xlane.xlu1 %3177  ;;  %v3209_v47 = vmul.f32 %v8316_v19, %v9841_v58 }
0x1298   : > { %v3222_v63 = vmul.f32 %v6108_v0, %v3210_v11  ;;  %v3190_v13 = vmul.f32 0.03125, %v3178_v12  ;;  %v3175_v9 = vpop.xlane.xlu0 %3174 }
0x1299   : > { %v3189_v6 = vmul.f32 0.03125, %v3175_v9  ;;  %v3221_v55 = vmul.f32 %v6108_v0, %v3209_v47 }
0x129a   : > { %v3198_v15 = vadd.f32 1e-05, %v3190_v13  ;;  %v3234_v1 = vadd.f32 %v6109_v23, %v3222_v63 }
0x129b   : > { %v3197_v8 = vadd.f32 1e-05, %v3189_v6  ;;  %v3233_v52 = vadd.f32 %v6109_v23, %v3221_v55 }
0x129c   : > { %8321 = vrsqrt.f32 %v3198_v15 }
0x129d   : > { %8323 = vrsqrt.f32 %v3197_v8  ;;  %7000 = vmatprep.mubr.msk.f32.mxu0 %vm381_vm0, %v3233_v52 }
0x129e   : > { %7001 = vmatmul.mubr.msk.f32.vlgmr.msra.gmra.mrb[40].mxu0 %vm381_vm0, %v3234_v1 }
0x12a0   : > { %v8318_v53 = vpop.eup %8317 }
0x12a1   : > { %v8320_v10 = vpop.eup %8319  ;;  %v3212_v58 = vmul.f32 %v8318_v53, %v9850_v5 }
0x12a2   : > { %v3211_v60 = vmul.f32 %v8320_v10, %v9853_v7 }
0x12a3   : > { %v3224_v62 = vmul.f32 %v6108_v0, %v3212_v58 }
0x12a4   : > { %v3223_v3 = vmul.f32 %v6108_v0, %v3211_v60 }
0x12a5   : > { %v3236_v26 = vadd.f32 %v6109_v23, %v3224_v62 }
0x12a6   : > { %v8322_v14 = vpop.eup %8321  ;;  %v3235_v40 = vadd.f32 %v6109_v23, %v3223_v3 }
0x12a7   : > { %v8324_v41 = vpop.eup %8323  ;;  %v3214_v49 = vmul.f32 %v8322_v14, %v9862_v57 }
0x12a8   : > { %7003 = vmatprep.mubr.msk.f32.mxu0 %vm381_vm0, %v3235_v40  ;;  %v3213_v39 = vmul.f32 %v8324_v41, %v9865_v61 }
0x12a9   : > { %7004 = vmatmul.mubr.msk.f32.gmra.mrb[42].mxu0 %vm381_vm0, %v3236_v26  ;;  %v3226_v35 = vmul.f32 %v6108_v0, %v3214_v49 }
0x12aa   : > { %v3225_v36 = vmul.f32 %v6108_v0, %v3213_v39 }
0x12ab   : > { %v3238_v5 = vadd.f32 %v6109_v23, %v3226_v35 }
0x12ac   : > { %v3237_v27 = vadd.f32 %v6109_v23, %v3225_v36 }
0x12ae   : > { %7006 = vmatprep.mubr.msk.f32.mxu0 %vm381_vm0, %v3237_v27 }
0x12af   : > { %7007 = vmatmul.mubr.msk.f32.gmra.mrb[44].mxu0 %vm381_vm0, %v3238_v5 }
0x12b9   : > { %v3184_v7 = vpop.xlane.xlu1 %3183 }
0x12ba   : > { %v3192_v59 = vmul.f32 0.03125, %v3184_v7  ;;  %v3181_v37 = vpop.xlane.xlu0 %3180 }
0x12bb   : > { %v3191_v45 = vmul.f32 0.03125, %v3181_v37 }
0x12bc   : > { %v3200_v24 = vadd.f32 1e-05, %v3192_v59 }
0x12bd   : > { %v3199_v57 = vadd.f32 1e-05, %v3191_v45 }
0x12be   : > { %8325 = vrsqrt.f32 %v3200_v24  ;;  %v6120_v24 = vld [vmem:[%s10781_s2 + $0x108] sm:$0xff] }
0x12bf   : > { %8327 = vrsqrt.f32 %v3199_v57  ;;  %v6119_v57 = vld [vmem:[%s10781_s2 + $0x100] sm:$0xff] }
0x12c8   : > { %v8326_v25 = vpop.eup %8325 }
0x12c9   : > { %v8328_v61 = vpop.eup %8327  ;;  %v3216_v46 = vmul.f32 %v8326_v25, %v9874_v4 }
0x12ca   : > { %v3215_v42 = vmul.f32 %v8328_v61, %v9877_v33 }
0x12cb   : > { %v3228_v43 = vmul.f32 %v6108_v0, %v3216_v46 }
0x12cc   : > { %v3227_v29 = vmul.f32 %v6108_v0, %v3215_v42 }
0x12cd   : > { %v3240_v16 = vadd.f32 %v6109_v23, %v3228_v43  ;;  %v6122_v43 = vld [vmem:[%s10781_s2 + $0x118] sm:$0xff] }
0x12ce   : > { %v3239_v32 = vadd.f32 %v6109_v23, %v3227_v29 }
0x12d0   : > { %7009 = vmatprep.mubr.msk.f32.mxu0 %vm381_vm0, %v3239_v32 }
0x12d1   : > { %7010 = vmatmul.mubr.msk.f32.gmra.mrb[46].mxu0 %vm381_vm0, %v3240_v16 }
0x1371   : > { %v7002_v38 = vpop.f32.mrb[40].mxu0 }
0x1372   : > { %v3346_v44 = vadd.f32 %v7002_v38, %v6110_v21  ;;  %v3340_v56 = vpop.f32.mrb[41].mxu0 }
0x1373   : > { %v3341_v34 = vadd.f32 %v6110_v21, %v3340_v56  ;;  %v6124_v56 = vld [vmem:[%s10781_s2 + $0x128] sm:$0xff] }
0x1374   : > { %v9940_v36 = vmul.f32 0.35355338, %v3346_v44 }
0x1375   : > { %v9904_v48 = vpack.i.bf16 %v3346_v44, %v3341_v34  ;;  %v9906_v4 = vmul.f32 0.35355338, %v3341_v34  ;;  %v6121_v44 = vld [vmem:[%s10781_s2 + $0x110] sm:$0xff] }
0x1377   : > { %7978 = vrot.lane.b32.xlu0 %v9904_v48, %s8635_s20  ;;  %7028 = vmatprep.mubr.msk.f32.mxu0 %vm688_vm1, %v9906_v4 }
0x137c   : > { %v7005_v33 = vpop.f32.mrb[42].mxu0 }
0x137d   : > { %v3356_v54 = vadd.f32 %v7005_v33, %v6110_v21  ;;  %v3350_v0 = vpop.f32.mrb[43].mxu0 }
0x137e   : > { %v3351_v2 = vadd.f32 %v6110_v21, %v3350_v0 }
0x137f   : > { %v9948_v5 = vmul.f32 0.35355338, %v3356_v54 }
0x1380   : > { %v9912_v19 = vpack.i.bf16 %v3356_v54, %v3351_v2  ;;  %v9942_v27 = vmul.f32 0.35355338, %v3351_v2 }
0x1382   : > { %v7008_v11 = vpop.f32.mrb[44].mxu0  ;;  %7983 = vrot.lane.b32.xlu1 %v9912_v19, %s8635_s20 }
0x1383   : > { %v3366_v12 = vadd.f32 %v7008_v11, %v6110_v21  ;;  %v3360_v47 = vpop.f32.mrb[45].mxu0  ;;  %v6123_v11 = vld [vmem:[%s10781_s2 + $0x120] sm:$0xff] }
0x1384   : > { %v3361_v63 = vadd.f32 %v6110_v21, %v3360_v47 }
0x1385   : > { %v9956_v59 = vmul.f32 0.35355338, %v3366_v12 }
0x1386   : > { %v9916_v13 = vpack.i.bf16 %v3366_v12, %v3361_v63  ;;  %v9950_v7 = vmul.f32 0.35355338, %v3361_v63  ;;  %v6126_v12 = vld [vmem:[%s10781_s2 + $0x138] sm:$0xff] }
0x1388   : > { %7988 = vrot.lane.b32.xlu1 %v9916_v13, %s8635_s20 }
0x13a4   : > { %v7011_v9 = vpop.f32.mrb[46].mxu0 }
0x13a5   : > { %v3376_v23 = vadd.f32 %v7011_v9, %v6110_v21  ;;  %v3370_v6 = vpop.f32.mrb[47].mxu0 }
0x13a6   : > { %v3371_v55 = vadd.f32 %v6110_v21, %v3370_v6 }
0x13a7   : > { %v9964_v45 = vmul.f32 0.35355338, %v3376_v23 }
0x13a8   : > { %v9920_v15 = vpack.i.bf16 %v3376_v23, %v3371_v55  ;;  %v9958_v37 = vmul.f32 0.35355338, %v3371_v55 }
0x13aa   : > { %7993 = vrot.lane.b32.xlu1 %v9920_v15, %s8635_s20  ;;  %s10815_s20 = sshll.u32 %s10817_s28, 6 }
0x13e9   : > { %v7979_v8 = vpop.permute.xlu0 %7978 }
0x13ea   : > { %v7981_v52 = vunpack.i.h.bf16 %v7979_v8  ;;  %v7980_v1 = vunpack.i.l.bf16 %v7979_v8  ;;  %v6125_v8 = vld [vmem:[%s10781_s2 + $0x130] sm:$0xff] }
0x13ec   : > { %v7544_v53 = vpack.c.bf16 %v7981_v52, %v7980_v1 }
0x13ee   : > { %7546 = vmatprep.subr.msk.bf16.mxu0 %vm8954_vm2, %v7544_v53 }
0x13ef   : > { %7549 = vmatpush3.bf16.xpose.msk.msra.mxu0 %vm8954_vm2, %v7544_v53 }
0x13f4   : > { %v7984_v10 = vpop.permute.xlu1 %7983 }
0x13f5   : > { %v7986_v58 = vunpack.i.h.bf16 %v7984_v10  ;;  %v7985_v60 = vunpack.i.l.bf16 %v7984_v10 }
0x13f7   : > { %v7550_v62 = vpack.c.bf16 %v7986_v58, %v7985_v60 }
0x13f9   : > { %7552 = vmatprep.subr.msk.bf16.mxu0 %vm8954_vm2, %v7550_v62 }
0x13fa   : > { %v7989_v3 = vpop.permute.xlu1 %7988  ;;  %7555 = vmatpush3.bf16.xpose.msk.msra.mxu0 %vm8954_vm2, %v7550_v62 }
0x13fb   : > { %v7991_v14 = vunpack.i.h.bf16 %v7989_v3  ;;  %v7990_v40 = vunpack.i.l.bf16 %v7989_v3 }
0x13fd   : > { %v7556_v41 = vpack.c.bf16 %v7991_v14, %v7990_v40 }
0x13ff   : > { %7558 = vmatprep.subr.msk.bf16.mxu0 %vm8954_vm2, %v7556_v41 }
0x1402   : > { %7561 = vmatpush3.bf16.xpose.msk.msra.mxu0 %vm8954_vm2, %v7556_v41 }
0x141c   : > { %v7994_v26 = vpop.permute.xlu1 %7993 }
0x141d   : > { %v7996_v49 = vunpack.i.h.bf16 %v7994_v26  ;;  %v7995_v39 = vunpack.i.l.bf16 %v7994_v26 }
0x141f   : > { %v7562_v35 = vpack.c.bf16 %v7996_v49, %v7995_v39 }
0x1421   : > { %7564 = vmatprep.subr.msk.bf16.mxu0 %vm8954_vm2, %v7562_v35 }
0x1422   : > { %7567 = vmatpush3.bf16.xpose.msk.msra.mxu0 %vm8954_vm2, %v7562_v35 }
0x1429   : > { %7029 = vmatmul.mubr.msk.f32.vlgmr.msra.gmra.mrb[48].mxu0 %vm688_vm1, %v9940_v36 }
0x142a   : > { %7031 = vmatprep.mubr.msk.f32.mxu0 %vm688_vm1, %v9942_v27 }
0x142d   : > { %7032 = vmatmul.mubr.msk.f32.gmra.mrb[50].mxu0 %vm688_vm1, %v9948_v5 }
0x142e   : > { %7034 = vmatprep.mubr.msk.f32.mxu0 %vm688_vm1, %v9950_v7 }
0x1431   : > { %7035 = vmatmul.mubr.msk.f32.gmra.mrb[52].mxu0 %vm688_vm1, %v9956_v59 }
0x1432   : > { %7037 = vmatprep.mubr.msk.f32.mxu0 %vm688_vm1, %v9958_v37 }
0x1435   : > { %7038 = vmatmul.mubr.msk.f32.gmra.mrb[54].mxu0 %vm688_vm1, %v9964_v45 }
0x14fc   : > { %v7030_v25 = vpop.f32.mrb[48].mxu0 }
0x14fd   : > { %v3532_v61 = vadd.f32 %v7030_v25, %v6120_v24  ;;  %v3526_v46 = vpop.f32.mrb[49].mxu0 }
0x14fe   : > { %v3527_v42 = vadd.f32 %v6119_v57, %v3526_v46 }
0x14ff   : > { %v3568_v29 = vsel %vm834_vm3, %v3532_v61, -inf }
0x1500   : > { %3569 = vmax.xlane.f32.xlu1 %v3568_v29  ;;  %v7033_v32 = vpop.f32.mrb[50].mxu0  ;;  %v3565_v16 = vsel %vm834_vm3, %v3527_v42, -inf }
0x1501   : > { %v3542_v21 = vadd.f32 %v7033_v32, %v6122_v43  ;;  %v3536_v38 = vpop.f32.mrb[51].mxu0  ;;  %3566 = vmax.xlane.f32.xlu0 %v3565_v16 }
0x1502   : > { %v3537_v33 = vadd.f32 %v6121_v44, %v3536_v38 }
0x1503   : > { %v3574_v34 = vsel %vm834_vm3, %v3542_v21, -inf }
0x1504   : > { %v7036_v54 = vpop.f32.mrb[52].mxu0  ;;  %v3571_v23 = vsel %vm834_vm3, %v3537_v33, -inf }
0x1505   : > { %v3552_v0 = vadd.f32 %v7036_v54, %v6124_v56  ;;  %v3546_v2 = vpop.f32.mrb[53].mxu0  ;;  %3575 = vmax.xlane.f32.xlu0 %v3574_v34 }
0x1506   : > { %v3547_v63 = vadd.f32 %v6123_v11, %v3546_v2 }
0x1507   : > { %v3580_v47 = vsel %vm834_vm3, %v3552_v0, -inf }
0x1508   : > { %3581 = vmax.xlane.f32.xlu1 %v3580_v47  ;;  %v7039_v9 = vpop.f32.mrb[54].mxu0  ;;  %v3577_v53 = vsel %vm834_vm3, %v3547_v63, -inf }
0x1509   : > { %v9994_v6 = vadd.f32 %v7039_v9, %v6126_v12  ;;  %v3556_v55 = vpop.f32.mrb[55].mxu0  ;;  %3572 = vmax.xlane.f32.xlu0 %v3571_v23 }
0x150a   : > { %v10001_v1 = vadd.f32 %v6125_v8, %v3556_v55 }
0x150b   : > { %v3586_v52 = vsel %vm834_vm3, %v9994_v6, -inf }
0x150c   : > { %3587 = vmax.xlane.f32.xlu1 %v3586_v52  ;;  %v3583_v10 = vsel %vm834_vm3, %v10001_v1, -inf }
0x150d   : > { %3578 = vmax.xlane.f32.xlu0 %v3577_v53 }
0x1511   : > { %3584 = vmax.xlane.f32.xlu0 %v3583_v10 }
0x151d   : > { %8003 = vrot.lane.b32.xlu1 %v9912_v19, %s8636_s30 }
0x1521   : > { %8008 = vrot.lane.b32.xlu1 %v9916_v13, %s8636_s30 }
0x1525   : > { %8013 = vrot.lane.b32.xlu1 %v9920_v15, %s8636_s30 }
0x1527   : > { %7998 = vrot.lane.b32.xlu0 %v9904_v48, %s8636_s30  ;;  %s10814_s30 = smov 24  }
0x1529   : > { %8023 = vrot.lane.b32.xlu1 %v9912_v19, %s8637_s11 }
0x152b   : > { %8018 = vrot.lane.b32.xlu0 %v9904_v48, %s8637_s11 }
0x158d   : > { %v3570_v58 = vpop.xlane.xlu1 %3569 }
0x158e   : > { %v3590_v60 = vsub.f32 %v3532_v61, %v3570_v58  ;;  %v3567_v62 = vpop.xlane.xlu0 %3566 }
0x158f   : > { %v3589_v3 = vsub.f32 %v3527_v42, %v3567_v62 }
0x1590   : > { %v3599_v14 = vmul.f32 1.442695, %v3590_v60 }
0x1591   : > { %v3597_v40 = vmul.f32 1.442695, %v3589_v3 }
0x1592   : > { %8329 = vpow2.f32 %v3599_v14  ;;  %v3576_v41 = vpop.xlane.xlu0 %3575 }
0x1593   : > { %8331 = vpow2.f32 %v3597_v40  ;;  %v3592_v26 = vsub.f32 %v3542_v21, %v3576_v41 }
0x1595   : > { %v3603_v49 = vmul.f32 1.442695, %v3592_v26  ;;  %v3582_v39 = vpop.xlane.xlu1 %3581 }
0x1596   : > { %v3594_v35 = vsub.f32 %v3552_v0, %v3582_v39  ;;  %v3573_v24 = vpop.xlane.xlu0 %3572 }
0x1597   : > { %8333 = vpow2.f32 %v3603_v49  ;;  %v3591_v57 = vsub.f32 %v3537_v33, %v3573_v24 }
0x1598   : > { %v3607_v25 = vmul.f32 1.442695, %v3594_v35 }
0x1599   : > { %v3601_v46 = vmul.f32 1.442695, %v3591_v57  ;;  %v3588_v43 = vpop.xlane.xlu1 %3587 }
0x159a   : > { %v3579_v29 = vpop.xlane.xlu0 %3578  ;;  %v3596_v24 = vsub.f32 %v9994_v6, %v3588_v43 }
0x159b   : > { %8335 = vpow2.f32 %v3601_v46  ;;  %v3593_v61 = vsub.f32 %v3547_v63, %v3579_v29 }
0x159c   : > { %v10018_v32 = vpop.eup %8329  ;;  %8337 = vpow2.f32 %v3607_v25  ;;  %v3611_v57 = vmul.f32 1.442695, %v3596_v24 }
0x159d   : > { %v10020_v42 = vpop.eup %8331  ;;  %v3605_v16 = vmul.f32 1.442695, %v3593_v61  ;;  %v8004_v38 = vpop.permute.xlu1 %8003  ;;  %v3616_v21 = vsel %vm834_vm3, %v10018_v32, 0.0 }
0x159e   : > { %3617 = vadd.xlane.f32.xlu1 %v3616_v21  ;;  %v3585_v44 = vpop.xlane.xlu0 %3584  ;;  %v3613_v56 = vsel %vm834_vm3, %v10020_v42, 0.0  ;;  %v8006_v2 = vunpack.i.h.bf16 %v8004_v38  ;;  %v8005_v11 = vunpack.i.l.bf16 %v8004_v38 }
0x159f   : > { %3614 = vadd.xlane.f32.xlu0 %v3613_v56  ;;  %8339 = vpow2.f32 %v3605_v16  ;;  %v3595_v25 = vsub.f32 %v10001_v1, %v3585_v44 }
0x15a0   : > { %v7572_v53 = vpack.c.bf16 %v8006_v2, %v8005_v11  ;;  %8341 = vpow2.f32 %v3611_v57 }
0x15a1   : > { %v10026_v34 = vpop.eup %8333  ;;  %v8009_v33 = vpop.permute.xlu1 %8008  ;;  %v3609_v46 = vmul.f32 1.442695, %v3595_v25 }
0x15a2   : > { %v7999_v54 = vpop.permute.xlu0 %7998  ;;  %v3622_v0 = vsel %vm834_vm3, %v10026_v34, 0.0  ;;  %v8011_v8 = vunpack.i.h.bf16 %v8009_v33  ;;  %v8010_v52 = vunpack.i.l.bf16 %v8009_v33 }
0x15a3   : > { %v8001_v12 = vunpack.i.h.bf16 %v7999_v54  ;;  %v8000_v47 = vunpack.i.l.bf16 %v7999_v54  ;;  %3623 = vadd.xlane.f32.xlu1 %v3622_v0  ;;  %8343 = vpow2.f32 %v3609_v46 }
0x15a4   : > { %v7576_v14 = vpack.c.bf16 %v8011_v8, %v8010_v52 }
0x15a5   : > { %v10030_v63 = vpop.eup %8335  ;;  %v7568_v9 = vpack.c.bf16 %v8001_v12, %v8000_v47  ;;  %v8014_v10 = vpop.permute.xlu1 %8013 }
0x15a6   : > { %v3619_v23 = vsel %vm834_vm3, %v10030_v63, 0.0  ;;  %v10034_v55 = vpop.eup %8337  ;;  %v8016_v62 = vunpack.i.h.bf16 %v8014_v10  ;;  %v8015_v3 = vunpack.i.l.bf16 %v8014_v10  ;;  %v8019_v40 = vpop.permute.xlu0 %8018 }
0x15a7   : > { %3620 = vadd.xlane.f32.xlu0 %v3619_v23  ;;  %7569 = vmatprep.subr.bf16.mxu1 %v7568_v9  ;;  %v3628_v58 = vsel %vm834_vm3, %v10034_v55, 0.0  ;;  %v8021_v26 = vunpack.i.h.bf16 %v8019_v40  ;;  %v8020_v49 = vunpack.i.l.bf16 %v8019_v40 }
0x15a8   : > { %7571 = vmatpush3.bf16.msra.mxu1 %v7568_v9  ;;  %v7580_v39 = vpack.c.bf16 %v8016_v62, %v8015_v3 }
0x15a9   : > { %7573 = vmatprep.subr.bf16.mxu1 %v7572_v53  ;;  %v10038_v60 = vpop.eup %8339  ;;  %v7584_v35 = vpack.c.bf16 %v8021_v26, %v8020_v49  ;;  %v8024_v61 = vpop.permute.xlu1 %8023 }
0x15aa   : > { %v3625_v41 = vsel %vm834_vm3, %v10038_v60, 0.0  ;;  %v10056_v29 = vpop.eup %8341  ;;  %v8026_v54 = vunpack.i.h.bf16 %v8024_v61  ;;  %v8025_v0 = vunpack.i.l.bf16 %v8024_v61 }
0x15ab   : > { %3629 = vadd.xlane.f32.xlu0 %v3628_v58  ;;  %v3634_v6 = vsel %vm834_vm3, %v10056_v29, 0.0 }
0x15ac   : > { %7575 = vmatpush3.bf16.msra.mxu1 %v7572_v53  ;;  %v7590_v47 = vpack.c.bf16 %v8026_v54, %v8025_v0 }
0x15ad   : > { %7577 = vmatprep.subr.bf16.mxu1 %v7576_v14  ;;  %v10062_v1 = vpop.eup %8343 }
0x15ae   : > { %v3631_v43 = vsel %vm834_vm3, %v10062_v1, 0.0 }
0x15af   : > { %3626 = vadd.xlane.f32.xlu0 %v3625_v41 }
0x15b0   : > { %7579 = vmatpush3.bf16.msra.mxu1 %v7576_v14 }
0x15b1   : > { %7581 = vmatprep.subr.bf16.mxu1 %v7580_v39 }
0x15b4   : > { %8033 = vrot.lane.b32.xlu1 %v9920_v15, %s8637_s11  ;;  %7583 = vmatpush3.bf16.msra.mxu1 %v7580_v39 }
0x15b5   : > { %7586 = vmatprep.subr.msk.bf16.mxu1 %vm8954_vm2, %v7584_v35 }
0x15c5   : > { %8028 = vrot.lane.b32.xlu0 %v9916_v13, %s8637_s11 }
0x15c9   : > { %3831 = vrot.lane.b32.xlu0 %v9906_v4, %s8638_s21 }
0x15cd   : > { %3835 = vrot.lane.b32.xlu0 %v9942_v27, %s8638_s21 }
0x15d1   : > { %3839 = vrot.lane.b32.xlu0 %v9950_v7, %s8638_s21 }
0x15d5   : > { %3843 = vrot.lane.b32.xlu0 %v9958_v37, %s8638_s21 }
0x15d8   : > { %3635 = vadd.xlane.f32.xlu1 %v3634_v6 }
0x15dc   : > { %3632 = vadd.xlane.f32.xlu1 %v3631_v43 }
0x15ed   : > { %3833 = vrot.lane.b32.xlu1 %v9940_v36, %s8638_s21 }
0x15f1   : > { %3837 = vrot.lane.b32.xlu1 %v9948_v5, %s8638_s21 }
0x15f5   : > { %3841 = vrot.lane.b32.xlu1 %v9956_v59, %s8638_s21 }
0x15f9   : > { %3845 = vrot.lane.b32.xlu1 %v9964_v45, %s8638_s21 }
0x162b   : > { %v3618_v16 = vpop.xlane.xlu1 %3617 }
0x162c   : > { %8345 = vrcp.f32 %v3618_v16  ;;  %v3615_v38 = vpop.xlane.xlu0 %3614 }
0x162d   : > { %8347 = vrcp.f32 %v3615_v38 }
0x1630   : > { %v3624_v21 = vpop.xlane.xlu1 %3623 }
0x1631   : > { %8349 = vrcp.f32 %v3624_v21 }
0x1634   : > { %v3621_v44 = vpop.xlane.xlu0 %3620  ;;  %v8034_v62 = vpop.permute.xlu1 %8033 }
0x1635   : > { %8351 = vrcp.f32 %v3621_v44  ;;  %v8036_v40 = vunpack.i.h.bf16 %v8034_v62 }
0x1636   : > { %v8346_v56 = vpop.eup %8345 }
0x1637   : > { %v8348_v33 = vpop.eup %8347  ;;  %v3654_v12 = vmul.f32 %v8346_v56, %v10018_v32 }
0x1638   : > { %v3630_v2 = vpop.xlane.xlu0 %3629  ;;  %v3653_v11 = vmul.f32 %v8348_v33, %v10020_v42 }
0x1639   : > { %8353 = vrcp.f32 %v3630_v2  ;;  %v6152_v2 = vld [vmem:[%s10781_s2 + $0x148] sm:$0xff] }
0x163a   : > { %7056 = vmatprep.mubr.msk.f32.mxu1 %vm834_vm3, %v3653_v11  ;;  %v6151_v11 = vld [vmem:[%s10781_s2 + $0x140] sm:$0xff] }
0x163b   : > { %7057 = vmatmul.mubr.msk.f32.vlgmr.msra.gmra.mrb[56].mxu1 %vm834_vm3, %v3654_v12  ;;  %v8350_v23 = vpop.eup %8349 }
0x163c   : > { %7589 = vmatpush3.bf16.xpose.msk.msra.mxu1 %vm8954_vm2, %v7584_v35  ;;  %v3627_v9 = vpop.xlane.xlu0 %3626  ;;  %v3656_v10 = vmul.f32 %v8350_v23, %v10026_v34 }
0x163d   : > { %8355 = vrcp.f32 %v3627_v9  ;;  %7592 = vmatprep.subr.msk.bf16.mxu1 %vm8954_vm2, %v7590_v47 }
0x163f   : > { %v8352_v8 = vpop.eup %8351 }
0x1640   : > { %v8029_v52 = vpop.permute.xlu0 %8028  ;;  %v3655_v42 = vmul.f32 %v8352_v8, %v10030_v63  ;;  %v8035_v63 = vunpack.i.l.bf16 %v8034_v62  ;;  %v6154_v8 = vld [vmem:[%s10781_s2 + $0x158] sm:$0xff]  ;;  %v6156_v62 = vld [vmem:[%s10781_s2 + $0x168] sm:$0xff] }
0x1641   : > { %v8031_v32 = vunpack.i.h.bf16 %v8029_v52  ;;  %v8030_v53 = vunpack.i.l.bf16 %v8029_v52 }
0x1642   : > { %7059 = vmatprep.mubr.msk.f32.mxu1 %vm834_vm3, %v3655_v42  ;;  %v7602_v26 = vpack.c.bf16 %v8036_v40, %v8035_v63 }
0x1643   : > { %v7596_v58 = vpack.c.bf16 %v8031_v32, %v8030_v53  ;;  %7060 = vmatmul.mubr.msk.f32.gmra.mrb[58].mxu1 %vm834_vm3, %v3656_v10  ;;  %v8354_v3 = vpop.eup %8353 }
0x1644   : > { %7595 = vmatpush3.bf16.xpose.msk.msra.mxu1 %vm8954_vm2, %v7590_v47  ;;  %v3658_v34 = vmul.f32 %v8354_v3, %v10034_v55 }
0x1645   : > { %7598 = vmatprep.subr.msk.bf16.mxu1 %vm8954_vm2, %v7596_v58 }
0x1647   : > { %v8356_v14 = vpop.eup %8355 }
0x1648   : > { %v3657_v41 = vmul.f32 %v8356_v14, %v10038_v60  ;;  %v3832_v60 = vpop.permute.xlu0 %3831 }
0x164a   : > { %7062 = vmatprep.mubr.msk.f32.mxu1 %vm834_vm3, %v3657_v41 }
0x164b   : > { %7063 = vmatmul.mubr.msk.f32.gmra.mrb[60].mxu1 %vm834_vm3, %v3658_v34  ;;  %v6155_v34 = vld [vmem:[%s10781_s2 + $0x160] sm:$0xff] }
0x164c   : > { %7601 = vmatpush3.bf16.xpose.msk.msra.mxu1 %vm8954_vm2, %v7596_v58  ;;  %v3836_v46 = vpop.permute.xlu0 %3835  ;;  %v6153_v58 = vld [vmem:[%s10781_s2 + $0x150] sm:$0xff] }
0x164d   : > { %7604 = vmatprep.subr.msk.bf16.mxu1 %vm8954_vm2, %v7602_v26 }
0x1650   : > { %v3840_v43 = vpop.permute.xlu0 %3839 }
0x1654   : > { %7607 = vmatpush3.bf16.xpose.msk.msra.mxu1 %vm8954_vm2, %v7602_v26  ;;  %v6158_v26 = vld [vmem:[%s10781_s2 + $0x178] sm:$0xff] }
0x1665   : > { %v3636_v49 = vpop.xlane.xlu1 %3635 }
0x1666   : > { %8357 = vrcp.f32 %v3636_v49 }
0x1669   : > { %v3633_v39 = vpop.xlane.xlu1 %3632 }
0x166a   : > { %8359 = vrcp.f32 %v3633_v39 }
0x166d   : > { %v3834_v24 = vpop.permute.xlu1 %3833 }
0x1670   : > { %v8358_v55 = vpop.eup %8357 }
0x1671   : > { %v3660_v25 = vmul.f32 %v8358_v55, %v10056_v29  ;;  %v3838_v6 = vpop.permute.xlu1 %3837 }
0x1674   : > { %v8360_v35 = vpop.eup %8359 }
0x1675   : > { %v3659_v57 = vmul.f32 %v8360_v35, %v10062_v1  ;;  %v3842_v61 = vpop.permute.xlu1 %3841  ;;  %v3844_v1 = vpop.permute.xlu0 %3843 }
0x1677   : > { %7065 = vmatprep.mubr.msk.f32.mxu1 %vm834_vm3, %v3659_v57  ;;  %v6157_v57 = vld [vmem:[%s10781_s2 + $0x170] sm:$0xff] }
0x1678   : > { %7066 = vmatmul.mubr.msk.f32.gmra.mrb[62].mxu1 %vm834_vm3, %v3660_v25 }
0x1679   : > { %7084 = vmatprep.mubr.msk.f32.mxu1 %vm688_vm1, %v3832_v60  ;;  %v3846_v29 = vpop.permute.xlu1 %3845 }
0x167c   : > { %7085 = vmatmul.mubr.msk.f32.vlgmr.msra.gmra.mrb[64].mxu1 %vm688_vm1, %v3834_v24 }
0x167d   : > { %7087 = vmatprep.mubr.msk.f32.mxu1 %vm688_vm1, %v3836_v46 }
0x1680   : > { %7088 = vmatmul.mubr.msk.f32.gmra.mrb[66].mxu1 %vm688_vm1, %v3838_v6 }
0x1681   : > { %7090 = vmatprep.mubr.msk.f32.mxu1 %vm688_vm1, %v3840_v43 }
0x1684   : > { %7091 = vmatmul.mubr.msk.f32.gmra.mrb[68].mxu1 %vm688_vm1, %v3842_v61 }
0x1685   : > { %7093 = vmatprep.mubr.msk.f32.mxu1 %vm688_vm1, %v3844_v1 }
0x1688   : > { %7094 = vmatmul.mubr.msk.f32.gmra.mrb[70].mxu1 %vm688_vm1, %v3846_v29 }
0x170e   : > { %v7058_v16 = vpop.f32.mrb[56].mxu1 }
0x170f   : > { %3815 = vst.msk [vmem:[#allocation2 + $0x8] sm:$0xff] %vm688_vm1, %v7058_v16  ;;  %v3775_v38 = vpop.f32.mrb[57].mxu1 }
0x1710   : > { %3814 = vst.msk [vmem:[#allocation2] sm:$0xff] %vm688_vm1, %v3775_v38 }
0x1716   : > { %v7061_v21 = vpop.f32.mrb[58].mxu1 }
0x1717   : > { %3817 = vst.msk [vmem:[#allocation2 + $0x18] sm:$0xff] %vm688_vm1, %v7061_v21  ;;  %v3785_v44 = vpop.f32.mrb[59].mxu1 }
0x1718   : > { %3816 = vst.msk [vmem:[#allocation2 + $0x10] sm:$0xff] %vm688_vm1, %v3785_v44 }
0x171e   : > { %v7064_v56 = vpop.f32.mrb[60].mxu1 }
0x171f   : > { %3819 = vst.msk [vmem:[#allocation2 + $0x28] sm:$0xff] %vm688_vm1, %v7064_v56  ;;  %v3795_v33 = vpop.f32.mrb[61].mxu1 }
0x1720   : > { %3818 = vst.msk [vmem:[#allocation2 + $0x20] sm:$0xff] %vm688_vm1, %v3795_v33 }
0x174b   : > { %v7067_v54 = vpop.f32.mrb[62].mxu1 }
0x174c   : > { %3821 = vst.msk [vmem:[#allocation2 + $0x38] sm:$0xff] %vm688_vm1, %v7067_v54  ;;  %v3805_v0 = vpop.f32.mrb[63].mxu1 }
0x174d   : > { %3820 = vst.msk [vmem:[#allocation2 + $0x30] sm:$0xff] %vm688_vm1, %v3805_v0 }
0x174f   : > { %v7086_v12 = vpop.f32.mrb[64].mxu1 }
0x1750   : > { %v3967_v47 = vadd.f32 %v7086_v12, %v6152_v2  ;;  %v3961_v9 = vpop.f32.mrb[65].mxu1 }
0x1751   : > { %v3962_v23 = vadd.f32 %v6151_v11, %v3961_v9 }
0x1752   : > { %v4003_v52 = vsel %vm834_vm3, %v3967_v47, -inf }
0x1753   : > { %4004 = vmax.xlane.f32.xlu1 %v4003_v52  ;;  %v7089_v42 = vpop.f32.mrb[66].mxu1  ;;  %v4000_v32 = vsel %vm834_vm3, %v3962_v23, -inf }
0x1754   : > { %v3977_v53 = vadd.f32 %v7089_v42, %v6154_v8  ;;  %v3971_v10 = vpop.f32.mrb[67].mxu1  ;;  %4001 = vmax.xlane.f32.xlu0 %v4000_v32 }
0x1755   : > { %v3972_v14 = vadd.f32 %v6153_v58, %v3971_v10 }
0x1756   : > { %v4009_v3 = vsel %vm834_vm3, %v3977_v53, -inf }
0x1757   : > { %v7092_v40 = vpop.f32.mrb[68].mxu1  ;;  %v4006_v55 = vsel %vm834_vm3, %v3972_v14, -inf }
0x1758   : > { %v3987_v63 = vadd.f32 %v7092_v40, %v6156_v62  ;;  %v3981_v41 = vpop.f32.mrb[69].mxu1  ;;  %4010 = vmax.xlane.f32.xlu0 %v4009_v3 }
0x1759   : > { %v3982_v39 = vadd.f32 %v6155_v34, %v3981_v41 }
0x175a   : > { %v4015_v49 = vsel %vm834_vm3, %v3987_v63, -inf }
0x175b   : > { %4016 = vmax.xlane.f32.xlu1 %v4015_v49  ;;  %v7095_v60 = vpop.f32.mrb[70].mxu1  ;;  %v4012_v6 = vsel %vm834_vm3, %v3982_v39, -inf }
0x175c   : > { %v10146_v35 = vadd.f32 %v7095_v60, %v6158_v26  ;;  %v3991_v24 = vpop.f32.mrb[71].mxu1  ;;  %4007 = vmax.xlane.f32.xlu0 %v4006_v55 }
0x175d   : > { %v10153_v46 = vadd.f32 %v6157_v57, %v3991_v24 }
0x175e   : > { %v4021_v25 = vsel %vm834_vm3, %v10146_v35, -inf }
0x175f   : > { %4022 = vmax.xlane.f32.xlu1 %v4021_v25  ;;  %v4018_v43 = vsel %vm834_vm3, %v10153_v46, -inf }
0x1760   : > { %4013 = vmax.xlane.f32.xlu0 %v4012_v6 }
0x1764   : > { %4019 = vmax.xlane.f32.xlu0 %v4018_v43 }
0x1770   : > { %8043 = vrot.lane.b32.xlu1 %v9912_v19, %s8639_s24 }
0x1774   : > { %8048 = vrot.lane.b32.xlu1 %v9916_v13, %s8639_s24 }
0x1778   : > { %8053 = vrot.lane.b32.xlu1 %v9920_v15, %s8639_s24 }
0x177a   : > { %8038 = vrot.lane.b32.xlu0 %v9904_v48, %s8639_s24 }
0x177c   : > { %8063 = vrot.lane.b32.xlu1 %v9912_v19, %s8640_s25 }
0x177e   : > { %8058 = vrot.lane.b32.xlu0 %v9904_v48, %s8640_s25 }
0x17e0   : > { %v4005_v61 = vpop.xlane.xlu1 %4004 }
0x17e1   : > { %v4025_v1 = vsub.f32 %v3967_v47, %v4005_v61  ;;  %v4002_v29 = vpop.xlane.xlu0 %4001 }
0x17e2   : > { %v4024_v16 = vsub.f32 %v3962_v23, %v4002_v29 }
0x17e3   : > { %v4034_v38 = vmul.f32 1.442695, %v4025_v1 }
0x17e4   : > { %v4032_v21 = vmul.f32 1.442695, %v4024_v16 }
0x17e5   : > { %8361 = vpow2.f32 %v4034_v38  ;;  %v4011_v44 = vpop.xlane.xlu0 %4010 }
0x17e6   : > { %8363 = vpow2.f32 %v4032_v21  ;;  %v4027_v56 = vsub.f32 %v3977_v53, %v4011_v44 }
0x17e8   : > { %v4038_v33 = vmul.f32 1.442695, %v4027_v56  ;;  %v4017_v54 = vpop.xlane.xlu1 %4016 }
0x17e9   : > { %v4029_v0 = vsub.f32 %v3987_v63, %v4017_v54  ;;  %v4008_v2 = vpop.xlane.xlu0 %4007 }
0x17ea   : > { %8365 = vpow2.f32 %v4038_v33  ;;  %v4026_v11 = vsub.f32 %v3972_v14, %v4008_v2 }
0x17eb   : > { %v4042_v12 = vmul.f32 1.442695, %v4029_v0 }
0x17ec   : > { %v4036_v9 = vmul.f32 1.442695, %v4026_v11  ;;  %v4023_v8 = vpop.xlane.xlu1 %4022 }
0x17ed   : > { %v4014_v52 = vpop.xlane.xlu0 %4013  ;;  %v4031_v2 = vsub.f32 %v10146_v35, %v4023_v8 }
0x17ee   : > { %8367 = vpow2.f32 %v4036_v9  ;;  %v4028_v47 = vsub.f32 %v3982_v39, %v4014_v52 }
0x17ef   : > { %v10170_v42 = vpop.eup %8361  ;;  %8369 = vpow2.f32 %v4042_v12  ;;  %v4046_v11 = vmul.f32 1.442695, %v4031_v2 }
0x17f0   : > { %v10172_v23 = vpop.eup %8363  ;;  %v4040_v32 = vmul.f32 1.442695, %v4028_v47  ;;  %v8044_v10 = vpop.permute.xlu1 %8043  ;;  %v4051_v53 = vsel %vm834_vm3, %v10170_v42, 0.0 }
0x17f1   : > { %4052 = vadd.xlane.f32.xlu1 %v4051_v53  ;;  %v4020_v58 = vpop.xlane.xlu0 %4019  ;;  %v4048_v62 = vsel %vm834_vm3, %v10172_v23, 0.0  ;;  %v8046_v41 = vunpack.i.h.bf16 %v8044_v10  ;;  %v8045_v34 = vunpack.i.l.bf16 %v8044_v10 }
0x17f2   : > { %4049 = vadd.xlane.f32.xlu0 %v4048_v62  ;;  %8371 = vpow2.f32 %v4040_v32  ;;  %v4030_v12 = vsub.f32 %v10153_v46, %v4020_v58 }
0x17f3   : > { %v7612_v6 = vpack.c.bf16 %v8046_v41, %v8045_v34  ;;  %8373 = vpow2.f32 %v4046_v11 }
0x17f4   : > { %v10178_v3 = vpop.eup %8365  ;;  %v8049_v14 = vpop.permute.xlu1 %8048  ;;  %v4044_v9 = vmul.f32 1.442695, %v4030_v12 }
0x17f5   : > { %v8039_v40 = vpop.permute.xlu0 %8038  ;;  %v4057_v63 = vsel %vm834_vm3, %v10178_v3, 0.0  ;;  %v8051_v57 = vunpack.i.h.bf16 %v8049_v14  ;;  %v8050_v25 = vunpack.i.l.bf16 %v8049_v14 }
0x17f6   : > { %v8041_v26 = vunpack.i.h.bf16 %v8039_v40  ;;  %v8040_v49 = vunpack.i.l.bf16 %v8039_v40  ;;  %4058 = vadd.xlane.f32.xlu1 %v4057_v63  ;;  %8375 = vpow2.f32 %v4044_v9 }
0x17f7   : > { %v7616_v38 = vpack.c.bf16 %v8051_v57, %v8050_v25 }
0x17f8   : > { %v10182_v39 = vpop.eup %8367  ;;  %v7608_v60 = vpack.c.bf16 %v8041_v26, %v8040_v49  ;;  %v8054_v43 = vpop.permute.xlu1 %8053 }
0x17f9   : > { %v4054_v55 = vsel %vm834_vm3, %v10182_v39, 0.0  ;;  %v10186_v24 = vpop.eup %8369  ;;  %v8056_v29 = vunpack.i.h.bf16 %v8054_v43  ;;  %v8055_v16 = vunpack.i.l.bf16 %v8054_v43  ;;  %v8059_v21 = vpop.permute.xlu0 %8058 }
0x17fa   : > { %4055 = vadd.xlane.f32.xlu0 %v4054_v55  ;;  %7609 = vmatprep.subr.bf16.mxu0 %v7608_v60  ;;  %v4063_v61 = vsel %vm834_vm3, %v10186_v24, 0.0  ;;  %v8061_v56 = vunpack.i.h.bf16 %v8059_v21  ;;  %v8060_v33 = vunpack.i.l.bf16 %v8059_v21 }
0x17fb   : > { %7611 = vmatpush3.bf16.msra.mxu0 %v7608_v60  ;;  %v7620_v54 = vpack.c.bf16 %v8056_v29, %v8055_v16 }
0x17fc   : > { %7613 = vmatprep.subr.bf16.mxu0 %v7612_v6  ;;  %v10190_v1 = vpop.eup %8371  ;;  %v7624_v0 = vpack.c.bf16 %v8061_v56, %v8060_v33  ;;  %v8064_v47 = vpop.permute.xlu1 %8063 }
0x17fd   : > { %v4060_v44 = vsel %vm834_vm3, %v10190_v1, 0.0  ;;  %v10208_v52 = vpop.eup %8373  ;;  %v8066_v40 = vunpack.i.h.bf16 %v8064_v47  ;;  %v8065_v63 = vunpack.i.l.bf16 %v8064_v47 }
0x17fe   : > { %4064 = vadd.xlane.f32.xlu0 %v4063_v61  ;;  %v4069_v35 = vsel %vm834_vm3, %v10208_v52, 0.0 }
0x17ff   : > { %7615 = vmatpush3.bf16.msra.mxu0 %v7612_v6  ;;  %v7630_v49 = vpack.c.bf16 %v8066_v40, %v8065_v63 }
0x1800   : > { %7617 = vmatprep.subr.bf16.mxu0 %v7616_v38  ;;  %v10214_v46 = vpop.eup %8375 }
0x1801   : > { %v4066_v8 = vsel %vm834_vm3, %v10214_v46, 0.0 }
0x1802   : > { %4061 = vadd.xlane.f32.xlu0 %v4060_v44 }
0x1803   : > { %7619 = vmatpush3.bf16.msra.mxu0 %v7616_v38 }
0x1804   : > { %7621 = vmatprep.subr.bf16.mxu0 %v7620_v54 }
0x1807   : > { %8073 = vrot.lane.b32.xlu1 %v9920_v15, %s8640_s25  ;;  %7623 = vmatpush3.bf16.msra.mxu0 %v7620_v54 }
0x1808   : > { %7626 = vmatprep.subr.msk.bf16.mxu0 %vm8954_vm2, %v7624_v0 }
0x1818   : > { %8068 = vrot.lane.b32.xlu0 %v9916_v13, %s8640_s25 }
0x181c   : > { %4298 = vrot.lane.b32.xlu0 %v9906_v4, %s8641_s10 }
0x1820   : > { %4302 = vrot.lane.b32.xlu0 %v9942_v27, %s8641_s10 }
0x1824   : > { %4306 = vrot.lane.b32.xlu0 %v9950_v7, %s8641_s10 }
0x1828   : > { %4310 = vrot.lane.b32.xlu0 %v9958_v37, %s8641_s10 }
0x182b   : > { %4070 = vadd.xlane.f32.xlu1 %v4069_v35 }
0x182f   : > { %4067 = vadd.xlane.f32.xlu1 %v4066_v8 }
0x1840   : > { %4300 = vrot.lane.b32.xlu1 %v9940_v36, %s8641_s10 }
0x1844   : > { %4304 = vrot.lane.b32.xlu1 %v9948_v5, %s8641_s10 }
0x1848   : > { %4308 = vrot.lane.b32.xlu1 %v9956_v59, %s8641_s10 }
0x184c   : > { %4312 = vrot.lane.b32.xlu1 %v9964_v45, %s8641_s10 }
0x187e   : > { %v4053_v32 = vpop.xlane.xlu1 %4052 }
0x187f   : > { %8377 = vrcp.f32 %v4053_v32  ;;  %v4050_v10 = vpop.xlane.xlu0 %4049 }
0x1880   : > { %8379 = vrcp.f32 %v4050_v10 }
0x1883   : > { %v4059_v53 = vpop.xlane.xlu1 %4058 }
0x1884   : > { %8381 = vrcp.f32 %v4059_v53 }
0x1887   : > { %v4056_v58 = vpop.xlane.xlu0 %4055  ;;  %v8074_v29 = vpop.permute.xlu1 %8073 }
0x1888   : > { %8383 = vrcp.f32 %v4056_v58  ;;  %v8076_v21 = vunpack.i.h.bf16 %v8074_v29 }
0x1889   : > { %v8378_v62 = vpop.eup %8377 }
0x188a   : > { %v8380_v14 = vpop.eup %8379  ;;  %v4089_v26 = vmul.f32 %v8378_v62, %v10170_v42 }
0x188b   : > { %v4065_v41 = vpop.xlane.xlu0 %4064  ;;  %v4088_v34 = vmul.f32 %v8380_v14, %v10172_v23 }
0x188c   : > { %8385 = vrcp.f32 %v4065_v41  ;;  %v6184_v41 = vld [vmem:[%s10781_s2 + $0x188] sm:$0xff] }
0x188d   : > { %7112 = vmatprep.mubr.msk.f32.mxu0 %vm834_vm3, %v4088_v34  ;;  %v6183_v34 = vld [vmem:[%s10781_s2 + $0x180] sm:$0xff] }
0x188e   : > { %7113 = vmatmul.mubr.msk.f32.vlgmr.msra.gmra.mrb[56].mxu0 %vm834_vm3, %v4089_v26  ;;  %v8382_v55 = vpop.eup %8381 }
0x188f   : > { %7629 = vmatpush3.bf16.xpose.msk.msra.mxu0 %vm8954_vm2, %v7624_v0  ;;  %v4062_v60 = vpop.xlane.xlu0 %4061  ;;  %v4091_v43 = vmul.f32 %v8382_v55, %v10178_v3 }
0x1890   : > { %8387 = vrcp.f32 %v4062_v60  ;;  %7632 = vmatprep.subr.msk.bf16.mxu0 %vm8954_vm2, %v7630_v49 }
0x1892   : > { %v8384_v57 = vpop.eup %8383 }
0x1893   : > { %v8069_v25 = vpop.permute.xlu0 %8068  ;;  %v4090_v23 = vmul.f32 %v8384_v57, %v10182_v39  ;;  %v8075_v39 = vunpack.i.l.bf16 %v8074_v29  ;;  %v6186_v57 = vld [vmem:[%s10781_s2 + $0x198] sm:$0xff]  ;;  %v6188_v29 = vld [vmem:[%s10781_s2 + $0x1a8] sm:$0xff] }
0x1894   : > { %v8071_v42 = vunpack.i.h.bf16 %v8069_v25  ;;  %v8070_v6 = vunpack.i.l.bf16 %v8069_v25 }
0x1895   : > { %7115 = vmatprep.mubr.msk.f32.mxu0 %vm834_vm3, %v4090_v23  ;;  %v7642_v56 = vpack.c.bf16 %v8076_v21, %v8075_v39 }
0x1896   : > { %v7636_v61 = vpack.c.bf16 %v8071_v42, %v8070_v6  ;;  %7116 = vmatmul.mubr.msk.f32.gmra.mrb[58].mxu0 %vm834_vm3, %v4091_v43  ;;  %v8386_v16 = vpop.eup %8385 }
0x1897   : > { %7635 = vmatpush3.bf16.xpose.msk.msra.mxu0 %vm8954_vm2, %v7630_v49  ;;  %v4093_v3 = vmul.f32 %v8386_v16, %v10186_v24 }
0x1898   : > { %7638 = vmatprep.subr.msk.bf16.mxu0 %vm8954_vm2, %v7636_v61 }
0x189a   : > { %v8388_v38 = vpop.eup %8387 }
0x189b   : > { %v4092_v44 = vmul.f32 %v8388_v38, %v10190_v1  ;;  %v4299_v1 = vpop.permute.xlu0 %4298 }
0x189d   : > { %7118 = vmatprep.mubr.msk.f32.mxu0 %vm834_vm3, %v4092_v44 }
0x189e   : > { %7119 = vmatmul.mubr.msk.f32.gmra.mrb[60].mxu0 %vm834_vm3, %v4093_v3  ;;  %v6187_v3 = vld [vmem:[%s10781_s2 + $0x1a0] sm:$0xff] }
0x189f   : > { %7641 = vmatpush3.bf16.xpose.msk.msra.mxu0 %vm8954_vm2, %v7636_v61  ;;  %v4303_v9 = vpop.permute.xlu0 %4302  ;;  %v6185_v61 = vld [vmem:[%s10781_s2 + $0x190] sm:$0xff] }
0x18a0   : > { %7644 = vmatprep.subr.msk.bf16.mxu0 %vm8954_vm2, %v7642_v56 }
0x18a3   : > { %v4307_v8 = vpop.permute.xlu0 %4306 }
0x18a7   : > { %7647 = vmatpush3.bf16.xpose.msk.msra.mxu0 %vm8954_vm2, %v7642_v56  ;;  %v6190_v56 = vld [vmem:[%s10781_s2 + $0x1b8] sm:$0xff] }
0x18b8   : > { %v4071_v33 = vpop.xlane.xlu1 %4070 }
0x18b9   : > { %8389 = vrcp.f32 %v4071_v33 }
0x18bc   : > { %v4068_v54 = vpop.xlane.xlu1 %4067 }
0x18bd   : > { %8391 = vrcp.f32 %v4068_v54 }
0x18c0   : > { %v4301_v2 = vpop.permute.xlu1 %4300 }
0x18c3   : > { %v8390_v24 = vpop.eup %8389 }
0x18c4   : > { %v4095_v12 = vmul.f32 %v8390_v24, %v10208_v52  ;;  %v4305_v35 = vpop.permute.xlu1 %4304 }
0x18c7   : > { %v8392_v0 = vpop.eup %8391 }
0x18c8   : > { %v4094_v11 = vmul.f32 %v8392_v0, %v10214_v46  ;;  %v4309_v47 = vpop.permute.xlu1 %4308  ;;  %v4311_v46 = vpop.permute.xlu0 %4310 }
0x18ca   : > { %7121 = vmatprep.mubr.msk.f32.mxu0 %vm834_vm3, %v4094_v11  ;;  %v6189_v11 = vld [vmem:[%s10781_s2 + $0x1b0] sm:$0xff] }
0x18cb   : > { %7122 = vmatmul.mubr.msk.f32.gmra.mrb[62].mxu0 %vm834_vm3, %v4095_v12 }
0x18cc   : > { %7140 = vmatprep.mubr.msk.f32.mxu0 %vm688_vm1, %v4299_v1  ;;  %v4313_v52 = vpop.permute.xlu1 %4312 }
0x18cf   : > { %7141 = vmatmul.mubr.msk.f32.vlgmr.msra.gmra.mrb[64].mxu0 %vm688_vm1, %v4301_v2 }
0x18d0   : > { %7143 = vmatprep.mubr.msk.f32.mxu0 %vm688_vm1, %v4303_v9 }
0x18d3   : > { %7144 = vmatmul.mubr.msk.f32.gmra.mrb[66].mxu0 %vm688_vm1, %v4305_v35 }
0x18d4   : > { %7146 = vmatprep.mubr.msk.f32.mxu0 %vm688_vm1, %v4307_v8 }
0x18d7   : > { %7147 = vmatmul.mubr.msk.f32.gmra.mrb[68].mxu0 %vm688_vm1, %v4309_v47 }
0x18d8   : > { %7149 = vmatprep.mubr.msk.f32.mxu0 %vm688_vm1, %v4311_v46 }
0x18db   : > { %7150 = vmatmul.mubr.msk.f32.gmra.mrb[70].mxu0 %vm688_vm1, %v4313_v52 }
0x1961   : > { %v10264_v32 = vpop.f32.mrb[56].mxu0 }
0x1962   : > { %v10266_v10 = vpop.f32.mrb[57].mxu0 }
0x1969   : > { %v10268_v53 = vpop.f32.mrb[58].mxu0 }
0x196a   : > { %v10270_v58 = vpop.f32.mrb[59].mxu0 }
0x1971   : > { %v10272_v62 = vpop.f32.mrb[60].mxu0 }
0x1972   : > { %v10274_v14 = vpop.f32.mrb[61].mxu0 }
0x199e   : > { %v10276_v40 = vpop.f32.mrb[62].mxu0 }
0x199f   : > { %v10278_v63 = vpop.f32.mrb[63].mxu0 }
0x19a2   : > { %v7142_v26 = vpop.f32.mrb[64].mxu0 }
0x19a3   : > { %v4434_v49 = vadd.f32 %v7142_v26, %v6184_v41  ;;  %v4428_v60 = vpop.f32.mrb[65].mxu0 }
0x19a4   : > { %v4429_v55 = vadd.f32 %v6183_v34, %v4428_v60 }
0x19a5   : > { %v4470_v25 = vsel %vm834_vm3, %v4434_v49, -inf }
0x19a6   : > { %4471 = vmax.xlane.f32.xlu1 %v4470_v25  ;;  %v7145_v23 = vpop.f32.mrb[66].mxu0  ;;  %v4467_v42 = vsel %vm834_vm3, %v4429_v55, -inf }
0x19a7   : > { %v4444_v6 = vadd.f32 %v7145_v23, %v6186_v57  ;;  %v4438_v43 = vpop.f32.mrb[67].mxu0  ;;  %4468 = vmax.xlane.f32.xlu0 %v4467_v42 }
0x19a8   : > { %v4439_v38 = vadd.f32 %v6185_v61, %v4438_v43 }
0x19a9   : > { %v4476_v16 = vsel %vm834_vm3, %v4444_v6, -inf }
0x19aa   : > { %v7148_v21 = vpop.f32.mrb[68].mxu0  ;;  %v4473_v24 = vsel %vm834_vm3, %v4439_v38, -inf }
0x19ab   : > { %v4454_v39 = vadd.f32 %v7148_v21, %v6188_v29  ;;  %v4448_v44 = vpop.f32.mrb[69].mxu0  ;;  %4477 = vmax.xlane.f32.xlu0 %v4476_v16 }
0x19ac   : > { %v4449_v54 = vadd.f32 %v6187_v3, %v4448_v44 }
0x19ad   : > { %v4482_v33 = vsel %vm834_vm3, %v4454_v39, -inf }
0x19ae   : > { %4483 = vmax.xlane.f32.xlu1 %v4482_v33  ;;  %v7151_v1 = vpop.f32.mrb[70].mxu0  ;;  %v4479_v35 = vsel %vm834_vm3, %v4449_v54, -inf }
0x19af   : > { %v10306_v0 = vadd.f32 %v7151_v1, %v6190_v56  ;;  %v4458_v2 = vpop.f32.mrb[71].mxu0  ;;  %4474 = vmax.xlane.f32.xlu0 %v4473_v24 }
0x19b0   : > { %v10313_v9 = vadd.f32 %v6189_v11, %v4458_v2 }
0x19b1   : > { %v4488_v12 = vsel %vm834_vm3, %v10306_v0, -inf }
0x19b2   : > { %4489 = vmax.xlane.f32.xlu1 %v4488_v12  ;;  %v4485_v8 = vsel %vm834_vm3, %v10313_v9, -inf }
0x19b3   : > { %4480 = vmax.xlane.f32.xlu0 %v4479_v35 }
0x19b7   : > { %4486 = vmax.xlane.f32.xlu0 %v4485_v8 }
0x19c3   : > { %8083 = vrot.lane.b32.xlu1 %v9912_v19, %s8642_s19 }
0x19c7   : > { %8088 = vrot.lane.b32.xlu1 %v9916_v13, %s8642_s19 }
0x19cb   : > { %8093 = vrot.lane.b32.xlu1 %v9920_v15, %s8642_s19 }
0x19cd   : > { %8078 = vrot.lane.b32.xlu0 %v9904_v48, %s8642_s19 }
0x19cf   : > { %8103 = vrot.lane.b32.xlu1 %v9912_v19, %s8643_s12 }
0x19d1   : > { %8098 = vrot.lane.b32.xlu0 %v9904_v48, %s8643_s12 }
0x1a33   : > { %v4472_v47 = vpop.xlane.xlu1 %4471 }
0x1a34   : > { %v4492_v46 = vsub.f32 %v4434_v49, %v4472_v47  ;;  %v4469_v52 = vpop.xlane.xlu0 %4468 }
0x1a35   : > { %v4491_v41 = vsub.f32 %v4429_v55, %v4469_v52 }
0x1a36   : > { %v4501_v34 = vmul.f32 1.442695, %v4492_v46 }
0x1a37   : > { %v4499_v26 = vmul.f32 1.442695, %v4491_v41 }
0x1a38   : > { %8393 = vpow2.f32 %v4501_v34  ;;  %v4478_v60 = vpop.xlane.xlu0 %4477 }
0x1a39   : > { %8395 = vpow2.f32 %v4499_v26  ;;  %v4494_v57 = vsub.f32 %v4444_v6, %v4478_v60 }
0x1a3b   : > { %v4505_v25 = vmul.f32 1.442695, %v4494_v57  ;;  %v4484_v23 = vpop.xlane.xlu1 %4483 }
0x1a3c   : > { %v4496_v42 = vsub.f32 %v4454_v39, %v4484_v23  ;;  %v4475_v43 = vpop.xlane.xlu0 %4474 }
0x1a3d   : > { %8397 = vpow2.f32 %v4505_v25  ;;  %v4493_v61 = vsub.f32 %v4439_v38, %v4475_v43 }
0x1a3e   : > { %v4509_v29 = vmul.f32 1.442695, %v4496_v42 }
0x1a3f   : > { %v4503_v16 = vmul.f32 1.442695, %v4493_v61  ;;  %v4490_v21 = vpop.xlane.xlu1 %4489 }
0x1a40   : > { %v4481_v44 = vpop.xlane.xlu0 %4480 }
0x1a41   : > { %8399 = vpow2.f32 %v4503_v16  ;;  %v4495_v49 = vsub.f32 %v4449_v54, %v4481_v44 }
0x1a42   : > { %v10330_v3 = vpop.eup %8393  ;;  %8401 = vpow2.f32 %v4509_v29 }
0x1a43   : > { %v10332_v55 = vpop.eup %8395  ;;  %v4507_v56 = vmul.f32 1.442695, %v4495_v49  ;;  %v8084_v33 = vpop.permute.xlu1 %8083  ;;  %v4518_v6 = vsel %vm834_vm3, %v10330_v3, 0.0 }
0x1a44   : > { %4519 = vadd.xlane.f32.xlu1 %v4518_v6  ;;  %v4487_v39 = vpop.xlane.xlu0 %4486  ;;  %v4515_v38 = vsel %vm834_vm3, %v10332_v55, 0.0  ;;  %v8086_v11 = vunpack.i.h.bf16 %v8084_v33  ;;  %v8085_v12 = vunpack.i.l.bf16 %v8084_v33  ;;  %v4498_v6 = vsub.f32 %v10306_v0, %v4490_v21 }
0x1a45   : > { %4516 = vadd.xlane.f32.xlu0 %v4515_v38  ;;  %8403 = vpow2.f32 %v4507_v56 }
0x1a46   : > { %v7652_v34 = vpack.c.bf16 %v8086_v11, %v8085_v12  ;;  %v4513_v38 = vmul.f32 1.442695, %v4498_v6 }
0x1a47   : > { %v10338_v1 = vpop.eup %8397  ;;  %v8089_v54 = vpop.permute.xlu1 %8088 }
0x1a48   : > { %v8079_v24 = vpop.permute.xlu0 %8078  ;;  %v4524_v2 = vsel %vm834_vm3, %v10338_v1, 0.0  ;;  %v8091_v26 = vunpack.i.h.bf16 %v8089_v54  ;;  %v8090_v60 = vunpack.i.l.bf16 %v8089_v54  ;;  %v4497_v54 = vsub.f32 %v10313_v9, %v4487_v39 }
0x1a49   : > { %v8081_v35 = vunpack.i.h.bf16 %v8079_v24  ;;  %v8080_v8 = vunpack.i.l.bf16 %v8079_v24  ;;  %4525 = vadd.xlane.f32.xlu1 %v4524_v2  ;;  %8405 = vpow2.f32 %v4513_v38 }
0x1a4a   : > { %v7656_v42 = vpack.c.bf16 %v8091_v26, %v8090_v60  ;;  %v4511_v24 = vmul.f32 1.442695, %v4497_v54 }
0x1a4b   : > { %v10342_v47 = vpop.eup %8399  ;;  %v7648_v46 = vpack.c.bf16 %v8081_v35, %v8080_v8  ;;  %v8094_v57 = vpop.permute.xlu1 %8093 }
0x1a4c   : > { %v4521_v52 = vsel %vm834_vm3, %v10342_v47, 0.0  ;;  %v10346_v41 = vpop.eup %8401  ;;  %v8096_v43 = vunpack.i.h.bf16 %v8094_v57  ;;  %v8095_v61 = vunpack.i.l.bf16 %v8094_v57  ;;  %v8099_v29 = vpop.permute.xlu0 %8098  ;;  %8407 = vpow2.f32 %v4511_v24 }
0x1a4d   : > { %4522 = vadd.xlane.f32.xlu0 %v4521_v52  ;;  %7649 = vmatprep.subr.bf16.mxu1 %v7648_v46  ;;  %v4530_v25 = vsel %vm834_vm3, %v10346_v41, 0.0  ;;  %v8101_v49 = vunpack.i.h.bf16 %v8099_v29  ;;  %v8100_v56 = vunpack.i.l.bf16 %v8099_v29 }
0x1a4e   : > { %7651 = vmatpush3.bf16.msra.mxu1 %v7648_v46  ;;  %v7660_v44 = vpack.c.bf16 %v8096_v43, %v8095_v61 }
0x1a4f   : > { %7653 = vmatprep.subr.bf16.mxu1 %v7652_v34  ;;  %v10350_v23 = vpop.eup %8403  ;;  %v7664_v33 = vpack.c.bf16 %v8101_v49, %v8100_v56 }
0x1a50   : > { %v4527_v16 = vsel %vm834_vm3, %v10350_v23, 0.0 }
0x1a51   : > { %4531 = vadd.xlane.f32.xlu0 %v4530_v25 }
0x1a52   : > { %7655 = vmatpush3.bf16.msra.mxu1 %v7652_v34 }
0x1a53   : > { %7657 = vmatprep.subr.bf16.mxu1 %v7656_v42 }
0x1a55   : > { %4528 = vadd.xlane.f32.xlu0 %v4527_v16 }
0x1a56   : > { %7659 = vmatpush3.bf16.msra.mxu1 %v7656_v42 }
0x1a57   : > { %7661 = vmatprep.subr.bf16.mxu1 %v7660_v44 }
0x1a5a   : > { %8113 = vrot.lane.b32.xlu1 %v9920_v15, %s8643_s12  ;;  %7663 = vmatpush3.bf16.msra.mxu1 %v7660_v44 }
0x1a5b   : > { %7666 = vmatprep.subr.msk.bf16.mxu1 %vm8954_vm2, %v7664_v33 }
0x1a5e   : > { %4767 = vrot.lane.b32.xlu1 %v9940_v36, %s8644_s16  ;;  %v10372_v36 = vpop.eup %8405 }
0x1a5f   : > { %v10376_v0 = vpop.eup %8407 }
0x1a6b   : > { %8108 = vrot.lane.b32.xlu0 %v9916_v13, %s8643_s12 }
0x1a6f   : > { %4765 = vrot.lane.b32.xlu0 %v9906_v4, %s8644_s16  ;;  %v4536_v4 = vsel %vm834_vm3, %v10372_v36, 0.0 }
0x1a73   : > { %4769 = vrot.lane.b32.xlu0 %v9942_v27, %s8644_s16  ;;  %v4533_v27 = vsel %vm834_vm3, %v10376_v0, 0.0 }
0x1a77   : > { %4773 = vrot.lane.b32.xlu0 %v9950_v7, %s8644_s16  ;;  %v8104_v7 = vpop.permute.xlu1 %8103 }
0x1a78   : > { %v8106_v12 = vunpack.i.h.bf16 %v8104_v7  ;;  %v8105_v35 = vunpack.i.l.bf16 %v8104_v7 }
0x1a7b   : > { %4777 = vrot.lane.b32.xlu0 %v9958_v37, %s8644_s16 }
0x1a82   : > { %4537 = vadd.xlane.f32.xlu1 %v4536_v4 }
0x1a86   : > { %4534 = vadd.xlane.f32.xlu1 %v4533_v27 }
0x1a97   : > { %4771 = vrot.lane.b32.xlu1 %v9948_v5, %s8644_s16 }
0x1a9b   : > { %4775 = vrot.lane.b32.xlu1 %v9956_v59, %s8644_s16 }
0x1a9f   : > { %4779 = vrot.lane.b32.xlu1 %v9964_v45, %s8644_s16  ;;  %v7670_v45 = vpack.c.bf16 %v8106_v12, %v8105_v35  ;;  %v6216_v35 = vld [vmem:[%s10781_s2 + $0x1c8] sm:$0xff] }
0x1ad1   : > { %v4520_v37 = vpop.xlane.xlu1 %4519 }
0x1ad2   : > { %8409 = vrcp.f32 %v4520_v37  ;;  %v4517_v9 = vpop.xlane.xlu0 %4516 }
0x1ad3   : > { %8411 = vrcp.f32 %v4517_v9 }
0x1ad6   : > { %v4526_v21 = vpop.xlane.xlu1 %4525 }
0x1ad7   : > { %8413 = vrcp.f32 %v4526_v21 }
0x1ada   : > { %v4523_v39 = vpop.xlane.xlu0 %4522  ;;  %v8114_v42 = vpop.permute.xlu1 %8113 }
0x1adb   : > { %8415 = vrcp.f32 %v4523_v39  ;;  %v8116_v29 = vunpack.i.h.bf16 %v8114_v42 }
0x1adc   : > { %v8410_v2 = vpop.eup %8409 }
0x1add   : > { %v8412_v11 = vpop.eup %8411  ;;  %v4556_v59 = vmul.f32 %v8410_v2, %v10330_v3 }
0x1ade   : > { %v4532_v5 = vpop.xlane.xlu0 %4531  ;;  %v4555_v8 = vmul.f32 %v8412_v11, %v10332_v55  ;;  %v4768_v49 = vpop.permute.xlu1 %4767 }
0x1adf   : > { %8417 = vrcp.f32 %v4532_v5  ;;  %v6215_v5 = vld [vmem:[%s10781_s2 + $0x1c0] sm:$0xff] }
0x1ae0   : > { %7168 = vmatprep.mubr.msk.f32.mxu1 %vm834_vm3, %v4555_v8 }
0x1ae1   : > { %7169 = vmatmul.mubr.msk.f32.vlgmr.msra.gmra.mrb[72].mxu1 %vm834_vm3, %v4556_v59  ;;  %v8414_v52 = vpop.eup %8413 }
0x1ae2   : > { %7669 = vmatpush3.bf16.xpose.msk.msra.mxu1 %vm8954_vm2, %v7664_v33  ;;  %v4529_v46 = vpop.xlane.xlu0 %4528  ;;  %v4558_v57 = vmul.f32 %v8414_v52, %v10338_v1  ;;  %v6218_v52 = vld [vmem:[%s10781_s2 + $0x1d8] sm:$0xff] }
0x1ae3   : > { %8419 = vrcp.f32 %v4529_v46  ;;  %7672 = vmatprep.subr.msk.bf16.mxu1 %vm8954_vm2, %v7670_v45 }
0x1ae5   : > { %v8416_v34 = vpop.eup %8415 }
0x1ae6   : > { %v8109_v26 = vpop.permute.xlu0 %8108  ;;  %v4557_v55 = vmul.f32 %v8416_v34, %v10342_v47  ;;  %v8115_v47 = vunpack.i.l.bf16 %v8114_v42 }
0x1ae7   : > { %v8111_v3 = vunpack.i.h.bf16 %v8109_v26  ;;  %v8110_v60 = vunpack.i.l.bf16 %v8109_v26 }
0x1ae8   : > { %7171 = vmatprep.mubr.msk.f32.mxu1 %vm834_vm3, %v4557_v55  ;;  %v7682_v44 = vpack.c.bf16 %v8116_v29, %v8115_v47 }
0x1ae9   : > { %v7676_v25 = vpack.c.bf16 %v8111_v3, %v8110_v60  ;;  %7172 = vmatmul.mubr.msk.f32.gmra.mrb[74].mxu1 %vm834_vm3, %v4558_v57  ;;  %v8418_v43 = vpop.eup %8417  ;;  %v6217_v57 = vld [vmem:[%s10781_s2 + $0x1d0] sm:$0xff] }
0x1aea   : > { %7675 = vmatpush3.bf16.xpose.msk.msra.mxu1 %vm8954_vm2, %v7670_v45  ;;  %v4560_v1 = vmul.f32 %v8418_v43, %v10346_v41  ;;  %v4766_v41 = vpop.permute.xlu0 %4765 }
0x1aeb   : > { %7678 = vmatprep.subr.msk.bf16.mxu1 %vm8954_vm2, %v7676_v25 }
0x1aed   : > { %v8420_v61 = vpop.eup %8419 }
0x1aee   : > { %v4559_v16 = vmul.f32 %v8420_v61, %v10350_v23  ;;  %v4770_v24 = vpop.permute.xlu0 %4769 }
0x1af0   : > { %7174 = vmatprep.mubr.msk.f32.mxu1 %vm834_vm3, %v4559_v16  ;;  %v6219_v16 = vld [vmem:[%s10781_s2 + $0x1e0] sm:$0xff] }
0x1af1   : > { %7175 = vmatmul.mubr.msk.f32.gmra.mrb[76].mxu1 %vm834_vm3, %v4560_v1  ;;  %v6222_v1 = vld [vmem:[%s10781_s2 + $0x1f8] sm:$0xff] }
0x1af2   : > { %7681 = vmatpush3.bf16.xpose.msk.msra.mxu1 %vm8954_vm2, %v7676_v25  ;;  %v4774_v4 = vpop.permute.xlu0 %4773  ;;  %v6220_v25 = vld [vmem:[%s10781_s2 + $0x1e8] sm:$0xff] }
0x1af3   : > { %7684 = vmatprep.subr.msk.bf16.mxu1 %vm8954_vm2, %v7682_v44 }
0x1afa   : > { %7687 = vmatpush3.bf16.xpose.msk.msra.mxu1 %vm8954_vm2, %v7682_v44 }
0x1b0f   : > { %v4538_v56 = vpop.xlane.xlu1 %4537 }
0x1b10   : > { %8421 = vrcp.f32 %v4538_v56 }
0x1b13   : > { %v4535_v23 = vpop.xlane.xlu1 %4534 }
0x1b14   : > { %8423 = vrcp.f32 %v4535_v23 }
0x1b17   : > { %v4772_v17 = vpop.permute.xlu1 %4771 }
0x1b1a   : > { %v8422_v33 = vpop.eup %8421 }
0x1b1b   : > { %v4562_v54 = vmul.f32 %v8422_v33, %v10372_v36  ;;  %v4776_v27 = vpop.permute.xlu1 %4775 }
0x1b1e   : > { %v8424_v6 = vpop.eup %8423 }
0x1b1f   : > { %v4561_v38 = vmul.f32 %v8424_v6, %v10376_v0  ;;  %v4778_v0 = vpop.permute.xlu0 %4777  ;;  %v4780_v36 = vpop.permute.xlu1 %4779  ;;  %v6221_v6 = vld [vmem:[%s10781_s2 + $0x1f0] sm:$0xff] }
0x1b21   : > { %7177 = vmatprep.mubr.msk.f32.mxu1 %vm834_vm3, %v4561_v38 }
0x1b22   : > { %7178 = vmatmul.mubr.msk.f32.gmra.mrb[78].mxu1 %vm834_vm3, %v4562_v54 }
0x1b23   : > { %7196 = vmatprep.mubr.msk.f32.mxu1 %vm688_vm1, %v4766_v41 }
0x1b26   : > { %7197 = vmatmul.mubr.msk.f32.vlgmr.msra.gmra.mrb[80].mxu1 %vm688_vm1, %v4768_v49 }
0x1b27   : > { %7199 = vmatprep.mubr.msk.f32.mxu1 %vm688_vm1, %v4770_v24 }
0x1b2a   : > { %7200 = vmatmul.mubr.msk.f32.gmra.mrb[82].mxu1 %vm688_vm1, %v4772_v17 }
0x1b2b   : > { %7202 = vmatprep.mubr.msk.f32.mxu1 %vm688_vm1, %v4774_v4 }
0x1b2e   : > { %7203 = vmatmul.mubr.msk.f32.gmra.mrb[84].mxu1 %vm688_vm1, %v4776_v27 }
0x1b2f   : > { %7205 = vmatprep.mubr.msk.f32.mxu1 %vm688_vm1, %v4778_v0 }
0x1b32   : > { %7206 = vmatmul.mubr.msk.f32.gmra.mrb[86].mxu1 %vm688_vm1, %v4780_v36 }
0x1bb4   : > { %v10424_v7 = vpop.f32.mrb[72].mxu1 }
0x1bb5   : > { %v10426_v37 = vpop.f32.mrb[73].mxu1 }
0x1bbc   : > { %v10428_v9 = vpop.f32.mrb[74].mxu1 }
0x1bbd   : > { %v10430_v21 = vpop.f32.mrb[75].mxu1 }
0x1bc4   : > { %v10432_v39 = vpop.f32.mrb[76].mxu1 }
0x1bc5   : > { %v10434_v2 = vpop.f32.mrb[77].mxu1 }
0x1bf5   : > { %v10436_v11 = vpop.f32.mrb[78].mxu1 }
0x1bf6   : > { %v10438_v12 = vpop.f32.mrb[79].mxu1 }
0x1bf9   : > { %v7198_v8 = vpop.f32.mrb[80].mxu1 }
0x1bfa   : > { %v4901_v59 = vadd.f32 %v7198_v8, %v6216_v35  ;;  %v4895_v45 = vpop.f32.mrb[81].mxu1 }
0x1bfb   : > { %v4896_v46 = vadd.f32 %v6215_v5, %v4895_v45 }
0x1bfc   : > { %v4937_v34 = vsel %vm834_vm3, %v4901_v59, -inf }
0x1bfd   : > { %4938 = vmax.xlane.f32.xlu1 %v4937_v34  ;;  %v7201_v26 = vpop.f32.mrb[82].mxu1  ;;  %v4934_v55 = vsel %vm834_vm3, %v4896_v46, -inf }
0x1bfe   : > { %v4911_v3 = vadd.f32 %v7201_v26, %v6218_v52  ;;  %v4905_v60 = vpop.f32.mrb[83].mxu1  ;;  %4935 = vmax.xlane.f32.xlu0 %v4934_v55 }
0x1bff   : > { %v4906_v43 = vadd.f32 %v6217_v57, %v4905_v60 }
0x1c00   : > { %v4943_v42 = vsel %vm834_vm3, %v4911_v3, -inf }
0x1c01   : > { %v7204_v61 = vpop.f32.mrb[84].mxu1  ;;  %v4940_v23 = vsel %vm834_vm3, %v4906_v43, -inf }
0x1c02   : > { %v4921_v29 = vadd.f32 %v7204_v61, %v6220_v25  ;;  %v4915_v47 = vpop.f32.mrb[85].mxu1  ;;  %4944 = vmax.xlane.f32.xlu0 %v4943_v42 }
0x1c03   : > { %v4916_v49 = vadd.f32 %v6219_v16, %v4915_v47 }
0x1c04   : > { %v4949_v44 = vsel %vm834_vm3, %v4921_v29, -inf }
0x1c05   : > { %4950 = vmax.xlane.f32.xlu1 %v4949_v44  ;;  %v7207_v56 = vpop.f32.mrb[86].mxu1  ;;  %v4946_v24 = vsel %vm834_vm3, %v4916_v49, -inf }
0x1c06   : > { %v4931_v41 = vadd.f32 %v7207_v56, %v6222_v1  ;;  %v4925_v33 = vpop.f32.mrb[87].mxu1  ;;  %4941 = vmax.xlane.f32.xlu0 %v4940_v23 }
0x1c07   : > { %v4926_v54 = vadd.f32 %v6221_v6, %v4925_v33 }
0x1c08   : > { %v4955_v38 = vsel %vm834_vm3, %v4931_v41, -inf }
0x1c09   : > { %4956 = vmax.xlane.f32.xlu1 %v4955_v38  ;;  %v4952_v17 = vsel %vm834_vm3, %v4926_v54, -inf }
0x1c0a   : > { %4947 = vmax.xlane.f32.xlu0 %v4946_v24 }
0x1c0e   : > { %4953 = vmax.xlane.f32.xlu0 %v4952_v17 }
0x1c1a   : > { %8123 = vrot.lane.b32.xlu1 %v9912_v19, %s10811_s17 }
0x1c24   : > { %8118 = vrot.lane.b32.xlu0 %v9904_v48, %s10811_s17 }
0x1c8a   : > { %v4939_v4 = vpop.xlane.xlu1 %4938 }
0x1c8b   : > { %v4959_v27 = vsub.f32 %v4901_v59, %v4939_v4  ;;  %v4936_v0 = vpop.xlane.xlu0 %4935 }
0x1c8c   : > { %v4958_v36 = vsub.f32 %v4896_v46, %v4936_v0 }
0x1c8d   : > { %v4968_v35 = vmul.f32 1.442695, %v4959_v27 }
0x1c8e   : > { %v4966_v5 = vmul.f32 1.442695, %v4958_v36 }
0x1c8f   : > { %8425 = vpow2.f32 %v4968_v35  ;;  %v4945_v8 = vpop.xlane.xlu0 %4944 }
0x1c90   : > { %8427 = vpow2.f32 %v4966_v5  ;;  %v4961_v45 = vsub.f32 %v4911_v3, %v4945_v8 }
0x1c92   : > { %v4972_v52 = vmul.f32 1.442695, %v4961_v45  ;;  %v4951_v34 = vpop.xlane.xlu1 %4950 }
0x1c93   : > { %v4963_v26 = vsub.f32 %v4921_v29, %v4951_v34  ;;  %v4942_v55 = vpop.xlane.xlu0 %4941 }
0x1c94   : > { %8429 = vpow2.f32 %v4972_v52  ;;  %v4960_v60 = vsub.f32 %v4906_v43, %v4942_v55 }
0x1c95   : > { %v4976_v19 = vmul.f32 1.442695, %v4963_v26 }
0x1c96   : > { %v4970_v57 = vmul.f32 1.442695, %v4960_v60  ;;  %v4957_v25 = vpop.xlane.xlu1 %4956 }
0x1c97   : > { %8431 = vpow2.f32 %v4976_v19  ;;  %v4965_v48 = vsub.f32 %v4931_v41, %v4957_v25  ;;  %v4948_v59 = vpop.xlane.xlu0 %4947 }
0x1c98   : > { %8433 = vpow2.f32 %v4970_v57  ;;  %v4962_v46 = vsub.f32 %v4916_v49, %v4948_v59 }
0x1c99   : > { %v10476_v42 = vpop.eup %8425  ;;  %v4980_v61 = vmul.f32 1.442695, %v4965_v48 }
0x1c9a   : > { %v10478_v47 = vpop.eup %8427  ;;  %v4974_v3 = vmul.f32 1.442695, %v4962_v46  ;;  %v4985_v29 = vsel %vm834_vm3, %v10476_v42, 0.0  ;;  %v8124_v49 = vpop.permute.xlu1 %8123 }
0x1c9b   : > { %8435 = vpow2.f32 %v4980_v61  ;;  %4986 = vadd.xlane.f32.xlu1 %v4985_v29  ;;  %v4954_v43 = vpop.xlane.xlu0 %4953  ;;  %v4982_v16 = vsel %vm834_vm3, %v10478_v47, 0.0  ;;  %v8126_v24 = vunpack.i.h.bf16 %v8124_v49  ;;  %v8125_v17 = vunpack.i.l.bf16 %v8124_v49 }
0x1c9c   : > { %8437 = vpow2.f32 %v4974_v3  ;;  %v4964_v1 = vsub.f32 %v4926_v54, %v4954_v43  ;;  %4983 = vadd.xlane.f32.xlu0 %v4982_v16 }
0x1c9d   : > { %v7692_v35 = vpack.c.bf16 %v8126_v24, %v8125_v17 }
0x1c9e   : > { %v10484_v44 = vpop.eup %8429  ;;  %v4978_v56 = vmul.f32 1.442695, %v4964_v1 }
0x1c9f   : > { %v8119_v23 = vpop.permute.xlu0 %8118  ;;  %v4991_v41 = vsel %vm834_vm3, %v10484_v44, 0.0 }
0x1ca0   : > { %8439 = vpow2.f32 %v4978_v56  ;;  %v8121_v33 = vunpack.i.h.bf16 %v8119_v23  ;;  %v8120_v6 = vunpack.i.l.bf16 %v8119_v23  ;;  %4992 = vadd.xlane.f32.xlu1 %v4991_v41 }
0x1ca1   : > { %v10488_v38 = vpop.eup %8431 }
0x1ca2   : > { %v10490_v4 = vpop.eup %8433  ;;  %v7688_v54 = vpack.c.bf16 %v8121_v33, %v8120_v6  ;;  %v4997_v27 = vsel %vm834_vm3, %v10488_v38, 0.0 }
0x1ca3   : > { %v4988_v0 = vsel %vm834_vm3, %v10490_v4, 0.0 }
0x1ca4   : > { %4998 = vadd.xlane.f32.xlu1 %v4997_v27  ;;  %4989 = vadd.xlane.f32.xlu0 %v4988_v0  ;;  %v5232_v0 = vld [vmem:[#allocation5 + $0x20] sm:$0xff] }
0x1ca5   : > { %v10496_v36 = vpop.eup %8435  ;;  %7689 = vmatprep.subr.bf16.mxu0 %v7688_v54 }
0x1ca6   : > { %v10498_v5 = vpop.eup %8437  ;;  %7691 = vmatpush3.bf16.msra.mxu0 %v7688_v54  ;;  %v5003_v8 = vsel %vm834_vm3, %v10496_v36, 0.0 }
0x1ca7   : > { %7693 = vmatprep.subr.bf16.mxu0 %v7692_v35  ;;  %v4994_v45 = vsel %vm834_vm3, %v10498_v5, 0.0 }
0x1ca8   : > { %5004 = vadd.xlane.f32.xlu1 %v5003_v8  ;;  %4995 = vadd.xlane.f32.xlu0 %v4994_v45  ;;  %v5235_v8 = vld [vmem:[#allocation5 + $0x38] sm:$0xff] }
0x1caa   : > { %v10504_v52 = vpop.eup %8439  ;;  %7695 = vmatpush3.bf16.msra.mxu0 %v7692_v35 }
0x1cab   : > { %v5000_v34 = vsel %vm834_vm3, %v10504_v52, 0.0 }
0x1cac   : > { %5001 = vadd.xlane.f32.xlu1 %v5000_v34 }
0x1cbd   : > { %8133 = vrot.lane.b32.xlu1 %v9920_v15, %s10811_s17 }
0x1cbe   : > { %8128 = vrot.lane.b32.xlu0 %v9916_v13, %s10811_s17 }
0x1cc1   : > { %4259 = vrot.lane.b32.xlu1 %v10264_v32, %s10812_s18 }
0x1cc2   : > { %4257 = vrot.lane.b32.xlu0 %v10266_v10, %s10812_s18 }
0x1cc5   : > { %4726 = vrot.lane.b32.xlu1 %v10424_v7, %s10813_s14 }
0x1cc6   : > { %4724 = vrot.lane.b32.xlu0 %v10426_v37, %s10813_s14 }
0x1cc9   : > { %4263 = vrot.lane.b32.xlu1 %v10268_v53, %s10812_s18 }
0x1cca   : > { %4261 = vrot.lane.b32.xlu0 %v10270_v58, %s10812_s18 }
0x1ccd   : > { %4730 = vrot.lane.b32.xlu1 %v10428_v9, %s10813_s14 }
0x1cce   : > { %4728 = vrot.lane.b32.xlu0 %v10430_v21, %s10813_s14 }
0x1cd1   : > { %4267 = vrot.lane.b32.xlu1 %v10272_v62, %s10812_s18 }
0x1cd2   : > { %4265 = vrot.lane.b32.xlu0 %v10274_v14, %s10812_s18 }
0x1cd5   : > { %4734 = vrot.lane.b32.xlu1 %v10432_v39, %s10813_s14 }
0x1cd6   : > { %4732 = vrot.lane.b32.xlu0 %v10434_v2, %s10813_s14 }
0x1cd9   : > { %4271 = vrot.lane.b32.xlu1 %v10276_v40, %s10812_s18 }
0x1cda   : > { %4269 = vrot.lane.b32.xlu0 %v10278_v63, %s10812_s18  ;;  %s364_s18 = scalar_lea.vmem %s10787_s8, %s10815_s20 }
0x1cdd   : > { %4738 = vrot.lane.b32.xlu1 %v10436_v11, %s10813_s14 }
0x1cde   : > { %4736 = vrot.lane.b32.xlu0 %v10438_v12, %s10813_s14 }
0x1d28   : > { %v4987_v13 = vpop.xlane.xlu1 %4986 }
0x1d29   : > { %v4984_v15 = vpop.xlane.xlu0 %4983 }
0x1d2a   : > { %8441 = vrcp.f32 %v4984_v15 }
0x1d2b   : > { %8443 = vrcp.f32 %v4987_v13 }
0x1d2d   : > { %v4993_v32 = vpop.xlane.xlu1 %4992 }
0x1d31   : > { %v4999_v10 = vpop.xlane.xlu1 %4998  ;;  %v4990_v53 = vpop.xlane.xlu0 %4989 }
0x1d32   : > { %8445 = vrcp.f32 %v4990_v53 }
0x1d33   : > { %8447 = vrcp.f32 %v4993_v32 }
0x1d34   : > { %v8442_v58 = vpop.eup %8441 }
0x1d35   : > { %v5005_v62 = vpop.xlane.xlu1 %5004  ;;  %v4996_v14 = vpop.xlane.xlu0 %4995  ;;  %v5022_v40 = vmul.f32 %v8442_v58, %v10478_v47 }
0x1d36   : > { %8449 = vrcp.f32 %v4996_v14  ;;  %v8444_v55 = vpop.eup %8443 }
0x1d37   : > { %7224 = vmatprep.mubr.msk.f32.mxu0 %vm834_vm3, %v5022_v40  ;;  %8451 = vrcp.f32 %v4999_v10  ;;  %v5023_v25 = vmul.f32 %v8444_v55, %v10476_v42 }
0x1d39   : > { %v5002_v63 = vpop.xlane.xlu1 %5001  ;;  %v8129_v7 = vpop.permute.xlu0 %8128 }
0x1d3a   : > { %v8131_v37 = vunpack.i.h.bf16 %v8129_v7  ;;  %v8130_v9 = vunpack.i.l.bf16 %v8129_v7  ;;  %8453 = vrcp.f32 %v5002_v63 }
0x1d3b   : > { %8455 = vrcp.f32 %v5005_v62 }
0x1d3c   : > { %v7696_v21 = vpack.c.bf16 %v8131_v37, %v8130_v9  ;;  %v8446_v57 = vpop.eup %8445 }
0x1d3d   : > { %v8134_v39 = vpop.permute.xlu1 %8133  ;;  %v4258_v2 = vpop.permute.xlu0 %4257  ;;  %v5024_v61 = vmul.f32 %v8446_v57, %v10490_v4  ;;  %v6255_v57 = vld [vmem:[#allocation8 + $0xa] ss:$0 sm:$0xff] }
0x1d3e   : > { %v8136_v11 = vunpack.i.h.bf16 %v8134_v39  ;;  %v8135_v12 = vunpack.i.l.bf16 %v8134_v39  ;;  %4281 = vst.msk [vmem:[#allocation2] sm:$0xff] %vm1551_vm4, %v4258_v2  ;;  %7697 = vmatprep.subr.bf16.mxu0 %v7696_v21  ;;  %v8448_v48 = vpop.eup %8447 }
0x1d3f   : > { %7699 = vmatpush3.bf16.msra.mxu0 %v7696_v21  ;;  %v5025_v3 = vmul.f32 %v8448_v48, %v10484_v44 }
0x1d40   : > { %v7700_v26 = vpack.c.bf16 %v8136_v11, %v8135_v12  ;;  %v8450_v47 = vpop.eup %8449 }
0x1d41   : > { %v4260_v60 = vpop.permute.xlu1 %4259  ;;  %v4725_v19 = vpop.permute.xlu0 %4724  ;;  %v5026_v42 = vmul.f32 %v8450_v47, %v10498_v5  ;;  %v5234_v5 = vld [vmem:[#allocation5 + $0x30] sm:$0xff] }
0x1d42   : > { %4282 = vst.msk [vmem:[#allocation2 + $0x8] sm:$0xff] %vm1551_vm4, %v4260_v60  ;;  %7701 = vmatprep.subr.bf16.mxu0 %v7700_v26  ;;  %v8452_v29 = vpop.eup %8451  ;;  %v7708_v45 = vpack.c.bf16 %v5235_v8, %v5234_v5 }
0x1d43   : > { %4748 = vst.msk [vmem:[#allocation2] sm:$0xff] %vm2019_vm5, %v4725_v19  ;;  %7703 = vmatpush3.bf16.msra.mxu0 %v7700_v26  ;;  %v5027_v49 = vmul.f32 %v8452_v29, %v10488_v38 }
0x1d44   : > { %v8454_v1 = vpop.eup %8453 }
0x1d45   : > { %v4727_v59 = vpop.permute.xlu1 %4726  ;;  %v4262_v46 = vpop.permute.xlu0 %4261  ;;  %v5028_v44 = vmul.f32 %v8454_v1, %v10504_v52 }
0x1d46   : > { %4749 = vst.msk [vmem:[#allocation2 + $0x8] sm:$0xff] %vm2019_vm5, %v4727_v59  ;;  %7225 = vmatmul.mubr.msk.f32.vlgmr.msra.gmra.mrb[72].mxu0 %vm834_vm3, %v5023_v25  ;;  %v8456_v56 = vpop.eup %8455 }
0x1d47   : > { %4283 = vst.msk [vmem:[#allocation2 + $0x10] sm:$0xff] %vm1551_vm4, %v4262_v46  ;;  %7227 = vmatprep.mubr.msk.f32.mxu0 %vm834_vm3, %v5024_v61  ;;  %v5029_v33 = vmul.f32 %v8456_v56, %v10496_v36  ;;  %v5233_v36 = vld [vmem:[#allocation5 + $0x28] sm:$0xff] }
0x1d48   : > { %v7704_v35 = vpack.c.bf16 %v5233_v36, %v5232_v0 }
0x1d49   : > { %v4264_v43 = vpop.permute.xlu1 %4263  ;;  %v4729_v16 = vpop.permute.xlu0 %4728 }
0x1d4a   : > { %4284 = vst.msk [vmem:[#allocation2 + $0x18] sm:$0xff] %vm1551_vm4, %v4264_v43  ;;  %7228 = vmatmul.mubr.msk.f32.gmra.mrb[74].mxu0 %vm834_vm3, %v5025_v3  ;;  %7705 = vmatprep.subr.bf16.mxu0 %v7704_v35 }
0x1d4b   : > { %4750 = vst.msk [vmem:[#allocation2 + $0x10] sm:$0xff] %vm2019_vm5, %v4729_v16  ;;  %7230 = vmatprep.mubr.msk.f32.mxu0 %vm834_vm3, %v5026_v42  ;;  %7707 = vmatpush3.bf16.msra.mxu0 %v7704_v35 }
0x1d4c   : > { %7709 = vmatprep.subr.bf16.mxu0 %v7708_v45 }
0x1d4d   : > { %v4731_v23 = vpop.permute.xlu1 %4730  ;;  %v4266_v41 = vpop.permute.xlu0 %4265 }
0x1d4e   : > { %4751 = vst.msk [vmem:[#allocation2 + $0x18] sm:$0xff] %vm2019_vm5, %v4731_v23  ;;  %7231 = vmatmul.mubr.msk.f32.gmra.mrb[76].mxu0 %vm834_vm3, %v5027_v49 }
0x1d4f   : > { %4285 = vst.msk [vmem:[#allocation2 + $0x20] sm:$0xff] %vm1551_vm4, %v4266_v41  ;;  %7233 = vmatprep.mubr.msk.f32.mxu0 %vm834_vm3, %v5028_v44  ;;  %7711 = vmatpush3.bf16.msra.mxu0 %v7708_v45 }
0x1d51   : > { %v4268_v6 = vpop.permute.xlu1 %4267  ;;  %v4733_v24 = vpop.permute.xlu0 %4732 }
0x1d52   : > { %4286 = vst.msk [vmem:[#allocation2 + $0x28] sm:$0xff] %vm1551_vm4, %v4268_v6  ;;  %7234 = vmatmul.mubr.msk.f32.gmra.mrb[78].mxu0 %vm834_vm3, %v5029_v33 }
0x1d53   : > { %4752 = vst.msk [vmem:[#allocation2 + $0x20] sm:$0xff] %vm2019_vm5, %v4733_v24 }
0x1d55   : > { %v4735_v38 = vpop.permute.xlu1 %4734  ;;  %v4270_v17 = vpop.permute.xlu0 %4269 }
0x1d56   : > { %4753 = vst.msk [vmem:[#allocation2 + $0x28] sm:$0xff] %vm2019_vm5, %v4735_v38 }
0x1d57   : > { %4287 = vst.msk [vmem:[#allocation2 + $0x30] sm:$0xff] %vm1551_vm4, %v4270_v17 }
0x1d59   : > { %v4272_v4 = vpop.permute.xlu1 %4271  ;;  %v4737_v54 = vpop.permute.xlu0 %4736 }
0x1d5a   : > { %4288 = vst.msk [vmem:[#allocation2 + $0x38] sm:$0xff] %vm1551_vm4, %v4272_v4 }
0x1d5b   : > { %4754 = vst.msk [vmem:[#allocation2 + $0x30] sm:$0xff] %vm2019_vm5, %v4737_v54 }
0x1d5d   : > { %v4739_v27 = vpop.permute.xlu1 %4738 }
0x1d5e   : > { %4755 = vst.msk [vmem:[#allocation2 + $0x38] sm:$0xff] %vm2019_vm5, %v4739_v27 }
0x1e19   : > { %v7226_v52 = vpop.f32.mrb[72].mxu0 }
0x1e1a   : > { %5193 = vrot.lane.b32.xlu1 %v7226_v52, %s10814_s30  ;;  %v5144_v34 = vpop.f32.mrb[73].mxu0 }
0x1e1b   : > { %5191 = vrot.lane.b32.xlu0 %v5144_v34, %s10814_s30 }
0x1e1d   : > { %v7229_v13 = vpop.f32.mrb[74].mxu0 }
0x1e1e   : > { %5197 = vrot.lane.b32.xlu1 %v7229_v13, %s10814_s30  ;;  %v5154_v15 = vpop.f32.mrb[75].mxu0 }
0x1e1f   : > { %5195 = vrot.lane.b32.xlu0 %v5154_v15, %s10814_s30 }
0x1e21   : > { %v7232_v32 = vpop.f32.mrb[76].mxu0 }
0x1e22   : > { %5201 = vrot.lane.b32.xlu1 %v7232_v32, %s10814_s30  ;;  %v5164_v10 = vpop.f32.mrb[77].mxu0 }
0x1e23   : > { %5199 = vrot.lane.b32.xlu0 %v5164_v10, %s10814_s30 }
0x1e25   : > { %v7235_v53 = vpop.f32.mrb[78].mxu0 }
0x1e26   : > { %5205 = vrot.lane.b32.xlu1 %v7235_v53, %s10814_s30  ;;  %v5174_v58 = vpop.f32.mrb[79].mxu0 }
0x1e27   : > { %5203 = vrot.lane.b32.xlu0 %v5174_v58, %s10814_s30 }
0x1e8c   : > { %v5194_v62 = vpop.permute.xlu1 %5193 }
0x1e8d   : > { %5216 = vst.msk [vmem:[#allocation2 + $0x8] sm:$0xff] %vm2487_vm6, %v5194_v62  ;;  %v5192_v14 = vpop.permute.xlu0 %5191 }
0x1e8e   : > { %5215 = vst.msk [vmem:[#allocation2] sm:$0xff] %vm2487_vm6, %v5192_v14 }
0x1e90   : > { %v5198_v40 = vpop.permute.xlu1 %5197 }
0x1e91   : > { %5218 = vst.msk [vmem:[#allocation2 + $0x18] sm:$0xff] %vm2487_vm6, %v5198_v40  ;;  %v5196_v63 = vpop.permute.xlu0 %5195 }
0x1e92   : > { %5217 = vst.msk [vmem:[#allocation2 + $0x10] sm:$0xff] %vm2487_vm6, %v5196_v63 }
0x1e94   : > { %v5202_v7 = vpop.permute.xlu1 %5201  ;;  %v5224_v21 = vld [vmem:[#allocation2 + $0x8] sm:$0xff] }
0x1e95   : > { %5220 = vst.msk [vmem:[#allocation2 + $0x28] sm:$0xff] %vm2487_vm6, %v5202_v7  ;;  %v5200_v37 = vpop.permute.xlu0 %5199  ;;  %v5223_v9 = vld [vmem:[#allocation2] sm:$0xff] }
0x1e96   : > { %5219 = vst.msk [vmem:[#allocation2 + $0x20] sm:$0xff] %vm2487_vm6, %v5200_v37  ;;  %7244 = vmatprep.mubr.msk.f32.mxu0 %vm381_vm0, %v5223_v9 }
0x1e97   : > { %7245 = vmatmul.mubr.msk.f32.vlgmr.msra.gmra.mrb[80].mxu0 %vm381_vm0, %v5224_v21 }
0x1e98   : > { %v5206_v39 = vpop.permute.xlu1 %5205  ;;  %v5226_v12 = vld [vmem:[#allocation2 + $0x18] sm:$0xff] }
0x1e99   : > { %5222 = vst.msk [vmem:[#allocation2 + $0x38] sm:$0xff] %vm2487_vm6, %v5206_v39  ;;  %v5204_v2 = vpop.permute.xlu0 %5203  ;;  %v5225_v11 = vld [vmem:[#allocation2 + $0x10] sm:$0xff] }
0x1e9a   : > { %5221 = vst.msk [vmem:[#allocation2 + $0x30] sm:$0xff] %vm2487_vm6, %v5204_v2  ;;  %7247 = vmatprep.mubr.msk.f32.mxu0 %vm381_vm0, %v5225_v11 }
0x1e9b   : > { %7248 = vmatmul.mubr.msk.f32.gmra.mrb[82].mxu0 %vm381_vm0, %v5226_v12 }
0x1e9c   : > { %v5228_v55 = vld [vmem:[#allocation2 + $0x28] sm:$0xff] }
0x1e9d   : > { %v5227_v26 = vld [vmem:[#allocation2 + $0x20] sm:$0xff] }
0x1e9e   : > { %7250 = vmatprep.mubr.msk.f32.mxu0 %vm381_vm0, %v5227_v26 }
0x1e9f   : > { %7251 = vmatmul.mubr.msk.f32.gmra.mrb[84].mxu0 %vm381_vm0, %v5228_v55 }
0x1ea0   : > { %v5230_v19 = vld [vmem:[#allocation2 + $0x38] sm:$0xff] }
0x1ea1   : > { %v5229_v60 = vld [vmem:[#allocation2 + $0x30] sm:$0xff] }
0x1ea2   : > { %7253 = vmatprep.mubr.msk.f32.mxu0 %vm381_vm0, %v5229_v60 }
0x1ea3   : > { %7254 = vmatmul.mubr.msk.f32.gmra.mrb[86].mxu0 %vm381_vm0, %v5230_v19 }
0x1f6a   : > { %v7246_v25 = vpop.f32.mrb[80].mxu0 }
0x1f6b   : > { %v5366_v48 = vadd.f32 %v7246_v25, %v9799_v18  ;;  %v5326_v59 = vpop.f32.mrb[81].mxu0 }
0x1f6c   : > { %v5365_v46 = vadd.f32 %v5326_v59, %v9801_v30 }
0x1f6d   : > { %v10602_v61 = vadd.f32 %v6255_v57, %v5366_v48 }
0x1f6e   : > { %v10604_v47 = vadd.f32 %v6255_v57, %v5365_v46  ;;  %v7249_v3 = vpop.f32.mrb[82].mxu0 }
0x1f6f   : > { %v5368_v29 = vadd.f32 %v7249_v3, %v9809_v31  ;;  %v5336_v43 = vpop.f32.mrb[83].mxu0  ;;  %v5388_v16 = vsel %vm381_vm0, %v10602_v61, 0.0 }
0x1f70   : > { %v5367_v42 = vadd.f32 %v5336_v43, %v9811_v22  ;;  %5389 = vadd.xlane.f32.xlu1 %v5388_v16  ;;  %v5385_v18 = vsel %vm381_vm0, %v10604_v47, 0.0 }
0x1f71   : > { %v10612_v1 = vadd.f32 %v6255_v57, %v5368_v29  ;;  %5386 = vadd.xlane.f32.xlu0 %v5385_v18  ;;  %v5515_v18 = vld [vmem:[#allocation7 + $0x28] sm:$0xff] }
0x1f72   : > { %v7252_v30 = vpop.f32.mrb[84].mxu0  ;;  %v10617_v23 = vadd.f32 %v6255_v57, %v5367_v42  ;;  %v5514_v42 = vld [vmem:[#allocation7 + $0x20] sm:$0xff] }
0x1f73   : > { %v5370_v49 = vadd.f32 %v7252_v30, %v9819_v28  ;;  %v5346_v56 = vpop.f32.mrb[85].mxu0  ;;  %v5394_v31 = vsel %vm381_vm0, %v10612_v1, 0.0  ;;  %v7712_v30 = vpack.c.bf16 %v5515_v18, %v5514_v42 }
0x1f74   : > { %v5369_v41 = vadd.f32 %v5346_v56, %v9821_v20  ;;  %v5391_v17 = vsel %vm381_vm0, %v10617_v23, 0.0  ;;  %v5517_v56 = vld [vmem:[#allocation7 + $0x38] sm:$0xff] }
0x1f75   : > { %v10620_v44 = vadd.f32 %v6255_v57, %v5370_v49  ;;  %5395 = vadd.xlane.f32.xlu0 %v5394_v31  ;;  %7713 = vmatprep.subr.bf16.mxu1 %v7712_v30  ;;  %v5516_v49 = vld [vmem:[#allocation7 + $0x30] sm:$0xff] }
0x1f76   : > { %v7255_v22 = vpop.f32.mrb[86].mxu0  ;;  %v10625_v38 = vadd.f32 %v6255_v57, %v5369_v41  ;;  %7715 = vmatpush3.bf16.msra.mxu1 %v7712_v30  ;;  %v7716_v31 = vpack.c.bf16 %v5517_v56, %v5516_v49  ;;  %v6267_v41 = vld [vmem:[%s10784_s5 + $0x80] sm:$0xff] }
0x1f77   : > { %v5372_v33 = vadd.f32 %v7255_v22, %v9829_v51  ;;  %v5356_v6 = vpop.f32.mrb[87].mxu0  ;;  %v5400_v24 = vsel %vm381_vm0, %v10620_v44, 0.0  ;;  %v6268_v22 = vld [vmem:[%s10784_s5 + $0x88] sm:$0xff] }
0x1f78   : > { %v5371_v28 = vadd.f32 %v5356_v6, %v9831_v50  ;;  %5401 = vadd.xlane.f32.xlu1 %v5400_v24  ;;  %v5397_v51 = vsel %vm381_vm0, %v10625_v38, 0.0  ;;  %7717 = vmatprep.subr.bf16.mxu1 %v7716_v31  ;;  %v7720_v6 = vpack.c.bf16 %v6268_v22, %v6267_v41  ;;  %v6270_v24 = vld [vmem:[%s10784_s5 + $0x98] sm:$0xff] }
0x1f79   : > { %v10630_v4 = vadd.f32 %v6255_v57, %v5372_v33  ;;  %5392 = vadd.xlane.f32.xlu0 %v5391_v17  ;;  %v6269_v33 = vld [vmem:[%s10784_s5 + $0x90] sm:$0xff]  ;;  %v6271_v17 = vld [vmem:[%s10784_s5 + $0xa0] sm:$0xff] }
0x1f7a   : > { %v10634_v54 = vadd.f32 %v6255_v57, %v5371_v28  ;;  %7719 = vmatpush3.bf16.msra.mxu1 %v7716_v31  ;;  %v7724_v28 = vpack.c.bf16 %v6270_v24, %v6269_v33  ;;  %7721 = vmatprep.subr.bf16.mxu0 %v7720_v6 }
0x1f7b   : > { %v5406_v20 = vsel %vm381_vm0, %v10630_v4, 0.0  ;;  %7723 = vmatpush3.bf16.msra.mxu0 %v7720_v6 }
0x1f7c   : > { %5407 = vadd.xlane.f32.xlu1 %v5406_v20  ;;  %v5403_v50 = vsel %vm381_vm0, %v10634_v54, 0.0  ;;  %v6272_v20 = vld [vmem:[%s10784_s5 + $0xa8] sm:$0xff]  ;;  %7725 = vmatprep.subr.bf16.mxu0 %v7724_v28 }
0x1f7d   : > { %5398 = vadd.xlane.f32.xlu0 %v5397_v51  ;;  %v7728_v51 = vpack.c.bf16 %v6272_v20, %v6271_v17 }
0x1f7f   : > { %7727 = vmatpush3.bf16.msra.mxu0 %v7724_v28 }
0x1f80   : > { %7729 = vmatprep.subr.bf16.mxu0 %v7728_v51 }
0x1f81   : > { %5404 = vadd.xlane.f32.xlu0 %v5403_v50 }
0x1f83   : > { %7731 = vmatpush3.bf16.msra.mxu0 %v7728_v51 }
0x1ffd   : > { %v5390_v27 = vpop.xlane.xlu1 %5389 }
0x1ffe   : > { %v5410_v0 = vmul.f32 0.03125, %v5390_v27  ;;  %v5387_v36 = vpop.xlane.xlu0 %5386 }
0x1fff   : > { %v5409_v35 = vmul.f32 0.03125, %v5387_v36 }
0x2000   : > { %v10641_v5 = vsub.f32 %v10602_v61, %v5410_v0 }
0x2001   : > { %v10644_v8 = vsub.f32 %v10604_v47, %v5409_v35 }
0x2002   : > { %v5396_v45 = vpop.xlane.xlu0 %5395  ;;  %v5426_v52 = vmul.f32 %v10641_v5, %v10641_v5 }
0x2003   : > { %v5412_v34 = vmul.f32 0.03125, %v5396_v45  ;;  %v5425_v13 = vmul.f32 %v10644_v8, %v10644_v8 }
0x2004   : > { %v5436_v15 = vsel %vm381_vm0, %v5426_v52, 0.0 }
0x2005   : > { %v10652_v32 = vsub.f32 %v10612_v1, %v5412_v34  ;;  %v5402_v10 = vpop.xlane.xlu1 %5401  ;;  %5437 = vadd.xlane.f32.xlu1 %v5436_v15  ;;  %v5433_v53 = vsel %vm381_vm0, %v5425_v13, 0.0 }
0x2006   : > { %v5414_v58 = vmul.f32 0.03125, %v5402_v10  ;;  %v5393_v62 = vpop.xlane.xlu0 %5392  ;;  %5434 = vadd.xlane.f32.xlu0 %v5433_v53 }
0x2007   : > { %v5411_v14 = vmul.f32 0.03125, %v5393_v62  ;;  %v5428_v40 = vmul.f32 %v10652_v32, %v10652_v32 }
0x2008   : > { %v10658_v63 = vsub.f32 %v10620_v44, %v5414_v58 }
0x2009   : > { %v10661_v7 = vsub.f32 %v10617_v23, %v5411_v14  ;;  %v5408_v37 = vpop.xlane.xlu1 %5407  ;;  %v5442_v9 = vsel %vm381_vm0, %v5428_v40, 0.0 }
0x200a   : > { %v5416_v21 = vmul.f32 0.03125, %v5408_v37  ;;  %v5399_v39 = vpop.xlane.xlu0 %5398  ;;  %5443 = vadd.xlane.f32.xlu1 %v5442_v9  ;;  %v5430_v2 = vmul.f32 %v10658_v63, %v10658_v63 }
0x200b   : > { %v5413_v11 = vmul.f32 0.03125, %v5399_v39  ;;  %v5427_v12 = vmul.f32 %v10661_v7, %v10661_v7 }
0x200c   : > { %v10669_v26 = vsub.f32 %v10630_v4, %v5416_v21  ;;  %v5448_v55 = vsel %vm381_vm0, %v5430_v2, 0.0  ;;  %v6256_v2 = vld [vmem:[#allocation8 + $0xb] ss:$0 sm:$0xff] }
0x200d   : > { %v10673_v60 = vsub.f32 %v10625_v38, %v5413_v11  ;;  %v5439_v19 = vsel %vm381_vm0, %v5427_v12, 0.0 }
0x200e   : > { %5449 = vadd.xlane.f32.xlu1 %v5448_v55  ;;  %5440 = vadd.xlane.f32.xlu0 %v5439_v19  ;;  %v5405_v57 = vpop.xlane.xlu0 %5404  ;;  %v5432_v25 = vmul.f32 %v10669_v26, %v10669_v26 }
0x200f   : > { %v5415_v48 = vmul.f32 0.03125, %v5405_v57  ;;  %v5429_v59 = vmul.f32 %v10673_v60, %v10673_v60 }
0x2010   : > { %v5454_v46 = vsel %vm381_vm0, %v5432_v25, 0.0 }
0x2011   : > { %v10682_v3 = vsub.f32 %v10634_v54, %v5415_v48  ;;  %v5445_v29 = vsel %vm381_vm0, %v5429_v59, 0.0  ;;  %v6257_v48 = vld [vmem:[#allocation8 + $0xc] ss:$0 sm:$0xff] }
0x2012   : > { %5455 = vadd.xlane.f32.xlu1 %v5454_v46  ;;  %5446 = vadd.xlane.f32.xlu0 %v5445_v29 }
0x2013   : > { %v5431_v43 = vmul.f32 %v10682_v3, %v10682_v3 }
0x2015   : > { %v5451_v16 = vsel %vm381_vm0, %v5431_v43, 0.0 }
0x2016   : > { %5452 = vadd.xlane.f32.xlu0 %v5451_v16 }
0x2092   : > { %v5438_v50 = vpop.xlane.xlu1 %5437 }
0x2093   : > { %v5458_v27 = vmul.f32 0.03125, %v5438_v50  ;;  %v5435_v0 = vpop.xlane.xlu0 %5434 }
0x2094   : > { %v5457_v36 = vmul.f32 0.03125, %v5435_v0 }
0x2095   : > { %v5466_v35 = vadd.f32 1e-05, %v5458_v27 }
0x2096   : > { %v5465_v45 = vadd.f32 1e-05, %v5457_v36  ;;  %v6273_v36 = vld [vmem:[%s10784_s5 + $0xb0] sm:$0xff] }
0x2097   : > { %8457 = vrsqrt.f32 %v5466_v35  ;;  %v5444_v52 = vpop.xlane.xlu1 %5443 }
0x2098   : > { %8459 = vrsqrt.f32 %v5465_v45  ;;  %v5460_v34 = vmul.f32 0.03125, %v5444_v52  ;;  %v6275_v45 = vld [vmem:[%s10784_s5 + $0xc0] sm:$0xff]  ;;  %v6276_v52 = vld [vmem:[%s10784_s5 + $0xc8] sm:$0xff] }
0x209a   : > { %v5468_v13 = vadd.f32 1e-05, %v5460_v34  ;;  %v7736_v34 = vpack.c.bf16 %v6276_v52, %v6275_v45 }
0x209b   : > { %v5450_v15 = vpop.xlane.xlu1 %5449  ;;  %v5441_v10 = vpop.xlane.xlu0 %5440 }
0x209c   : > { %8461 = vrsqrt.f32 %v5468_v13  ;;  %v5462_v53 = vmul.f32 0.03125, %v5450_v15  ;;  %v5459_v58 = vmul.f32 0.03125, %v5441_v10  ;;  %v6277_v13 = vld [vmem:[%s10784_s5 + $0xd0] sm:$0xff]  ;;  %v6278_v15 = vld [vmem:[%s10784_s5 + $0xd8] sm:$0xff] }
0x209d   : > { %v7740_v10 = vpack.c.bf16 %v6278_v15, %v6277_v13 }
0x209e   : > { %v5470_v62 = vadd.f32 1e-05, %v5462_v53  ;;  %v5467_v14 = vadd.f32 1e-05, %v5459_v58  ;;  %v6279_v53 = vld [vmem:[%s10784_s5 + $0xe0] sm:$0xff]  ;;  %v6280_v58 = vld [vmem:[%s10784_s5 + $0xe8] sm:$0xff] }
0x209f   : > { %v5456_v40 = vpop.xlane.xlu1 %5455  ;;  %v5447_v37 = vpop.xlane.xlu0 %5446 }
0x20a0   : > { %8463 = vrsqrt.f32 %v5470_v62  ;;  %v5464_v9 = vmul.f32 0.03125, %v5456_v40  ;;  %v5461_v21 = vmul.f32 0.03125, %v5447_v37  ;;  %v7744_v62 = vpack.c.bf16 %v6280_v58, %v6279_v53  ;;  %v6282_v40 = vld [vmem:[%s10784_s5 + $0xf8] sm:$0xff] }
0x20a1   : > { %v8458_v39 = vpop.eup %8457  ;;  %8465 = vrsqrt.f32 %v5467_v14  ;;  %v6281_v14 = vld [vmem:[%s10784_s5 + $0xf0] sm:$0xff] }
0x20a2   : > { %v8460_v11 = vpop.eup %8459  ;;  %v5482_v12 = vmul.f32 %v8458_v39, %v10641_v5  ;;  %v5472_v55 = vadd.f32 1e-05, %v5464_v9  ;;  %v5469_v19 = vadd.f32 1e-05, %v5461_v21  ;;  %v7748_v37 = vpack.c.bf16 %v6282_v40, %v6281_v14  ;;  %v6258_v9 = vld [vmem:[%s10786_s7 + $0x3] ss:$0 sm:$0xff] }
0x20a3   : > { %v5453_v57 = vpop.xlane.xlu0 %5452  ;;  %v5481_v25 = vmul.f32 %v8460_v11, %v10644_v8 }
0x20a4   : > { %v5494_v59 = vmul.f32 %v6256_v2, %v5482_v12  ;;  %8467 = vrsqrt.f32 %v5472_v55  ;;  %v5463_v46 = vmul.f32 0.03125, %v5453_v57 }
0x20a5   : > { %8469 = vrsqrt.f32 %v5469_v19  ;;  %v5493_v29 = vmul.f32 %v6256_v2, %v5481_v25 }
0x20a6   : > { %v8462_v43 = vpop.eup %8461  ;;  %v5471_v16 = vadd.f32 1e-05, %v5463_v46  ;;  %v5506_v18 = vadd.f32 %v6257_v48, %v5494_v59 }
0x20a7   : > { %v5505_v42 = vadd.f32 %v6257_v48, %v5493_v29  ;;  %v5484_v5 = vmul.f32 %v8462_v43, %v10652_v32 }
0x20a8   : > { %8471 = vrsqrt.f32 %v5471_v16 }
0x20a9   : > { %7264 = vmatprep.mubr.msk.f32.mxu1 %vm381_vm0, %v5505_v42  ;;  %v5496_v56 = vmul.f32 %v6256_v2, %v5484_v5 }
0x20aa   : > { %v8464_v30 = vpop.eup %8463  ;;  %7265 = vmatmul.mubr.msk.f32.vlgmr.msra.gmra.mrb[88].mxu1 %vm381_vm0, %v5506_v18 }
0x20ab   : > { %v8466_v49 = vpop.eup %8465  ;;  %v5486_v31 = vmul.f32 %v8464_v30, %v10658_v63  ;;  %v5508_v28 = vadd.f32 %v6257_v48, %v5496_v56 }
0x20ac   : > { %v5483_v8 = vmul.f32 %v8466_v49, %v10661_v7 }
0x20ad   : > { %v5498_v17 = vmul.f32 %v6256_v2, %v5486_v31 }
0x20ae   : > { %v8468_v41 = vpop.eup %8467  ;;  %v5495_v22 = vmul.f32 %v6256_v2, %v5483_v8 }
0x20af   : > { %v8470_v33 = vpop.eup %8469  ;;  %v5488_v20 = vmul.f32 %v8468_v41, %v10669_v26  ;;  %v5510_v63 = vadd.f32 %v6257_v48, %v5498_v17 }
0x20b0   : > { %v5507_v6 = vadd.f32 %v6257_v48, %v5495_v22  ;;  %v5485_v24 = vmul.f32 %v8470_v33, %v10673_v60 }
0x20b1   : > { %v5500_v0 = vmul.f32 %v6256_v2, %v5488_v20 }
0x20b2   : > { %v8472_v32 = vpop.eup %8471  ;;  %7267 = vmatprep.mubr.msk.f32.mxu1 %vm381_vm0, %v5507_v6  ;;  %v5497_v51 = vmul.f32 %v6256_v2, %v5485_v24 }
0x20b3   : > { %7268 = vmatmul.mubr.msk.f32.gmra.mrb[90].mxu1 %vm381_vm0, %v5508_v28  ;;  %v5487_v7 = vmul.f32 %v8472_v32, %v10682_v3  ;;  %v5512_v26 = vadd.f32 %v6257_v48, %v5500_v0  ;;  %v6274_v3 = vld [vmem:[%s10784_s5 + $0xb8] sm:$0xff] }
0x20b4   : > { %v5509_v50 = vadd.f32 %v6257_v48, %v5497_v51  ;;  %v7732_v35 = vpack.c.bf16 %v6274_v3, %v6273_v36 }
0x20b5   : > { %v5499_v27 = vmul.f32 %v6256_v2, %v5487_v7 }
0x20b6   : > { %7270 = vmatprep.mubr.msk.f32.mxu1 %vm381_vm0, %v5509_v50  ;;  %7733 = vmatprep.subr.bf16.mxu0 %v7732_v35 }
0x20b7   : > { %7271 = vmatmul.mubr.msk.f32.gmra.mrb[92].mxu1 %vm381_vm0, %v5510_v63  ;;  %v5511_v60 = vadd.f32 %v6257_v48, %v5499_v27  ;;  %7735 = vmatpush3.bf16.msra.mxu0 %v7732_v35 }
0x20b8   : > { %7737 = vmatprep.subr.bf16.mxu0 %v7736_v34 }
0x20b9   : > { %7273 = vmatprep.mubr.msk.f32.mxu1 %vm381_vm0, %v5511_v60 }
0x20bb   : > { %7274 = vmatmul.mubr.msk.f32.gmra.mrb[94].mxu1 %vm381_vm0, %v5512_v26  ;;  %7739 = vmatpush3.bf16.msra.mxu0 %v7736_v34 }
0x20bc   : > { %7741 = vmatprep.subr.bf16.mxu0 %v7740_v10 }
0x20bf   : > { %7743 = vmatpush3.bf16.msra.mxu0 %v7740_v10 }
0x20c0   : > { %7745 = vmatprep.subr.bf16.mxu0 %v7744_v62 }
0x20c3   : > { %7747 = vmatpush3.bf16.msra.mxu0 %v7744_v62 }
0x20c4   : > { %7749 = vmatprep.subr.bf16.mxu0 %v7748_v37 }
0x20c7   : > { %7751 = vmatpush3.bf16.msra.mxu0 %v7748_v37 }
0x217d   : > { %v7266_v21 = vpop.f32.mrb[88].mxu1 }
0x217e   : > { %v5618_v39 = vadd.f32 %v7266_v21, %v6258_v9  ;;  %v5612_v2 = vpop.f32.mrb[89].mxu1  ;;  %v6283_v21 = vld [vmem:[#allocation8 + $0xd] ss:$0 sm:$0xff] }
0x217f   : > { %v5613_v11 = vadd.f32 %v6258_v9, %v5612_v2 }
0x2180   : > { %v5660_v12 = vmul.f32 0.70710677, %v5618_v39  ;;  %v5652_v22 = vmul.f32 0.5, %v5618_v39 }
0x2181   : > { %v5659_v55 = vmul.f32 0.70710677, %v5613_v11  ;;  %v5651_v8 = vmul.f32 0.5, %v5613_v11 }
0x2182   : > { %8473 = verf.f32 %v5660_v12 }
0x2183   : > { %8475 = verf.f32 %v5659_v55 }
0x2186   : > { %v7269_v19 = vpop.f32.mrb[90].mxu1 }
0x2187   : > { %v5628_v57 = vadd.f32 %v7269_v19, %v6258_v9  ;;  %v5622_v25 = vpop.f32.mrb[91].mxu1 }
0x2188   : > { %v5623_v48 = vadd.f32 %v6258_v9, %v5622_v25 }
0x2189   : > { %v5662_v59 = vmul.f32 0.70710677, %v5628_v57  ;;  %v5654_v0 = vmul.f32 0.5, %v5628_v57 }
0x218a   : > { %v5661_v46 = vmul.f32 0.70710677, %v5623_v48  ;;  %v7272_v29 = vpop.f32.mrb[92].mxu1  ;;  %v5653_v63 = vmul.f32 0.5, %v5623_v48 }
0x218b   : > { %8477 = verf.f32 %v5662_v59  ;;  %v5638_v43 = vadd.f32 %v7272_v29, %v6258_v9  ;;  %v5632_v16 = vpop.f32.mrb[93].mxu1 }
0x218c   : > { %v8474_v42 = vpop.eup %8473  ;;  %8479 = verf.f32 %v5661_v46  ;;  %v5633_v18 = vadd.f32 %v6258_v9, %v5632_v16 }
0x218d   : > { %v8476_v5 = vpop.eup %8475  ;;  %v5676_v30 = vadd.f32 1.0, %v8474_v42  ;;  %v5664_v49 = vmul.f32 0.70710677, %v5638_v43  ;;  %v5656_v34 = vmul.f32 0.5, %v5638_v43 }
0x218e   : > { %v5675_v56 = vadd.f32 1.0, %v8476_v5  ;;  %v5663_v31 = vmul.f32 0.70710677, %v5633_v18  ;;  %v7275_v41 = vpop.f32.mrb[94].mxu1  ;;  %v5655_v45 = vmul.f32 0.5, %v5633_v18 }
0x218f   : > { %8481 = verf.f32 %v5664_v49  ;;  %v5648_v33 = vadd.f32 %v7275_v41, %v6258_v9  ;;  %v5642_v6 = vpop.f32.mrb[95].mxu1  ;;  %v5684_v17 = vmul.f32 %v5676_v30, %v5652_v22 }
0x2190   : > { %8483 = verf.f32 %v5663_v31  ;;  %v5643_v24 = vadd.f32 %v6258_v9, %v5642_v6  ;;  %v5683_v28 = vmul.f32 %v5675_v56, %v5651_v8 }
0x2191   : > { %v5666_v20 = vmul.f32 0.70710677, %v5648_v33  ;;  %v5658_v40 = vmul.f32 0.5, %v5648_v33 }
0x2192   : > { %v5665_v32 = vmul.f32 0.70710677, %v5643_v24  ;;  %7308 = vmatprep.mubr.f32.mxu0 %v5683_v28  ;;  %v5657_v62 = vmul.f32 0.5, %v5643_v24 }
0x2193   : > { %8485 = verf.f32 %v5666_v20  ;;  %7309 = vmatmul.mubr.f32.vlgmr.msra.gmra.mrb[88].mxu0 %v5684_v17 }
0x2194   : > { %8487 = verf.f32 %v5665_v32 }
0x2195   : > { %v8478_v51 = vpop.eup %8477 }
0x2196   : > { %v8480_v7 = vpop.eup %8479  ;;  %v5678_v50 = vadd.f32 1.0, %v8478_v51 }
0x2197   : > { %v5677_v27 = vadd.f32 1.0, %v8480_v7 }
0x2198   : > { %v5686_v35 = vmul.f32 %v5678_v50, %v5654_v0 }
0x2199   : > { %v8482_v60 = vpop.eup %8481  ;;  %v5685_v26 = vmul.f32 %v5677_v27, %v5653_v63 }
0x219a   : > { %v8484_v36 = vpop.eup %8483  ;;  %v5680_v3 = vadd.f32 1.0, %v8482_v60 }
0x219b   : > { %v5679_v52 = vadd.f32 1.0, %v8484_v36  ;;  %7311 = vmatprep.mubr.f32.mxu0 %v5685_v26 }
0x219c   : > { %7312 = vmatmul.mubr.f32.gmra.mrb[90].mxu0 %v5686_v35  ;;  %v5688_v58 = vmul.f32 %v5680_v3, %v5656_v34 }
0x219d   : > { %v8486_v13 = vpop.eup %8485  ;;  %v5687_v15 = vmul.f32 %v5679_v52, %v5655_v45 }
0x219e   : > { %v8488_v10 = vpop.eup %8487  ;;  %v5682_v53 = vadd.f32 1.0, %v8486_v13 }
0x219f   : > { %v5681_v14 = vadd.f32 1.0, %v8488_v10  ;;  %7314 = vmatprep.mubr.f32.mxu0 %v5687_v15 }
0x21a0   : > { %7315 = vmatmul.mubr.f32.gmra.mrb[92].mxu0 %v5688_v58  ;;  %v5690_v9 = vmul.f32 %v5682_v53, %v5658_v40 }
0x21a1   : > { %v5689_v37 = vmul.f32 %v5681_v14, %v5657_v62 }
0x21a3   : > { %7317 = vmatprep.mubr.f32.mxu0 %v5689_v37 }
0x21a4   : > { %7318 = vmatmul.mubr.f32.gmra.mrb[94].mxu0 %v5690_v9 }
0x2266   : > { %v7310_v39 = vpop.f32.mrb[88].mxu0 }
0x2267   : > { %v5814_v2 = vadd.f32 %v7310_v39, %v10602_v61  ;;  %v5774_v11 = vpop.f32.mrb[89].mxu0 }
0x2268   : > { %v5813_v12 = vadd.f32 %v5774_v11, %v10604_v47 }
0x2269   : > { %v5826_v55 = vadd.f32 %v6283_v21, %v5814_v2 }
0x226a   : > { %v5825_v19 = vadd.f32 %v6283_v21, %v5813_v12 }
0x226b   : > { %5834 = vst.msk [vmem:[%s364_s18 + $0x8] sm:$0xff] %vm381_vm0, %v5826_v55 }
0x226c   : > { %5833 = vst.msk [vmem:[%s364_s18] sm:$0xff] %vm381_vm0, %v5825_v19 }
0x226f   : > { %v7313_v57 = vpop.f32.mrb[90].mxu0 }
0x2270   : > { %v5816_v25 = vadd.f32 %v7313_v57, %v10612_v1  ;;  %v5784_v48 = vpop.f32.mrb[91].mxu0 }
0x2271   : > { %v5815_v61 = vadd.f32 %v5784_v48, %v10617_v23 }
0x2272   : > { %v5828_v59 = vadd.f32 %v6283_v21, %v5816_v25 }
0x2273   : > { %v5827_v46 = vadd.f32 %v6283_v21, %v5815_v61  ;;  %v7316_v29 = vpop.f32.mrb[92].mxu0 }
0x2274   : > { %5836 = vst.msk [vmem:[%s364_s18 + $0x18] sm:$0xff] %vm381_vm0, %v5828_v59  ;;  %v5818_v43 = vadd.f32 %v7316_v29, %v10620_v44  ;;  %v5794_v47 = vpop.f32.mrb[93].mxu0 }
0x2275   : > { %5835 = vst.msk [vmem:[%s364_s18 + $0x10] sm:$0xff] %vm381_vm0, %v5827_v46  ;;  %v5817_v16 = vadd.f32 %v5794_v47, %v10625_v38 }
0x2276   : > { %v5830_v42 = vadd.f32 %v6283_v21, %v5818_v43 }
0x2277   : > { %v5829_v18 = vadd.f32 %v6283_v21, %v5817_v16  ;;  %v7319_v5 = vpop.f32.mrb[94].mxu0 }
0x2278   : > { %5838 = vst.msk [vmem:[%s364_s18 + $0x28] sm:$0xff] %vm381_vm0, %v5830_v42  ;;  %v5820_v1 = vadd.f32 %v7319_v5, %v10630_v4  ;;  %v5804_v23 = vpop.f32.mrb[95].mxu0 }
0x2279   : > { %5837 = vst.msk [vmem:[%s364_s18 + $0x20] sm:$0xff] %vm381_vm0, %v5829_v18  ;;  %v5819_v30 = vadd.f32 %v5804_v23, %v10634_v54 }
0x227a   : > { %v5832_v49 = vadd.f32 %v6283_v21, %v5820_v1 }
0x227b   : > { %v5831_v8 = vadd.f32 %v6283_v21, %v5819_v30 }
0x227c   : > { %5840 = vst.msk [vmem:[%s364_s18 + $0x38] sm:$0xff] %vm381_vm0, %v5832_v49 }
0x227d   : > { %5839 = vst.msk [vmem:[%s364_s18 + $0x30] sm:$0xff] %vm381_vm0, %v5831_v8 }
0x227e PF: > { %s21_s27 = sadd.s32 1, %s8627_s27  }
0x227f   : > { %p18_p6 = scmp.ge.s32.totalorder %s21_s27, 4  }
0x2281   :  { %20 = sbr.rel (!%p18_p6) target bundleno = 3 (0x3), region = 112 }
0x2288   :  { %5862 = vsyncpa [#allocation4], 1 }
0x2289   :  { %5864 = vsyncpa [#allocation4 + $0x1], 1 }
0x228a   :  { %5865 = vsyncpa [#allocation6], 1 }
0x228b   :  { %5866 = vsyncpa [#allocation9], 1 }

</bundles_post_ra>
